<compile_context>
chip_gen: v6e
topology: v6e:2x2x1
jax: 0.10.0
libtpu: 0.0.40
codegen_flags: <defaults>
</compile_context>

<pallas_src>
import jax
import jax.numpy as jnp
from jax.experimental import pallas as pl
from jax.experimental.pallas import tpu as pltpu


def _make_seq_encoder_kernel(seq_len, batch_tile, hidden):
    S, TB, H = seq_len, batch_tile, hidden

    def kernel(ids_ref, emb_ref, wxf_ref, whf_ref, bf_ref,
               wxb_ref, whb_ref, bb_ref, out_ref, xgf_ref, xgb_ref):
        V = emb_ref.shape[0]
        R = S * TB  # rows, ordered time-major / batch-minor: row = t*TB + b

        # ---- Embedding gather as a one-hot matmul on the MXU (dropout = identity in eval).
        ids = ids_ref[...]                                               # (R, 1) int32
        vocab_iota = jax.lax.broadcasted_iota(jnp.int32, (R, V), 1)
        onehot = (ids == vocab_iota).astype(jnp.float32)                 # (R, V)
        x = jnp.dot(onehot, emb_ref[...],
                    preferred_element_type=jnp.float32)                  # (R, E)

        # ---- Input-side gate pre-activations for both directions; biases folded in.
        xgf_ref[...] = jnp.dot(x, wxf_ref[...],
                               preferred_element_type=jnp.float32) + bf_ref[...]
        xgb_ref[...] = jnp.dot(x, wxb_ref[...],
                               preferred_element_type=jnp.float32) + bb_ref[...]

        def cell(gates, c_prev):
            # PyTorch LSTM gate order: i, f, g, o
            i = jax.nn.sigmoid(gates[:, 0 * H:1 * H])
            f = jax.nn.sigmoid(gates[:, 1 * H:2 * H])
            g = jnp.tanh(gates[:, 2 * H:3 * H])
            o = jax.nn.sigmoid(gates[:, 3 * H:4 * H])
            c = f * c_prev + i * g
            h = o * jnp.tanh(c)
            return h, c

        zeros = jnp.zeros((TB, H), dtype=jnp.float32)
        h_f, c_f = zeros, zeros
        h_b, c_b = zeros, zeros
        m_f = jnp.full((TB, H), -jnp.inf, dtype=jnp.float32)
        m_b = jnp.full((TB, H), -jnp.inf, dtype=jnp.float32)

        # Fully-unrolled (S is small & static) time recurrence. Forward walks t = 0..S-1,
        # backward walks t = S-1..0. Only the running max over time of each direction's
        # hidden state is kept: max_t concat(h_f, h_b) == concat(max_t h_f, max_t h_b).
        for t in range(S):
            gf = xgf_ref[pl.ds(t * TB, TB), :] + jnp.dot(
                h_f, whf_ref[...], preferred_element_type=jnp.float32)
            h_f, c_f = cell(gf, c_f)
            m_f = jnp.maximum(m_f, h_f)

            gb = xgb_ref[pl.ds((S - 1 - t) * TB, TB), :] + jnp.dot(
                h_b, whb_ref[...], preferred_element_type=jnp.float32)
            h_b, c_b = cell(gb, c_b)
            m_b = jnp.maximum(m_b, h_b)

        # ---- Final tanh; forward/backward concatenated along the feature axis.
        out_ref[:, 0:H] = jnp.tanh(m_f)
        out_ref[:, H:2 * H] = jnp.tanh(m_b)

    return kernel


def seq_encoder(token_ids, emb_table,
                w_ih_f, w_hh_f, b_ih_f, b_hh_f,
                w_ih_b, w_hh_b, b_ih_b, b_hh_b,
                *, batch_tile=8):
    """token_ids: (B, S) int32; emb_table: (V, E) f32; LSTM weights in PyTorch layout
    (w_ih: (4H, E), w_hh: (4H, H), biases: (4H,)). Returns (B, 2H) f32."""
    B, S = token_ids.shape
    V, E = emb_table.shape
    H = w_hh_f.shape[1]
    TB = batch_tile

    # Pad batch to a multiple of the batch tile (pad rows use token id 0 == padding_idx).
    B_pad = ((B + TB - 1) // TB) * TB
    ids = token_ids.astype(jnp.int32)
    if B_pad != B:
        ids = jnp.pad(ids, ((0, B_pad - B), (0, 0)))
    NT = B_pad // TB

    # (B, S) -> column vector ordered (tile, time, batch-in-tile) so each grid step's
    # ids block is one contiguous (S*TB, 1) slab, time-major inside the kernel.
    ids_col = ids.reshape(NT, TB, S).transpose(0, 2, 1).reshape(NT * S * TB, 1)

    # Pre-transpose weights so kernel matmuls are plain (rows, K) @ (K, 4H); fold biases.
    wxf = w_ih_f.T.astype(jnp.float32)                       # (E, 4H)
    whf = w_hh_f.T.astype(jnp.float32)                       # (H, 4H)
    bf = (b_ih_f + b_hh_f).reshape(1, 4 * H).astype(jnp.float32)
    wxb = w_ih_b.T.astype(jnp.float32)
    whb = w_hh_b.T.astype(jnp.float32)
    bb = (b_ih_b + b_hh_b).reshape(1, 4 * H).astype(jnp.float32)

    kernel = _make_seq_encoder_kernel(S, TB, H)
    full = lambda i: (0, 0)

    grid_spec = pltpu.PrefetchScalarGridSpec(
        num_scalar_prefetch=0,
        grid=(NT,),
        in_specs=[
            pl.BlockSpec((S * TB, 1), lambda i: (i, 0)),     # token ids (column layout)
            pl.BlockSpec((V, E), full),                      # embedding table, VMEM-resident
            pl.BlockSpec((E, 4 * H), full),                  # forward W_ih^T
            pl.BlockSpec((H, 4 * H), full),                  # forward W_hh^T
            pl.BlockSpec((1, 4 * H), full),                  # forward bias
            pl.BlockSpec((E, 4 * H), full),                  # backward W_ih^T
            pl.BlockSpec((H, 4 * H), full),                  # backward W_hh^T
            pl.BlockSpec((1, 4 * H), full),                  # backward bias
        ],
        out_specs=pl.BlockSpec((TB, 2 * H), lambda i: (i, 0)),
        scratch_shapes=[
            pltpu.VMEM((S * TB, 4 * H), jnp.float32),        # forward x-gates
            pltpu.VMEM((S * TB, 4 * H), jnp.float32),        # backward x-gates
        ],
    )

    out = pl.pallas_call(
        kernel,
        out_shape=jax.ShapeDtypeStruct((B_pad, 2 * H), jnp.float32),
        grid_spec=grid_spec,
        compiler_params=pltpu.CompilerParams(
            dimension_semantics=("parallel",)),
    )(ids_col, emb_table.astype(jnp.float32), wxf, whf, bf, wxb, whb, bb)

    return out[:B]


# ----------------------------- pure-JAX reference -----------------------------

def _lstm_direction_ref(x, w_ih, w_hh, b_ih, b_hh, reverse):
    B, S, _ = x.shape
    H = w_hh.shape[1]
    h = jnp.zeros((B, H), jnp.float32)
    c = jnp.zeros((B, H), jnp.float32)
    hs = []
    time_order = range(S - 1, -1, -1) if reverse else range(S)
    hi = jax.lax.Precision.HIGHEST
    for t in time_order:
        gates = (jnp.dot(x[:, t, :], w_ih.T, precision=hi) + b_ih +
                 jnp.dot(h, w_hh.T, precision=hi) + b_hh)
        i, f, g, o = jnp.split(gates, 4, axis=-1)
        i = jax.nn.sigmoid(i)
        f = jax.nn.sigmoid(f)
        g = jnp.tanh(g)
        o = jax.nn.sigmoid(o)
        c = f * c + i * g
        h = o * jnp.tanh(c)
        hs.append(h)
    if reverse:
        hs = hs[::-1]
    return jnp.stack(hs, axis=1)  # (B, S, H)


def seq_encoder_ref(token_ids, emb_table,
                    w_ih_f, w_hh_f, b_ih_f, b_hh_f,
                    w_ih_b, w_hh_b, b_ih_b, b_hh_b):
    x = jnp.take(emb_table, token_ids, axis=0)          # (B, S, E); dropout = identity (eval)
    h_fwd = _lstm_direction_ref(x, w_ih_f, w_hh_f, b_ih_f, b_hh_f, reverse=False)
    h_bwd = _lstm_direction_ref(x, w_ih_b, w_hh_b, b_ih_b, b_hh_b, reverse=True)
    rnn_out = jnp.concatenate([h_fwd, h_bwd], axis=-1)  # (B, S, 2H)
    pooled = jnp.max(rnn_out, axis=1)                   # (B, 2H)  == max_pool1d over seq
    return jnp.tanh(pooled)


if __name__ == "__main__":
    vocab_size, emb_size, hidden_size = 128, 128, 128
    batch_size, seq_len = 16, 8

    key = jax.random.PRNGKey(0)
    ks = jax.random.split(key, 10)

    emb_table = jax.random.normal(ks[0], (vocab_size, emb_size), dtype=jnp.float32)
    emb_table = emb_table.at[0].set(0.0)   # nn.Embedding(padding_idx=0): row 0 is zeros

    def w(k, shape):
        return 0.1 * jax.random.normal(k, shape, dtype=jnp.float32)

    w_ih_f = w(ks[1], (4 * hidden_size, emb_size))
    w_hh_f = w(ks[2], (4 * hidden_size, hidden_size))
    b_ih_f = w(ks[3], (4 * hidden_size,))
    b_hh_f = w(ks[4], (4 * hidden_size,))
    w_ih_b = w(ks[5], (4 * hidden_size, emb_size))
    w_hh_b = w(ks[6], (4 * hidden_size, hidden_size))
    b_ih_b = w(ks[7], (4 * hidden_size,))
    b_hh_b = w(ks[8], (4 * hidden_size,))

    token_ids = jax.random.randint(ks[9], (batch_size, seq_len), 0, vocab_size,
                                   dtype=jnp.int32)

    out = seq_encoder(token_ids, emb_table,
                      w_ih_f, w_hh_f, b_ih_f, b_hh_f,
                      w_ih_b, w_hh_b, b_ih_b, b_hh_b)
    out = jax.block_until_ready(out)

    ref = seq_encoder_ref(token_ids, emb_table,
                          w_ih_f, w_hh_f, b_ih_f, b_hh_f,
                          w_ih_b, w_hh_b, b_ih_b, b_hh_b)

    assert out.shape == (batch_size, 2 * hidden_size)
    max_err = float(jnp.max(jnp.abs(out - ref)))
    assert jnp.allclose(out, ref, atol=1e-3, rtol=1e-3), max_err

    print("KERNEL_OK")
</pallas_src>

<mosaic_0001>
module attributes {stable_mosaic.version = 11 : i64} {
  func.func @kernel(%arg0: i32, %arg1: memref<64x1xi32, #tpu.memory_space<vmem>>, %arg2: memref<128x128xf32, #tpu.memory_space<vmem>>, %arg3: memref<128x512xf32, #tpu.memory_space<vmem>>, %arg4: memref<128x512xf32, #tpu.memory_space<vmem>>, %arg5: memref<1x512xf32, #tpu.memory_space<vmem>>, %arg6: memref<128x512xf32, #tpu.memory_space<vmem>>, %arg7: memref<128x512xf32, #tpu.memory_space<vmem>>, %arg8: memref<1x512xf32, #tpu.memory_space<vmem>>, %arg9: memref<8x256xf32, #tpu.memory_space<vmem>>, %arg10: memref<64x512xf32, #tpu.memory_space<vmem>>, %arg11: memref<64x512xf32, #tpu.memory_space<vmem>>) attributes {dimension_semantics = [#tpu.dimension_semantics<parallel>], iteration_bounds = array<i64: 2>, scalar_prefetch = 0 : i64, scratch_operands = 2 : i64, tpu.core_type = #tpu.core_type<tc>, window_params = [{transform_indices = @transform_0, window_bounds = array<i64: 64, 1>}, {pipeline_mode = #tpu.pipeline_mode<synchronous>, transform_indices = @transform_1, window_bounds = array<i64: 128, 128>}, {pipeline_mode = #tpu.pipeline_mode<synchronous>, transform_indices = @transform_2, window_bounds = array<i64: 128, 512>}, {pipeline_mode = #tpu.pipeline_mode<synchronous>, transform_indices = @transform_3, window_bounds = array<i64: 128, 512>}, {pipeline_mode = #tpu.pipeline_mode<synchronous>, transform_indices = @transform_4, window_bounds = array<i64: 1, 512>}, {pipeline_mode = #tpu.pipeline_mode<synchronous>, transform_indices = @transform_5, window_bounds = array<i64: 128, 512>}, {pipeline_mode = #tpu.pipeline_mode<synchronous>, transform_indices = @transform_6, window_bounds = array<i64: 128, 512>}, {pipeline_mode = #tpu.pipeline_mode<synchronous>, transform_indices = @transform_7, window_bounds = array<i64: 1, 512>}, {transform_indices = @transform_8, window_bounds = array<i64: 8, 256>}]} {
    %c0 = arith.constant 0 : index
    %c0_0 = arith.constant 0 : index
    %0 = vector.load %arg1[%c0, %c0_0] : memref<64x1xi32, #tpu.memory_space<vmem>>, vector<64x1xi32>
    %1 = tpu.iota {dimensions = array<i32: 1>} : vector<64x128xi32>
    %2 = vector.broadcast %0 : vector<64x1xi32> to vector<64x128xi32>
    %3 = arith.cmpi eq, %2, %1 : vector<64x128xi32>
    %4 = arith.extui %3 : vector<64x128xi1> to vector<64x128xi32>
    %5 = arith.sitofp %4 : vector<64x128xi32> to vector<64x128xf32>
    %c0_1 = arith.constant 0 : index
    %c0_2 = arith.constant 0 : index
    %6 = vector.load %arg2[%c0_1, %c0_2] : memref<128x128xf32, #tpu.memory_space<vmem>>, vector<128x128xf32>
    %cst = arith.constant dense<0.000000e+00> : vector<64x128xf32>
    %7 = tpu.matmul %5, %6, %cst {dimension_numbers = #tpu.dot_dimension_numbers<[1], [0], [0], [1], [0, 0, 1, 1], [], []>} : vector<64x128xf32>, vector<128x128xf32>, vector<64x128xf32> -> vector<64x128xf32>
    %c0_3 = arith.constant 0 : index
    %c0_4 = arith.constant 0 : index
    %8 = vector.load %arg3[%c0_3, %c0_4] : memref<128x512xf32, #tpu.memory_space<vmem>>, vector<128x512xf32>
    %cst_5 = arith.constant dense<0.000000e+00> : vector<64x512xf32>
    %9 = tpu.matmul %7, %8, %cst_5 {dimension_numbers = #tpu.dot_dimension_numbers<[1], [0], [0], [1], [0, 0, 1, 1], [], []>} : vector<64x128xf32>, vector<128x512xf32>, vector<64x512xf32> -> vector<64x512xf32>
    %c0_6 = arith.constant 0 : index
    %c0_7 = arith.constant 0 : index
    %10 = vector.load %arg5[%c0_6, %c0_7] : memref<1x512xf32, #tpu.memory_space<vmem>>, vector<1x512xf32>
    %11 = vector.broadcast %10 : vector<1x512xf32> to vector<64x512xf32>
    %12 = arith.addf %9, %11 : vector<64x512xf32>
    %c0_8 = arith.constant 0 : index
    %c0_9 = arith.constant 0 : index
    %13 = vector.load %arg10[%c0_8, %c0_9] : memref<64x512xf32, #tpu.memory_space<vmem>>, vector<64x512xf32>
    tpu.vector_store %arg10[%c0_8, %c0_9], %12 {strides = array<i32>} : memref<64x512xf32, #tpu.memory_space<vmem>>, vector<64x512xf32>,
    %c0_10 = arith.constant 0 : index
    %c0_11 = arith.constant 0 : index
    %14 = vector.load %arg6[%c0_10, %c0_11] : memref<128x512xf32, #tpu.memory_space<vmem>>, vector<128x512xf32>
    %cst_12 = arith.constant dense<0.000000e+00> : vector<64x512xf32>
    %15 = tpu.matmul %7, %14, %cst_12 {dimension_numbers = #tpu.dot_dimension_numbers<[1], [0], [0], [1], [0, 0, 1, 1], [], []>} : vector<64x128xf32>, vector<128x512xf32>, vector<64x512xf32> -> vector<64x512xf32>
    %c0_13 = arith.constant 0 : index
    %c0_14 = arith.constant 0 : index
    %16 = vector.load %arg8[%c0_13, %c0_14] : memref<1x512xf32, #tpu.memory_space<vmem>>, vector<1x512xf32>
    %17 = vector.broadcast %16 : vector<1x512xf32> to vector<64x512xf32>
    %18 = arith.addf %15, %17 : vector<64x512xf32>
    %c0_15 = arith.constant 0 : index
    %c0_16 = arith.constant 0 : index
    %19 = vector.load %arg11[%c0_15, %c0_16] : memref<64x512xf32, #tpu.memory_space<vmem>>, vector<64x512xf32>
    tpu.vector_store %arg11[%c0_15, %c0_16], %18 {strides = array<i32>} : memref<64x512xf32, #tpu.memory_space<vmem>>, vector<64x512xf32>,
    %cst_17 = arith.constant 0.000000e+00 : f32
    %20 = vector.broadcast %cst_17 : f32 to vector<8x128xf32>
    %cst_18 = arith.constant 0xFF800000 : f32
    %21 = vector.broadcast %cst_18 : f32 to vector<8x128xf32>
    %cst_19 = arith.constant 0xFF800000 : f32
    %22 = vector.broadcast %cst_19 : f32 to vector<8x128xf32>
    %c0_20 = arith.constant 0 : index
    %c0_21 = arith.constant 0 : index
    %23 = vector.load %arg10[%c0_20, %c0_21] : memref<64x512xf32, #tpu.memory_space<vmem>>, vector<8x512xf32>
    %c0_22 = arith.constant 0 : index
    %c0_23 = arith.constant 0 : index
    %24 = vector.load %arg4[%c0_22, %c0_23] : memref<128x512xf32, #tpu.memory_space<vmem>>, vector<128x512xf32>
    %cst_24 = arith.constant dense<0.000000e+00> : vector<8x512xf32>
    %25 = tpu.matmul %20, %24, %cst_24 {dimension_numbers = #tpu.dot_dimension_numbers<[1], [0], [0], [1], [0, 0, 1, 1], [], []>} : vector<8x128xf32>, vector<128x512xf32>, vector<8x512xf32> -> vector<8x512xf32>
    %26 = arith.addf %23, %25 : vector<8x512xf32>
    %27 = vector.extract_strided_slice %26 {offsets = [0, 0], sizes = [8, 128], strides = [1, 1]} : vector<8x512xf32> to vector<8x128xf32>
    %28 = arith.negf %27 : vector<8x128xf32>
    %29 = math.exp %28 : vector<8x128xf32>
    %cst_25 = arith.constant 1.000000e+00 : f32
    %30 = vector.broadcast %cst_25 : f32 to vector<8x128xf32>
    %31 = arith.addf %30, %29 : vector<8x128xf32>
    %32 = arith.divf %30, %31 : vector<8x128xf32>
    %33 = vector.extract_strided_slice %26 {offsets = [0, 128], sizes = [8, 128], strides = [1, 1]} : vector<8x512xf32> to vector<8x128xf32>
    %34 = arith.negf %33 : vector<8x128xf32>
    %35 = math.exp %34 : vector<8x128xf32>
    %cst_26 = arith.constant 1.000000e+00 : f32
    %36 = vector.broadcast %cst_26 : f32 to vector<8x128xf32>
    %37 = arith.addf %36, %35 : vector<8x128xf32>
    %38 = arith.divf %36, %37 : vector<8x128xf32>
    %39 = vector.extract_strided_slice %26 {offsets = [0, 256], sizes = [8, 128], strides = [1, 1]} : vector<8x512xf32> to vector<8x128xf32>
    %40 = math.tanh %39 : vector<8x128xf32>
    %41 = vector.extract_strided_slice %26 {offsets = [0, 384], sizes = [8, 128], strides = [1, 1]} : vector<8x512xf32> to vector<8x128xf32>
    %42 = arith.negf %41 : vector<8x128xf32>
    %43 = math.exp %42 : vector<8x128xf32>
    %cst_27 = arith.constant 1.000000e+00 : f32
    %44 = vector.broadcast %cst_27 : f32 to vector<8x128xf32>
    %45 = arith.addf %44, %43 : vector<8x128xf32>
    %46 = arith.divf %44, %45 : vector<8x128xf32>
    %47 = arith.mulf %38, %20 : vector<8x128xf32>
    %48 = arith.mulf %32, %40 : vector<8x128xf32>
    %49 = arith.addf %47, %48 : vector<8x128xf32>
    %50 = math.tanh %49 : vector<8x128xf32>
    %51 = arith.mulf %46, %50 : vector<8x128xf32>
    %52 = arith.maximumf %21, %51 : vector<8x128xf32>
    %c56 = arith.constant 56 : index
    %c0_28 = arith.constant 0 : index
    %53 = vector.load %arg11[%c56, %c0_28] : memref<64x512xf32, #tpu.memory_space<vmem>>, vector<8x512xf32>
    %c0_29 = arith.constant 0 : index
    %c0_30 = arith.constant 0 : index
    %54 = vector.load %arg7[%c0_29, %c0_30] : memref<128x512xf32, #tpu.memory_space<vmem>>, vector<128x512xf32>
    %cst_31 = arith.constant dense<0.000000e+00> : vector<8x512xf32>
    %55 = tpu.matmul %20, %54, %cst_31 {dimension_numbers = #tpu.dot_dimension_numbers<[1], [0], [0], [1], [0, 0, 1, 1], [], []>} : vector<8x128xf32>, vector<128x512xf32>, vector<8x512xf32> -> vector<8x512xf32>
    %56 = arith.addf %53, %55 : vector<8x512xf32>
    %57 = vector.extract_strided_slice %56 {offsets = [0, 0], sizes = [8, 128], strides = [1, 1]} : vector<8x512xf32> to vector<8x128xf32>
    %58 = arith.negf %57 : vector<8x128xf32>
    %59 = math.exp %58 : vector<8x128xf32>
    %cst_32 = arith.constant 1.000000e+00 : f32
    %60 = vector.broadcast %cst_32 : f32 to vector<8x128xf32>
    %61 = arith.addf %60, %59 : vector<8x128xf32>
    %62 = arith.divf %60, %61 : vector<8x128xf32>
    %63 = vector.extract_strided_slice %56 {offsets = [0, 128], sizes = [8, 128], strides = [1, 1]} : vector<8x512xf32> to vector<8x128xf32>
    %64 = arith.negf %63 : vector<8x128xf32>
    %65 = math.exp %64 : vector<8x128xf32>
    %cst_33 = arith.constant 1.000000e+00 : f32
    %66 = vector.broadcast %cst_33 : f32 to vector<8x128xf32>
    %67 = arith.addf %66, %65 : vector<8x128xf32>
    %68 = arith.divf %66, %67 : vector<8x128xf32>
    %69 = vector.extract_strided_slice %56 {offsets = [0, 256], sizes = [8, 128], strides = [1, 1]} : vector<8x512xf32> to vector<8x128xf32>
    %70 = math.tanh %69 : vector<8x128xf32>
    %71 = vector.extract_strided_slice %56 {offsets = [0, 384], sizes = [8, 128], strides = [1, 1]} : vector<8x512xf32> to vector<8x128xf32>
    %72 = arith.negf %71 : vector<8x128xf32>
    %73 = math.exp %72 : vector<8x128xf32>
    %cst_34 = arith.constant 1.000000e+00 : f32
    %74 = vector.broadcast %cst_34 : f32 to vector<8x128xf32>
    %75 = arith.addf %74, %73 : vector<8x128xf32>
    %76 = arith.divf %74, %75 : vector<8x128xf32>
    %77 = arith.mulf %68, %20 : vector<8x128xf32>
    %78 = arith.mulf %62, %70 : vector<8x128xf32>
    %79 = arith.addf %77, %78 : vector<8x128xf32>
    %80 = math.tanh %79 : vector<8x128xf32>
    %81 = arith.mulf %76, %80 : vector<8x128xf32>
    %82 = arith.maximumf %22, %81 : vector<8x128xf32>
    %c8 = arith.constant 8 : index
    %c0_35 = arith.constant 0 : index
    %83 = vector.load %arg10[%c8, %c0_35] : memref<64x512xf32, #tpu.memory_space<vmem>>, vector<8x512xf32>
    %c0_36 = arith.constant 0 : index
    %c0_37 = arith.constant 0 : index
    %84 = vector.load %arg4[%c0_36, %c0_37] : memref<128x512xf32, #tpu.memory_space<vmem>>, vector<128x512xf32>
    %cst_38 = arith.constant dense<0.000000e+00> : vector<8x512xf32>
    %85 = tpu.matmul %51, %84, %cst_38 {dimension_numbers = #tpu.dot_dimension_numbers<[1], [0], [0], [1], [0, 0, 1, 1], [], []>} : vector<8x128xf32>, vector<128x512xf32>, vector<8x512xf32> -> vector<8x512xf32>
    %86 = arith.addf %83, %85 : vector<8x512xf32>
    %87 = vector.extract_strided_slice %86 {offsets = [0, 0], sizes = [8, 128], strides = [1, 1]} : vector<8x512xf32> to vector<8x128xf32>
    %88 = arith.negf %87 : vector<8x128xf32>
    %89 = math.exp %88 : vector<8x128xf32>
    %cst_39 = arith.constant 1.000000e+00 : f32
    %90 = vector.broadcast %cst_39 : f32 to vector<8x128xf32>
    %91 = arith.addf %90, %89 : vector<8x128xf32>
    %92 = arith.divf %90, %91 : vector<8x128xf32>
    %93 = vector.extract_strided_slice %86 {offsets = [0, 128], sizes = [8, 128], strides = [1, 1]} : vector<8x512xf32> to vector<8x128xf32>
    %94 = arith.negf %93 : vector<8x128xf32>
    %95 = math.exp %94 : vector<8x128xf32>
    %cst_40 = arith.constant 1.000000e+00 : f32
    %96 = vector.broadcast %cst_40 : f32 to vector<8x128xf32>
    %97 = arith.addf %96, %95 : vector<8x128xf32>
    %98 = arith.divf %96, %97 : vector<8x128xf32>
    %99 = vector.extract_strided_slice %86 {offsets = [0, 256], sizes = [8, 128], strides = [1, 1]} : vector<8x512xf32> to vector<8x128xf32>
    %100 = math.tanh %99 : vector<8x128xf32>
    %101 = vector.extract_strided_slice %86 {offsets = [0, 384], sizes = [8, 128], strides = [1, 1]} : vector<8x512xf32> to vector<8x128xf32>
    %102 = arith.negf %101 : vector<8x128xf32>
    %103 = math.exp %102 : vector<8x128xf32>
    %cst_41 = arith.constant 1.000000e+00 : f32
    %104 = vector.broadcast %cst_41 : f32 to vector<8x128xf32>
    %105 = arith.addf %104, %103 : vector<8x128xf32>
    %106 = arith.divf %104, %105 : vector<8x128xf32>
    %107 = arith.mulf %98, %49 : vector<8x128xf32>
    %108 = arith.mulf %92, %100 : vector<8x128xf32>
    %109 = arith.addf %107, %108 : vector<8x128xf32>
    %110 = math.tanh %109 : vector<8x128xf32>
    %111 = arith.mulf %106, %110 : vector<8x128xf32>
    %112 = arith.maximumf %52, %111 : vector<8x128xf32>
    %c48 = arith.constant 48 : index
    %c0_42 = arith.constant 0 : index
    %113 = vector.load %arg11[%c48, %c0_42] : memref<64x512xf32, #tpu.memory_space<vmem>>, vector<8x512xf32>
    %c0_43 = arith.constant 0 : index
    %c0_44 = arith.constant 0 : index
    %114 = vector.load %arg7[%c0_43, %c0_44] : memref<128x512xf32, #tpu.memory_space<vmem>>, vector<128x512xf32>
    %cst_45 = arith.constant dense<0.000000e+00> : vector<8x512xf32>
    %115 = tpu.matmul %81, %114, %cst_45 {dimension_numbers = #tpu.dot_dimension_numbers<[1], [0], [0], [1], [0, 0, 1, 1], [], []>} : vector<8x128xf32>, vector<128x512xf32>, vector<8x512xf32> -> vector<8x512xf32>
    %116 = arith.addf %113, %115 : vector<8x512xf32>
    %117 = vector.extract_strided_slice %116 {offsets = [0, 0], sizes = [8, 128], strides = [1, 1]} : vector<8x512xf32> to vector<8x128xf32>
    %118 = arith.negf %117 : vector<8x128xf32>
    %119 = math.exp %118 : vector<8x128xf32>
    %cst_46 = arith.constant 1.000000e+00 : f32
    %120 = vector.broadcast %cst_46 : f32 to vector<8x128xf32>
    %121 = arith.addf %120, %119 : vector<8x128xf32>
    %122 = arith.divf %120, %121 : vector<8x128xf32>
    %123 = vector.extract_strided_slice %116 {offsets = [0, 128], sizes = [8, 128], strides = [1, 1]} : vector<8x512xf32> to vector<8x128xf32>
    %124 = arith.negf %123 : vector<8x128xf32>
    %125 = math.exp %124 : vector<8x128xf32>
    %cst_47 = arith.constant 1.000000e+00 : f32
    %126 = vector.broadcast %cst_47 : f32 to vector<8x128xf32>
    %127 = arith.addf %126, %125 : vector<8x128xf32>
    %128 = arith.divf %126, %127 : vector<8x128xf32>
    %129 = vector.extract_strided_slice %116 {offsets = [0, 256], sizes = [8, 128], strides = [1, 1]} : vector<8x512xf32> to vector<8x128xf32>
    %130 = math.tanh %129 : vector<8x128xf32>
    %131 = vector.extract_strided_slice %116 {offsets = [0, 384], sizes = [8, 128], strides = [1, 1]} : vector<8x512xf32> to vector<8x128xf32>
    %132 = arith.negf %131 : vector<8x128xf32>
    %133 = math.exp %132 : vector<8x128xf32>
    %cst_48 = arith.constant 1.000000e+00 : f32
    %134 = vector.broadcast %cst_48 : f32 to vector<8x128xf32>
    %135 = arith.addf %134, %133 : vector<8x128xf32>
    %136 = arith.divf %134, %135 : vector<8x128xf32>
    %137 = arith.mulf %128, %79 : vector<8x128xf32>
    %138 = arith.mulf %122, %130 : vector<8x128xf32>
    %139 = arith.addf %137, %138 : vector<8x128xf32>
    %140 = math.tanh %139 : vector<8x128xf32>
    %141 = arith.mulf %136, %140 : vector<8x128xf32>
    %142 = arith.maximumf %82, %141 : vector<8x128xf32>
    %c16 = arith.constant 16 : index
    %c0_49 = arith.constant 0 : index
    %143 = vector.load %arg10[%c16, %c0_49] : memref<64x512xf32, #tpu.memory_space<vmem>>, vector<8x512xf32>
    %c0_50 = arith.constant 0 : index
    %c0_51 = arith.constant 0 : index
    %144 = vector.load %arg4[%c0_50, %c0_51] : memref<128x512xf32, #tpu.memory_space<vmem>>, vector<128x512xf32>
    %cst_52 = arith.constant dense<0.000000e+00> : vector<8x512xf32>
    %145 = tpu.matmul %111, %144, %cst_52 {dimension_numbers = #tpu.dot_dimension_numbers<[1], [0], [0], [1], [0, 0, 1, 1], [], []>} : vector<8x128xf32>, vector<128x512xf32>, vector<8x512xf32> -> vector<8x512xf32>
    %146 = arith.addf %143, %145 : vector<8x512xf32>
    %147 = vector.extract_strided_slice %146 {offsets = [0, 0], sizes = [8, 128], strides = [1, 1]} : vector<8x512xf32> to vector<8x128xf32>
    %148 = arith.negf %147 : vector<8x128xf32>
    %149 = math.exp %148 : vector<8x128xf32>
    %cst_53 = arith.constant 1.000000e+00 : f32
    %150 = vector.broadcast %cst_53 : f32 to vector<8x128xf32>
    %151 = arith.addf %150, %149 : vector<8x128xf32>
    %152 = arith.divf %150, %151 : vector<8x128xf32>
    %153 = vector.extract_strided_slice %146 {offsets = [0, 128], sizes = [8, 128], strides = [1, 1]} : vector<8x512xf32> to vector<8x128xf32>
    %154 = arith.negf %153 : vector<8x128xf32>
    %155 = math.exp %154 : vector<8x128xf32>
    %cst_54 = arith.constant 1.000000e+00 : f32
    %156 = vector.broadcast %cst_54 : f32 to vector<8x128xf32>
    %157 = arith.addf %156, %155 : vector<8x128xf32>
    %158 = arith.divf %156, %157 : vector<8x128xf32>
    %159 = vector.extract_strided_slice %146 {offsets = [0, 256], sizes = [8, 128], strides = [1, 1]} : vector<8x512xf32> to vector<8x128xf32>
    %160 = math.tanh %159 : vector<8x128xf32>
    %161 = vector.extract_strided_slice %146 {offsets = [0, 384], sizes = [8, 128], strides = [1, 1]} : vector<8x512xf32> to vector<8x128xf32>
    %162 = arith.negf %161 : vector<8x128xf32>
    %163 = math.exp %162 : vector<8x128xf32>
    %cst_55 = arith.constant 1.000000e+00 : f32
    %164 = vector.broadcast %cst_55 : f32 to vector<8x128xf32>
    %165 = arith.addf %164, %163 : vector<8x128xf32>
    %166 = arith.divf %164, %165 : vector<8x128xf32>
    %167 = arith.mulf %158, %109 : vector<8x128xf32>
    %168 = arith.mulf %152, %160 : vector<8x128xf32>
    %169 = arith.addf %167, %168 : vector<8x128xf32>
    %170 = math.tanh %169 : vector<8x128xf32>
    %171 = arith.mulf %166, %170 : vector<8x128xf32>
    %172 = arith.maximumf %112, %171 : vector<8x128xf32>
    %c40 = arith.constant 40 : index
    %c0_56 = arith.constant 0 : index
    %173 = vector.load %arg11[%c40, %c0_56] : memref<64x512xf32, #tpu.memory_space<vmem>>, vector<8x512xf32>
    %c0_57 = arith.constant 0 : index
    %c0_58 = arith.constant 0 : index
    %174 = vector.load %arg7[%c0_57, %c0_58] : memref<128x512xf32, #tpu.memory_space<vmem>>, vector<128x512xf32>
    %cst_59 = arith.constant dense<0.000000e+00> : vector<8x512xf32>
    %175 = tpu.matmul %141, %174, %cst_59 {dimension_numbers = #tpu.dot_dimension_numbers<[1], [0], [0], [1], [0, 0, 1, 1], [], []>} : vector<8x128xf32>, vector<128x512xf32>, vector<8x512xf32> -> vector<8x512xf32>
    %176 = arith.addf %173, %175 : vector<8x512xf32>
    %177 = vector.extract_strided_slice %176 {offsets = [0, 0], sizes = [8, 128], strides = [1, 1]} : vector<8x512xf32> to vector<8x128xf32>
    %178 = arith.negf %177 : vector<8x128xf32>
    %179 = math.exp %178 : vector<8x128xf32>
    %cst_60 = arith.constant 1.000000e+00 : f32
    %180 = vector.broadcast %cst_60 : f32 to vector<8x128xf32>
    %181 = arith.addf %180, %179 : vector<8x128xf32>
    %182 = arith.divf %180, %181 : vector<8x128xf32>
    %183 = vector.extract_strided_slice %176 {offsets = [0, 128], sizes = [8, 128], strides = [1, 1]} : vector<8x512xf32> to vector<8x128xf32>
    %184 = arith.negf %183 : vector<8x128xf32>
    %185 = math.exp %184 : vector<8x128xf32>
    %cst_61 = arith.constant 1.000000e+00 : f32
    %186 = vector.broadcast %cst_61 : f32 to vector<8x128xf32>
    %187 = arith.addf %186, %185 : vector<8x128xf32>
    %188 = arith.divf %186, %187 : vector<8x128xf32>
    %189 = vector.extract_strided_slice %176 {offsets = [0, 256], sizes = [8, 128], strides = [1, 1]} : vector<8x512xf32> to vector<8x128xf32>
    %190 = math.tanh %189 : vector<8x128xf32>
    %191 = vector.extract_strided_slice %176 {offsets = [0, 384], sizes = [8, 128], strides = [1, 1]} : vector<8x512xf32> to vector<8x128xf32>
    %192 = arith.negf %191 : vector<8x128xf32>
    %193 = math.exp %192 : vector<8x128xf32>
    %cst_62 = arith.constant 1.000000e+00 : f32
    %194 = vector.broadcast %cst_62 : f32 to vector<8x128xf32>
    %195 = arith.addf %194, %193 : vector<8x128xf32>
    %196 = arith.divf %194, %195 : vector<8x128xf32>
    %197 = arith.mulf %188, %139 : vector<8x128xf32>
    %198 = arith.mulf %182, %190 : vector<8x128xf32>
    %199 = arith.addf %197, %198 : vector<8x128xf32>
    %200 = math.tanh %199 : vector<8x128xf32>
    %201 = arith.mulf %196, %200 : vector<8x128xf32>
    %202 = arith.maximumf %142, %201 : vector<8x128xf32>
    %c24 = arith.constant 24 : index
    %c0_63 = arith.constant 0 : index
    %203 = vector.load %arg10[%c24, %c0_63] : memref<64x512xf32, #tpu.memory_space<vmem>>, vector<8x512xf32>
    %c0_64 = arith.constant 0 : index
    %c0_65 = arith.constant 0 : index
    %204 = vector.load %arg4[%c0_64, %c0_65] : memref<128x512xf32, #tpu.memory_space<vmem>>, vector<128x512xf32>
    %cst_66 = arith.constant dense<0.000000e+00> : vector<8x512xf32>
    %205 = tpu.matmul %171, %204, %cst_66 {dimension_numbers = #tpu.dot_dimension_numbers<[1], [0], [0], [1], [0, 0, 1, 1], [], []>} : vector<8x128xf32>, vector<128x512xf32>, vector<8x512xf32> -> vector<8x512xf32>
    %206 = arith.addf %203, %205 : vector<8x512xf32>
    %207 = vector.extract_strided_slice %206 {offsets = [0, 0], sizes = [8, 128], strides = [1, 1]} : vector<8x512xf32> to vector<8x128xf32>
    %208 = arith.negf %207 : vector<8x128xf32>
    %209 = math.exp %208 : vector<8x128xf32>
    %cst_67 = arith.constant 1.000000e+00 : f32
    %210 = vector.broadcast %cst_67 : f32 to vector<8x128xf32>
    %211 = arith.addf %210, %209 : vector<8x128xf32>
    %212 = arith.divf %210, %211 : vector<8x128xf32>
    %213 = vector.extract_strided_slice %206 {offsets = [0, 128], sizes = [8, 128], strides = [1, 1]} : vector<8x512xf32> to vector<8x128xf32>
    %214 = arith.negf %213 : vector<8x128xf32>
    %215 = math.exp %214 : vector<8x128xf32>
    %cst_68 = arith.constant 1.000000e+00 : f32
    %216 = vector.broadcast %cst_68 : f32 to vector<8x128xf32>
    %217 = arith.addf %216, %215 : vector<8x128xf32>
    %218 = arith.divf %216, %217 : vector<8x128xf32>
    %219 = vector.extract_strided_slice %206 {offsets = [0, 256], sizes = [8, 128], strides = [1, 1]} : vector<8x512xf32> to vector<8x128xf32>
    %220 = math.tanh %219 : vector<8x128xf32>
    %221 = vector.extract_strided_slice %206 {offsets = [0, 384], sizes = [8, 128], strides = [1, 1]} : vector<8x512xf32> to vector<8x128xf32>
    %222 = arith.negf %221 : vector<8x128xf32>
    %223 = math.exp %222 : vector<8x128xf32>
    %cst_69 = arith.constant 1.000000e+00 : f32
    %224 = vector.broadcast %cst_69 : f32 to vector<8x128xf32>
    %225 = arith.addf %224, %223 : vector<8x128xf32>
    %226 = arith.divf %224, %225 : vector<8x128xf32>
    %227 = arith.mulf %218, %169 : vector<8x128xf32>
    %228 = arith.mulf %212, %220 : vector<8x128xf32>
    %229 = arith.addf %227, %228 : vector<8x128xf32>
    %230 = math.tanh %229 : vector<8x128xf32>
    %231 = arith.mulf %226, %230 : vector<8x128xf32>
    %232 = arith.maximumf %172, %231 : vector<8x128xf32>
    %c32 = arith.constant 32 : index
    %c0_70 = arith.constant 0 : index
    %233 = vector.load %arg11[%c32, %c0_70] : memref<64x512xf32, #tpu.memory_space<vmem>>, vector<8x512xf32>
    %c0_71 = arith.constant 0 : index
    %c0_72 = arith.constant 0 : index
    %234 = vector.load %arg7[%c0_71, %c0_72] : memref<128x512xf32, #tpu.memory_space<vmem>>, vector<128x512xf32>
    %cst_73 = arith.constant dense<0.000000e+00> : vector<8x512xf32>
    %235 = tpu.matmul %201, %234, %cst_73 {dimension_numbers = #tpu.dot_dimension_numbers<[1], [0], [0], [1], [0, 0, 1, 1], [], []>} : vector<8x128xf32>, vector<128x512xf32>, vector<8x512xf32> -> vector<8x512xf32>
    %236 = arith.addf %233, %235 : vector<8x512xf32>
    %237 = vector.extract_strided_slice %236 {offsets = [0, 0], sizes = [8, 128], strides = [1, 1]} : vector<8x512xf32> to vector<8x128xf32>
    %238 = arith.negf %237 : vector<8x128xf32>
    %239 = math.exp %238 : vector<8x128xf32>
    %cst_74 = arith.constant 1.000000e+00 : f32
    %240 = vector.broadcast %cst_74 : f32 to vector<8x128xf32>
    %241 = arith.addf %240, %239 : vector<8x128xf32>
    %242 = arith.divf %240, %241 : vector<8x128xf32>
    %243 = vector.extract_strided_slice %236 {offsets = [0, 128], sizes = [8, 128], strides = [1, 1]} : vector<8x512xf32> to vector<8x128xf32>
    %244 = arith.negf %243 : vector<8x128xf32>
    %245 = math.exp %244 : vector<8x128xf32>
    %cst_75 = arith.constant 1.000000e+00 : f32
    %246 = vector.broadcast %cst_75 : f32 to vector<8x128xf32>
    %247 = arith.addf %246, %245 : vector<8x128xf32>
    %248 = arith.divf %246, %247 : vector<8x128xf32>
    %249 = vector.extract_strided_slice %236 {offsets = [0, 256], sizes = [8, 128], strides = [1, 1]} : vector<8x512xf32> to vector<8x128xf32>
    %250 = math.tanh %249 : vector<8x128xf32>
    %251 = vector.extract_strided_slice %236 {offsets = [0, 384], sizes = [8, 128], strides = [1, 1]} : vector<8x512xf32> to vector<8x128xf32>
    %252 = arith.negf %251 : vector<8x128xf32>
    %253 = math.exp %252 : vector<8x128xf32>
    %cst_76 = arith.constant 1.000000e+00 : f32
    %254 = vector.broadcast %cst_76 : f32 to vector<8x128xf32>
    %255 = arith.addf %254, %253 : vector<8x128xf32>
    %256 = arith.divf %254, %255 : vector<8x128xf32>
    %257 = arith.mulf %248, %199 : vector<8x128xf32>
    %258 = arith.mulf %242, %250 : vector<8x128xf32>
    %259 = arith.addf %257, %258 : vector<8x128xf32>
    %260 = math.tanh %259 : vector<8x128xf32>
    %261 = arith.mulf %256, %260 : vector<8x128xf32>
    %262 = arith.maximumf %202, %261 : vector<8x128xf32>
    %c32_77 = arith.constant 32 : index
    %c0_78 = arith.constant 0 : index
    %263 = vector.load %arg10[%c32_77, %c0_78] : memref<64x512xf32, #tpu.memory_space<vmem>>, vector<8x512xf32>
    %c0_79 = arith.constant 0 : index
    %c0_80 = arith.constant 0 : index
    %264 = vector.load %arg4[%c0_79, %c0_80] : memref<128x512xf32, #tpu.memory_space<vmem>>, vector<128x512xf32>
    %cst_81 = arith.constant dense<0.000000e+00> : vector<8x512xf32>
    %265 = tpu.matmul %231, %264, %cst_81 {dimension_numbers = #tpu.dot_dimension_numbers<[1], [0], [0], [1], [0, 0, 1, 1], [], []>} : vector<8x128xf32>, vector<128x512xf32>, vector<8x512xf32> -> vector<8x512xf32>
    %266 = arith.addf %263, %265 : vector<8x512xf32>
    %267 = vector.extract_strided_slice %266 {offsets = [0, 0], sizes = [8, 128], strides = [1, 1]} : vector<8x512xf32> to vector<8x128xf32>
    %268 = arith.negf %267 : vector<8x128xf32>
    %269 = math.exp %268 : vector<8x128xf32>
    %cst_82 = arith.constant 1.000000e+00 : f32
    %270 = vector.broadcast %cst_82 : f32 to vector<8x128xf32>
    %271 = arith.addf %270, %269 : vector<8x128xf32>
    %272 = arith.divf %270, %271 : vector<8x128xf32>
    %273 = vector.extract_strided_slice %266 {offsets = [0, 128], sizes = [8, 128], strides = [1, 1]} : vector<8x512xf32> to vector<8x128xf32>
    %274 = arith.negf %273 : vector<8x128xf32>
    %275 = math.exp %274 : vector<8x128xf32>
    %cst_83 = arith.constant 1.000000e+00 : f32
    %276 = vector.broadcast %cst_83 : f32 to vector<8x128xf32>
    %277 = arith.addf %276, %275 : vector<8x128xf32>
    %278 = arith.divf %276, %277 : vector<8x128xf32>
    %279 = vector.extract_strided_slice %266 {offsets = [0, 256], sizes = [8, 128], strides = [1, 1]} : vector<8x512xf32> to vector<8x128xf32>
    %280 = math.tanh %279 : vector<8x128xf32>
    %281 = vector.extract_strided_slice %266 {offsets = [0, 384], sizes = [8, 128], strides = [1, 1]} : vector<8x512xf32> to vector<8x128xf32>
    %282 = arith.negf %281 : vector<8x128xf32>
    %283 = math.exp %282 : vector<8x128xf32>
    %cst_84 = arith.constant 1.000000e+00 : f32
    %284 = vector.broadcast %cst_84 : f32 to vector<8x128xf32>
    %285 = arith.addf %284, %283 : vector<8x128xf32>
    %286 = arith.divf %284, %285 : vector<8x128xf32>
    %287 = arith.mulf %278, %229 : vector<8x128xf32>
    %288 = arith.mulf %272, %280 : vector<8x128xf32>
    %289 = arith.addf %287, %288 : vector<8x128xf32>
    %290 = math.tanh %289 : vector<8x128xf32>
    %291 = arith.mulf %286, %290 : vector<8x128xf32>
    %292 = arith.maximumf %232, %291 : vector<8x128xf32>
    %c24_85 = arith.constant 24 : index
    %c0_86 = arith.constant 0 : index
    %293 = vector.load %arg11[%c24_85, %c0_86] : memref<64x512xf32, #tpu.memory_space<vmem>>, vector<8x512xf32>
    %c0_87 = arith.constant 0 : index
    %c0_88 = arith.constant 0 : index
    %294 = vector.load %arg7[%c0_87, %c0_88] : memref<128x512xf32, #tpu.memory_space<vmem>>, vector<128x512xf32>
    %cst_89 = arith.constant dense<0.000000e+00> : vector<8x512xf32>
    %295 = tpu.matmul %261, %294, %cst_89 {dimension_numbers = #tpu.dot_dimension_numbers<[1], [0], [0], [1], [0, 0, 1, 1], [], []>} : vector<8x128xf32>, vector<128x512xf32>, vector<8x512xf32> -> vector<8x512xf32>
    %296 = arith.addf %293, %295 : vector<8x512xf32>
    %297 = vector.extract_strided_slice %296 {offsets = [0, 0], sizes = [8, 128], strides = [1, 1]} : vector<8x512xf32> to vector<8x128xf32>
    %298 = arith.negf %297 : vector<8x128xf32>
    %299 = math.exp %298 : vector<8x128xf32>
    %cst_90 = arith.constant 1.000000e+00 : f32
    %300 = vector.broadcast %cst_90 : f32 to vector<8x128xf32>
    %301 = arith.addf %300, %299 : vector<8x128xf32>
    %302 = arith.divf %300, %301 : vector<8x128xf32>
    %303 = vector.extract_strided_slice %296 {offsets = [0, 128], sizes = [8, 128], strides = [1, 1]} : vector<8x512xf32> to vector<8x128xf32>
    %304 = arith.negf %303 : vector<8x128xf32>
    %305 = math.exp %304 : vector<8x128xf32>
    %cst_91 = arith.constant 1.000000e+00 : f32
    %306 = vector.broadcast %cst_91 : f32 to vector<8x128xf32>
    %307 = arith.addf %306, %305 : vector<8x128xf32>
    %308 = arith.divf %306, %307 : vector<8x128xf32>
    %309 = vector.extract_strided_slice %296 {offsets = [0, 256], sizes = [8, 128], strides = [1, 1]} : vector<8x512xf32> to vector<8x128xf32>
    %310 = math.tanh %309 : vector<8x128xf32>
    %311 = vector.extract_strided_slice %296 {offsets = [0, 384], sizes = [8, 128], strides = [1, 1]} : vector<8x512xf32> to vector<8x128xf32>
    %312 = arith.negf %311 : vector<8x128xf32>
    %313 = math.exp %312 : vector<8x128xf32>
    %cst_92 = arith.constant 1.000000e+00 : f32
    %314 = vector.broadcast %cst_92 : f32 to vector<8x128xf32>
    %315 = arith.addf %314, %313 : vector<8x128xf32>
    %316 = arith.divf %314, %315 : vector<8x128xf32>
    %317 = arith.mulf %308, %259 : vector<8x128xf32>
    %318 = arith.mulf %302, %310 : vector<8x128xf32>
    %319 = arith.addf %317, %318 : vector<8x128xf32>
    %320 = math.tanh %319 : vector<8x128xf32>
    %321 = arith.mulf %316, %320 : vector<8x128xf32>
    %322 = arith.maximumf %262, %321 : vector<8x128xf32>
    %c40_93 = arith.constant 40 : index
    %c0_94 = arith.constant 0 : index
    %323 = vector.load %arg10[%c40_93, %c0_94] : memref<64x512xf32, #tpu.memory_space<vmem>>, vector<8x512xf32>
    %c0_95 = arith.constant 0 : index
    %c0_96 = arith.constant 0 : index
    %324 = vector.load %arg4[%c0_95, %c0_96] : memref<128x512xf32, #tpu.memory_space<vmem>>, vector<128x512xf32>
    %cst_97 = arith.constant dense<0.000000e+00> : vector<8x512xf32>
    %325 = tpu.matmul %291, %324, %cst_97 {dimension_numbers = #tpu.dot_dimension_numbers<[1], [0], [0], [1], [0, 0, 1, 1], [], []>} : vector<8x128xf32>, vector<128x512xf32>, vector<8x512xf32> -> vector<8x512xf32>
    %326 = arith.addf %323, %325 : vector<8x512xf32>
    %327 = vector.extract_strided_slice %326 {offsets = [0, 0], sizes = [8, 128], strides = [1, 1]} : vector<8x512xf32> to vector<8x128xf32>
    %328 = arith.negf %327 : vector<8x128xf32>
    %329 = math.exp %328 : vector<8x128xf32>
    %cst_98 = arith.constant 1.000000e+00 : f32
    %330 = vector.broadcast %cst_98 : f32 to vector<8x128xf32>
    %331 = arith.addf %330, %329 : vector<8x128xf32>
    %332 = arith.divf %330, %331 : vector<8x128xf32>
    %333 = vector.extract_strided_slice %326 {offsets = [0, 128], sizes = [8, 128], strides = [1, 1]} : vector<8x512xf32> to vector<8x128xf32>
    %334 = arith.negf %333 : vector<8x128xf32>
    %335 = math.exp %334 : vector<8x128xf32>
    %cst_99 = arith.constant 1.000000e+00 : f32
    %336 = vector.broadcast %cst_99 : f32 to vector<8x128xf32>
    %337 = arith.addf %336, %335 : vector<8x128xf32>
    %338 = arith.divf %336, %337 : vector<8x128xf32>
    %339 = vector.extract_strided_slice %326 {offsets = [0, 256], sizes = [8, 128], strides = [1, 1]} : vector<8x512xf32> to vector<8x128xf32>
    %340 = math.tanh %339 : vector<8x128xf32>
    %341 = vector.extract_strided_slice %326 {offsets = [0, 384], sizes = [8, 128], strides = [1, 1]} : vector<8x512xf32> to vector<8x128xf32>
    %342 = arith.negf %341 : vector<8x128xf32>
    %343 = math.exp %342 : vector<8x128xf32>
    %cst_100 = arith.constant 1.000000e+00 : f32
    %344 = vector.broadcast %cst_100 : f32 to vector<8x128xf32>
    %345 = arith.addf %344, %343 : vector<8x128xf32>
    %346 = arith.divf %344, %345 : vector<8x128xf32>
    %347 = arith.mulf %338, %289 : vector<8x128xf32>
    %348 = arith.mulf %332, %340 : vector<8x128xf32>
    %349 = arith.addf %347, %348 : vector<8x128xf32>
    %350 = math.tanh %349 : vector<8x128xf32>
    %351 = arith.mulf %346, %350 : vector<8x128xf32>
    %352 = arith.maximumf %292, %351 : vector<8x128xf32>
    %c16_101 = arith.constant 16 : index
    %c0_102 = arith.constant 0 : index
    %353 = vector.load %arg11[%c16_101, %c0_102] : memref<64x512xf32, #tpu.memory_space<vmem>>, vector<8x512xf32>
    %c0_103 = arith.constant 0 : index
    %c0_104 = arith.constant 0 : index
    %354 = vector.load %arg7[%c0_103, %c0_104] : memref<128x512xf32, #tpu.memory_space<vmem>>, vector<128x512xf32>
    %cst_105 = arith.constant dense<0.000000e+00> : vector<8x512xf32>
    %355 = tpu.matmul %321, %354, %cst_105 {dimension_numbers = #tpu.dot_dimension_numbers<[1], [0], [0], [1], [0, 0, 1, 1], [], []>} : vector<8x128xf32>, vector<128x512xf32>, vector<8x512xf32> -> vector<8x512xf32>
    %356 = arith.addf %353, %355 : vector<8x512xf32>
    %357 = vector.extract_strided_slice %356 {offsets = [0, 0], sizes = [8, 128], strides = [1, 1]} : vector<8x512xf32> to vector<8x128xf32>
    %358 = arith.negf %357 : vector<8x128xf32>
    %359 = math.exp %358 : vector<8x128xf32>
    %cst_106 = arith.constant 1.000000e+00 : f32
    %360 = vector.broadcast %cst_106 : f32 to vector<8x128xf32>
    %361 = arith.addf %360, %359 : vector<8x128xf32>
    %362 = arith.divf %360, %361 : vector<8x128xf32>
    %363 = vector.extract_strided_slice %356 {offsets = [0, 128], sizes = [8, 128], strides = [1, 1]} : vector<8x512xf32> to vector<8x128xf32>
    %364 = arith.negf %363 : vector<8x128xf32>
    %365 = math.exp %364 : vector<8x128xf32>
    %cst_107 = arith.constant 1.000000e+00 : f32
    %366 = vector.broadcast %cst_107 : f32 to vector<8x128xf32>
    %367 = arith.addf %366, %365 : vector<8x128xf32>
    %368 = arith.divf %366, %367 : vector<8x128xf32>
    %369 = vector.extract_strided_slice %356 {offsets = [0, 256], sizes = [8, 128], strides = [1, 1]} : vector<8x512xf32> to vector<8x128xf32>
    %370 = math.tanh %369 : vector<8x128xf32>
    %371 = vector.extract_strided_slice %356 {offsets = [0, 384], sizes = [8, 128], strides = [1, 1]} : vector<8x512xf32> to vector<8x128xf32>
    %372 = arith.negf %371 : vector<8x128xf32>
    %373 = math.exp %372 : vector<8x128xf32>
    %cst_108 = arith.constant 1.000000e+00 : f32
    %374 = vector.broadcast %cst_108 : f32 to vector<8x128xf32>
    %375 = arith.addf %374, %373 : vector<8x128xf32>
    %376 = arith.divf %374, %375 : vector<8x128xf32>
    %377 = arith.mulf %368, %319 : vector<8x128xf32>
    %378 = arith.mulf %362, %370 : vector<8x128xf32>
    %379 = arith.addf %377, %378 : vector<8x128xf32>
    %380 = math.tanh %379 : vector<8x128xf32>
    %381 = arith.mulf %376, %380 : vector<8x128xf32>
    %382 = arith.maximumf %322, %381 : vector<8x128xf32>
    %c48_109 = arith.constant 48 : index
    %c0_110 = arith.constant 0 : index
    %383 = vector.load %arg10[%c48_109, %c0_110] : memref<64x512xf32, #tpu.memory_space<vmem>>, vector<8x512xf32>
    %c0_111 = arith.constant 0 : index
    %c0_112 = arith.constant 0 : index
    %384 = vector.load %arg4[%c0_111, %c0_112] : memref<128x512xf32, #tpu.memory_space<vmem>>, vector<128x512xf32>
    %cst_113 = arith.constant dense<0.000000e+00> : vector<8x512xf32>
    %385 = tpu.matmul %351, %384, %cst_113 {dimension_numbers = #tpu.dot_dimension_numbers<[1], [0], [0], [1], [0, 0, 1, 1], [], []>} : vector<8x128xf32>, vector<128x512xf32>, vector<8x512xf32> -> vector<8x512xf32>
    %386 = arith.addf %383, %385 : vector<8x512xf32>
    %387 = vector.extract_strided_slice %386 {offsets = [0, 0], sizes = [8, 128], strides = [1, 1]} : vector<8x512xf32> to vector<8x128xf32>
    %388 = arith.negf %387 : vector<8x128xf32>
    %389 = math.exp %388 : vector<8x128xf32>
    %cst_114 = arith.constant 1.000000e+00 : f32
    %390 = vector.broadcast %cst_114 : f32 to vector<8x128xf32>
    %391 = arith.addf %390, %389 : vector<8x128xf32>
    %392 = arith.divf %390, %391 : vector<8x128xf32>
    %393 = vector.extract_strided_slice %386 {offsets = [0, 128], sizes = [8, 128], strides = [1, 1]} : vector<8x512xf32> to vector<8x128xf32>
    %394 = arith.negf %393 : vector<8x128xf32>
    %395 = math.exp %394 : vector<8x128xf32>
    %cst_115 = arith.constant 1.000000e+00 : f32
    %396 = vector.broadcast %cst_115 : f32 to vector<8x128xf32>
    %397 = arith.addf %396, %395 : vector<8x128xf32>
    %398 = arith.divf %396, %397 : vector<8x128xf32>
    %399 = vector.extract_strided_slice %386 {offsets = [0, 256], sizes = [8, 128], strides = [1, 1]} : vector<8x512xf32> to vector<8x128xf32>
    %400 = math.tanh %399 : vector<8x128xf32>
    %401 = vector.extract_strided_slice %386 {offsets = [0, 384], sizes = [8, 128], strides = [1, 1]} : vector<8x512xf32> to vector<8x128xf32>
    %402 = arith.negf %401 : vector<8x128xf32>
    %403 = math.exp %402 : vector<8x128xf32>
    %cst_116 = arith.constant 1.000000e+00 : f32
    %404 = vector.broadcast %cst_116 : f32 to vector<8x128xf32>
    %405 = arith.addf %404, %403 : vector<8x128xf32>
    %406 = arith.divf %404, %405 : vector<8x128xf32>
    %407 = arith.mulf %398, %349 : vector<8x128xf32>
    %408 = arith.mulf %392, %400 : vector<8x128xf32>
    %409 = arith.addf %407, %408 : vector<8x128xf32>
    %410 = math.tanh %409 : vector<8x128xf32>
    %411 = arith.mulf %406, %410 : vector<8x128xf32>
    %412 = arith.maximumf %352, %411 : vector<8x128xf32>
    %c8_117 = arith.constant 8 : index
    %c0_118 = arith.constant 0 : index
    %413 = vector.load %arg11[%c8_117, %c0_118] : memref<64x512xf32, #tpu.memory_space<vmem>>, vector<8x512xf32>
    %c0_119 = arith.constant 0 : index
    %c0_120 = arith.constant 0 : index
    %414 = vector.load %arg7[%c0_119, %c0_120] : memref<128x512xf32, #tpu.memory_space<vmem>>, vector<128x512xf32>
    %cst_121 = arith.constant dense<0.000000e+00> : vector<8x512xf32>
    %415 = tpu.matmul %381, %414, %cst_121 {dimension_numbers = #tpu.dot_dimension_numbers<[1], [0], [0], [1], [0, 0, 1, 1], [], []>} : vector<8x128xf32>, vector<128x512xf32>, vector<8x512xf32> -> vector<8x512xf32>
    %416 = arith.addf %413, %415 : vector<8x512xf32>
    %417 = vector.extract_strided_slice %416 {offsets = [0, 0], sizes = [8, 128], strides = [1, 1]} : vector<8x512xf32> to vector<8x128xf32>
    %418 = arith.negf %417 : vector<8x128xf32>
    %419 = math.exp %418 : vector<8x128xf32>
    %cst_122 = arith.constant 1.000000e+00 : f32
    %420 = vector.broadcast %cst_122 : f32 to vector<8x128xf32>
    %421 = arith.addf %420, %419 : vector<8x128xf32>
    %422 = arith.divf %420, %421 : vector<8x128xf32>
    %423 = vector.extract_strided_slice %416 {offsets = [0, 128], sizes = [8, 128], strides = [1, 1]} : vector<8x512xf32> to vector<8x128xf32>
    %424 = arith.negf %423 : vector<8x128xf32>
    %425 = math.exp %424 : vector<8x128xf32>
    %cst_123 = arith.constant 1.000000e+00 : f32
    %426 = vector.broadcast %cst_123 : f32 to vector<8x128xf32>
    %427 = arith.addf %426, %425 : vector<8x128xf32>
    %428 = arith.divf %426, %427 : vector<8x128xf32>
    %429 = vector.extract_strided_slice %416 {offsets = [0, 256], sizes = [8, 128], strides = [1, 1]} : vector<8x512xf32> to vector<8x128xf32>
    %430 = math.tanh %429 : vector<8x128xf32>
    %431 = vector.extract_strided_slice %416 {offsets = [0, 384], sizes = [8, 128], strides = [1, 1]} : vector<8x512xf32> to vector<8x128xf32>
    %432 = arith.negf %431 : vector<8x128xf32>
    %433 = math.exp %432 : vector<8x128xf32>
    %cst_124 = arith.constant 1.000000e+00 : f32
    %434 = vector.broadcast %cst_124 : f32 to vector<8x128xf32>
    %435 = arith.addf %434, %433 : vector<8x128xf32>
    %436 = arith.divf %434, %435 : vector<8x128xf32>
    %437 = arith.mulf %428, %379 : vector<8x128xf32>
    %438 = arith.mulf %422, %430 : vector<8x128xf32>
    %439 = arith.addf %437, %438 : vector<8x128xf32>
    %440 = math.tanh %439 : vector<8x128xf32>
    %441 = arith.mulf %436, %440 : vector<8x128xf32>
    %442 = arith.maximumf %382, %441 : vector<8x128xf32>
    %c56_125 = arith.constant 56 : index
    %c0_126 = arith.constant 0 : index
    %443 = vector.load %arg10[%c56_125, %c0_126] : memref<64x512xf32, #tpu.memory_space<vmem>>, vector<8x512xf32>
    %c0_127 = arith.constant 0 : index
    %c0_128 = arith.constant 0 : index
    %444 = vector.load %arg4[%c0_127, %c0_128] : memref<128x512xf32, #tpu.memory_space<vmem>>, vector<128x512xf32>
    %cst_129 = arith.constant dense<0.000000e+00> : vector<8x512xf32>
    %445 = tpu.matmul %411, %444, %cst_129 {dimension_numbers = #tpu.dot_dimension_numbers<[1], [0], [0], [1], [0, 0, 1, 1], [], []>} : vector<8x128xf32>, vector<128x512xf32>, vector<8x512xf32> -> vector<8x512xf32>
    %446 = arith.addf %443, %445 : vector<8x512xf32>
    %447 = vector.extract_strided_slice %446 {offsets = [0, 0], sizes = [8, 128], strides = [1, 1]} : vector<8x512xf32> to vector<8x128xf32>
    %448 = arith.negf %447 : vector<8x128xf32>
    %449 = math.exp %448 : vector<8x128xf32>
    %cst_130 = arith.constant 1.000000e+00 : f32
    %450 = vector.broadcast %cst_130 : f32 to vector<8x128xf32>
    %451 = arith.addf %450, %449 : vector<8x128xf32>
    %452 = arith.divf %450, %451 : vector<8x128xf32>
    %453 = vector.extract_strided_slice %446 {offsets = [0, 128], sizes = [8, 128], strides = [1, 1]} : vector<8x512xf32> to vector<8x128xf32>
    %454 = arith.negf %453 : vector<8x128xf32>
    %455 = math.exp %454 : vector<8x128xf32>
    %cst_131 = arith.constant 1.000000e+00 : f32
    %456 = vector.broadcast %cst_131 : f32 to vector<8x128xf32>
    %457 = arith.addf %456, %455 : vector<8x128xf32>
    %458 = arith.divf %456, %457 : vector<8x128xf32>
    %459 = vector.extract_strided_slice %446 {offsets = [0, 256], sizes = [8, 128], strides = [1, 1]} : vector<8x512xf32> to vector<8x128xf32>
    %460 = math.tanh %459 : vector<8x128xf32>
    %461 = vector.extract_strided_slice %446 {offsets = [0, 384], sizes = [8, 128], strides = [1, 1]} : vector<8x512xf32> to vector<8x128xf32>
    %462 = arith.negf %461 : vector<8x128xf32>
    %463 = math.exp %462 : vector<8x128xf32>
    %cst_132 = arith.constant 1.000000e+00 : f32
    %464 = vector.broadcast %cst_132 : f32 to vector<8x128xf32>
    %465 = arith.addf %464, %463 : vector<8x128xf32>
    %466 = arith.divf %464, %465 : vector<8x128xf32>
    %467 = arith.mulf %458, %409 : vector<8x128xf32>
    %468 = arith.mulf %452, %460 : vector<8x128xf32>
    %469 = arith.addf %467, %468 : vector<8x128xf32>
    %470 = math.tanh %469 : vector<8x128xf32>
    %471 = arith.mulf %466, %470 : vector<8x128xf32>
    %472 = arith.maximumf %412, %471 : vector<8x128xf32>
    %c0_133 = arith.constant 0 : index
    %c0_134 = arith.constant 0 : index
    %473 = vector.load %arg11[%c0_133, %c0_134] : memref<64x512xf32, #tpu.memory_space<vmem>>, vector<8x512xf32>
    %c0_135 = arith.constant 0 : index
    %c0_136 = arith.constant 0 : index
    %474 = vector.load %arg7[%c0_135, %c0_136] : memref<128x512xf32, #tpu.memory_space<vmem>>, vector<128x512xf32>
    %cst_137 = arith.constant dense<0.000000e+00> : vector<8x512xf32>
    %475 = tpu.matmul %441, %474, %cst_137 {dimension_numbers = #tpu.dot_dimension_numbers<[1], [0], [0], [1], [0, 0, 1, 1], [], []>} : vector<8x128xf32>, vector<128x512xf32>, vector<8x512xf32> -> vector<8x512xf32>
    %476 = arith.addf %473, %475 : vector<8x512xf32>
    %477 = vector.extract_strided_slice %476 {offsets = [0, 0], sizes = [8, 128], strides = [1, 1]} : vector<8x512xf32> to vector<8x128xf32>
    %478 = arith.negf %477 : vector<8x128xf32>
    %479 = math.exp %478 : vector<8x128xf32>
    %cst_138 = arith.constant 1.000000e+00 : f32
    %480 = vector.broadcast %cst_138 : f32 to vector<8x128xf32>
    %481 = arith.addf %480, %479 : vector<8x128xf32>
    %482 = arith.divf %480, %481 : vector<8x128xf32>
    %483 = vector.extract_strided_slice %476 {offsets = [0, 128], sizes = [8, 128], strides = [1, 1]} : vector<8x512xf32> to vector<8x128xf32>
    %484 = arith.negf %483 : vector<8x128xf32>
    %485 = math.exp %484 : vector<8x128xf32>
    %cst_139 = arith.constant 1.000000e+00 : f32
    %486 = vector.broadcast %cst_139 : f32 to vector<8x128xf32>
    %487 = arith.addf %486, %485 : vector<8x128xf32>
    %488 = arith.divf %486, %487 : vector<8x128xf32>
    %489 = vector.extract_strided_slice %476 {offsets = [0, 256], sizes = [8, 128], strides = [1, 1]} : vector<8x512xf32> to vector<8x128xf32>
    %490 = math.tanh %489 : vector<8x128xf32>
    %491 = vector.extract_strided_slice %476 {offsets = [0, 384], sizes = [8, 128], strides = [1, 1]} : vector<8x512xf32> to vector<8x128xf32>
    %492 = arith.negf %491 : vector<8x128xf32>
    %493 = math.exp %492 : vector<8x128xf32>
    %cst_140 = arith.constant 1.000000e+00 : f32
    %494 = vector.broadcast %cst_140 : f32 to vector<8x128xf32>
    %495 = arith.addf %494, %493 : vector<8x128xf32>
    %496 = arith.divf %494, %495 : vector<8x128xf32>
    %497 = arith.mulf %488, %439 : vector<8x128xf32>
    %498 = arith.mulf %482, %490 : vector<8x128xf32>
    %499 = arith.addf %497, %498 : vector<8x128xf32>
    %500 = math.tanh %499 : vector<8x128xf32>
    %501 = arith.mulf %496, %500 : vector<8x128xf32>
    %502 = arith.maximumf %442, %501 : vector<8x128xf32>
    %503 = math.tanh %472 : vector<8x128xf32>
    %c0_141 = arith.constant 0 : index
    %c0_142 = arith.constant 0 : index
    %504 = vector.load %arg9[%c0_141, %c0_142] : memref<8x256xf32, #tpu.memory_space<vmem>>, vector<8x128xf32>
    tpu.vector_store %arg9[%c0_141, %c0_142], %503 {strides = array<i32>} : memref<8x256xf32, #tpu.memory_space<vmem>>, vector<8x128xf32>,
    %505 = math.tanh %502 : vector<8x128xf32>
    %c0_143 = arith.constant 0 : index
    %c128 = arith.constant 128 : index
    %506 = vector.load %arg9[%c0_143, %c128] : memref<8x256xf32, #tpu.memory_space<vmem>>, vector<8x128xf32>
    tpu.vector_store %arg9[%c0_143, %c128], %505 {strides = array<i32>} : memref<8x256xf32, #tpu.memory_space<vmem>>, vector<8x128xf32>,
    return
  }
  func.func @transform_0(%arg0: i32) -> (i32, i32) {
    %c0_i32 = arith.constant 0 : i32
    %c0_i32_0 = arith.constant 0 : i32
    return %arg0, %c0_i32 : i32, i32
  }
  func.func @transform_1(%arg0: i32) -> (i32, i32) {
    %c0_i32 = arith.constant 0 : i32
    %c0_i32_0 = arith.constant 0 : i32
    %c0_i32_1 = arith.constant 0 : i32
    return %c0_i32, %c0_i32_0 : i32, i32
  }
  func.func @transform_2(%arg0: i32) -> (i32, i32) {
    %c0_i32 = arith.constant 0 : i32
    %c0_i32_0 = arith.constant 0 : i32
    %c0_i32_1 = arith.constant 0 : i32
    return %c0_i32, %c0_i32_0 : i32, i32
  }
  func.func @transform_3(%arg0: i32) -> (i32, i32) {
    %c0_i32 = arith.constant 0 : i32
    %c0_i32_0 = arith.constant 0 : i32
    %c0_i32_1 = arith.constant 0 : i32
    return %c0_i32, %c0_i32_0 : i32, i32
  }
  func.func @transform_4(%arg0: i32) -> (i32, i32) {
    %c0_i32 = arith.constant 0 : i32
    %c0_i32_0 = arith.constant 0 : i32
    %c0_i32_1 = arith.constant 0 : i32
    return %c0_i32, %c0_i32_0 : i32, i32
  }
  func.func @transform_5(%arg0: i32) -> (i32, i32) {
    %c0_i32 = arith.constant 0 : i32
    %c0_i32_0 = arith.constant 0 : i32
    %c0_i32_1 = arith.constant 0 : i32
    return %c0_i32, %c0_i32_0 : i32, i32
  }
  func.func @transform_6(%arg0: i32) -> (i32, i32) {
    %c0_i32 = arith.constant 0 : i32
    %c0_i32_0 = arith.constant 0 : i32
    %c0_i32_1 = arith.constant 0 : i32
    return %c0_i32, %c0_i32_0 : i32, i32
  }
  func.func @transform_7(%arg0: i32) -> (i32, i32) {
    %c0_i32 = arith.constant 0 : i32
    %c0_i32_0 = arith.constant 0 : i32
    %c0_i32_1 = arith.constant 0 : i32
    return %c0_i32, %c0_i32_0 : i32, i32
  }
  func.func @transform_8(%arg0: i32) -> (i32, i32) {
    %c0_i32 = arith.constant 0 : i32
    %c0_i32_0 = arith.constant 0 : i32
    return %arg0, %c0_i32 : i32, i32
  }
}

</mosaic_0001>

<bundles_post_ra>
// kernel: tpu_custom_call.1
= control target key start
LH: loop header
LB: loop body
LE: loop exit
PB: predicated region body
PF: predicated region fallthrough
CT: control target
= control target key end

     0   :  { %13 = vsyncpa [#allocation5], 0  ;;  %s7803_s0 = inlined_call_operand.vmem [shape: s32[128,1], index: 0, kind: input, shape index: {}]   ;;  %s7804_s1 = inlined_call_operand.vmem [shape: f32[128,128], index: 1, kind: input, shape index: {}]   ;;  %s7805_s2 = inlined_call_operand.hbm [shape: f32[128,512], index: 2, kind: input, shape index: {}]   ;;  %s7806_s3 = inlined_call_operand.hbm [shape: f32[128,512], index: 3, kind: input, shape index: {}]   ;;  %s7807_s4 = inlined_call_operand.vmem [shape: f32[1,512], index: 4, kind: input, shape index: {}]   ;;  %s7808_s5 = inlined_call_operand.hbm [shape: f32[128,512], index: 5, kind: input, shape index: {}]   ;;  %s7809_s6 = inlined_call_operand.hbm [shape: f32[128,512], index: 6, kind: input, shape index: {}]   ;;  %s7810_s7 = inlined_call_operand.vmem [shape: f32[1,512], index: 7, kind: input, shape index: {}]   ;;  %s7811_s8 = inlined_call_operand.hbm [shape: f32[16,256], index: 8, kind: output, shape index: {}]  }
   0x1   :  { %14 = vsyncpa [#allocation8], 0 }
   0x2   :  { %15 = vsyncpa [#allocation11], 0 }
   0x3   :  { %16 = vsyncpa [#allocation6], 0 }
   0x4   :  { %18 = vsyncpa [#allocation6 + $0x1], 0  ;;  %s5266_s27 = smov 0   ;;  %s5268_s28 = smov 0  }
   0x5   :  { %s5270_s29 = smov 0   ;;  %s5272_s30 = smov 0  }
   0x6 LB: > { %s5287_s9 = sadd.s32 4294967295, %s5209_s30   ;;  %s4277_s10 = sadd.s32 4294967294, %s5209_s30   ;;  %s5209_s30 = sphi %s5272_s30, %s8925_s30   ;;  %s5205_s29 = sphi %s5270_s29, %s8924_s29   ;;  %s5201_s28 = sphi %s5268_s28, %s8923_s28   ;;  %s5197_s27 = sphi %s5266_s27, %s8922_s27  }
   0x7   : > { %s5291_s11 = sadd.s32 1, %s5209_s30   ;;  %s204_s12 = sadd.s32 1, %s5205_s29 }
   0x8   : > { %s201_s13 = ssub.s32 %s5209_s30, %s5291_s11  ;;  %p214_p0 = scmp.ne.s32.totalorder %s5205_s29, %s5201_s28 }
   0x9   : > { %p202_p1 = scmp.eq.s32.totalorder %s201_s13, 0  ;;  %p215_p2 = scmp.eq.s32.totalorder %s5287_s9, 1 }
   0xa   : > { %p220_p3 = scmp.ne.s32.totalorder %s5201_s28, %s5197_s27  ;;  %p221_p4 = scmp.eq.s32.totalorder %s4277_s10, 1 }
   0xb   : > { %s5302_s14 = scalar_select %p202_p1, %s5205_s29, %s204_s12  }
   0xc   : > { %p5304_p5 = por %p215_p2, %p214_p0  ;;  %p5308_p6 = por %p221_p4, %p220_p3 }
   0xd   : > { %p4278_p7 = scmp.ge.s32.totalorder %s5209_s30, 1  ;;  %p228_p8 = scmp.lt.s32.totalorder %s5209_s30, 3 }
   0xe   : > { %p4465_p9 = scmp.eq.s32.totalorder %s5287_s9, 0  ;;  %s5211_s18 = smov [#allocation7]  }
   0xf   : > { %p5315_p10 = pnand %p4278_p7, %p228_p8  ;;  %s256_s19 = sshll.u32 %s5211_s18, 4  ;;  %s257_s19 = int_to_ptr.vmem [resolvable:$true] %s256_s19 }
  0x10   : > { %s5212_s21 = smov [#allocation4]   ;;  %s5213_s23 = smov [#allocation9]  }
  0x11   : > { %p4448_p11 = pneg %p5315_p10  ;;  %s243_s22 = sshll.u32 %s5212_s21, 4  ;;  %s244_s22 = int_to_ptr.vmem [resolvable:$true] %s243_s22 }
  0x12   : > { %s272_s24 = sshll.u32 %s5213_s23, 4  ;;  %s5044_s25 = scalar_lea.vmem %s257_s19, 8192  ;;  %s273_s24 = int_to_ptr.vmem [resolvable:$true] %s272_s24 }
  0x13   : > { %p5323_p12 = pnand %p4465_p9, %p4448_p11  ;;  %p5045_p0 = scmp.ne.s32.totalorder %s257_s19, %s5044_s25 }
  0x14   : > { %p5052_p3 = scmp.lt.s32.totalorder %s257_s19, %s257_s19  ;;  %p5053_p4 = scmp.lt.s32.totalorder %s5044_s25, %s5044_s25 }
  0x15   : > { %p5035_p13 = pneg %p5323_p12 }
  0x16   : > { %p5054_p7 = por %p5053_p4, %p5052_p3 }
  0x17   : > { %p5047_p1 = pnand %p5045_p0, %p5035_p13 }
  0x19   : > { %p5048_p2 = pneg %p5047_p1 }
  0x1b   : > { %p5055_p8 = pnand %p5054_p7, %p5048_p2 }
  0x1d   : > { %5058 = shalt.err (!%p5055_p8)
}
  0x1e   : > { %s5214_s26 = smov 512   ;;  %s5215_s10 = smov 32  }
  0x1f   : > { %4454 = dma.hbm_to_vmem [thread:$0]  (!%p5323_p12), %s7806_s3, 8192, %s257_s19, [#allocation8], %s5214_s26, %s5214_s26, %s5215_s10  }
  0x20   : > { %s5070_s18 = scalar_lea.vmem %s244_s22, 8192  ;;  %p5078_p2 = scmp.lt.s32.totalorder %s244_s22, %s244_s22 }
  0x21   : > { %p5071_p11 = scmp.ne.s32.totalorder %s244_s22, %s5070_s18  ;;  %p5079_p3 = scmp.lt.s32.totalorder %s5070_s18, %s5070_s18 }
  0x23   : > { %p5073_p0 = pnand %p5071_p11, %p5035_p13  ;;  %p5080_p4 = por %p5079_p3, %p5078_p2 }
  0x25   : > { %p5074_p1 = pneg %p5073_p0 }
  0x27   : > { %p5081_p7 = pnand %p5080_p4, %p5074_p1 }
  0x29   : > { %5084 = shalt.err (!%p5081_p7)
}
  0x2a   : > { %4451 = dma.hbm_to_vmem [thread:$0]  (!%p5323_p12), %s7805_s2, 8192, %s244_s22, [#allocation5], %s5214_s26, %s5214_s26, %s5215_s10  }
  0x2b   : > { %s5096_s19 = scalar_lea.vmem %s273_s24, 8192  ;;  %p5104_p2 = scmp.lt.s32.totalorder %s273_s24, %s273_s24 }
  0x2c   : > { %p5097_p8 = scmp.ne.s32.totalorder %s273_s24, %s5096_s19  ;;  %p5105_p1 = scmp.lt.s32.totalorder %s5096_s19, %s5096_s19 }
  0x2e   : > { %p5099_p11 = pnand %p5097_p8, %p5035_p13  ;;  %p5106_p3 = por %p5105_p1, %p5104_p2 }
  0x30   : > { %p5100_p0 = pneg %p5099_p11 }
  0x32   : > { %p5107_p4 = pnand %p5106_p3, %p5100_p0 }
  0x34   : > { %5110 = shalt.err (!%p5107_p4)
}
  0x35   : > { %4457 = dma.hbm_to_vmem [thread:$0]  (!%p5323_p12), %s7808_s5, 8192, %s273_s24, [#allocation8], %s5214_s26, %s5214_s26, %s5215_s10  }
  0x36   : > { %s5216_s22 = smov [#allocation10]  }
  0x37   : > { %s285_s13 = sshll.u32 %s5216_s22, 4  ;;  %s286_s13 = int_to_ptr.vmem [resolvable:$true] %s285_s13 }
  0x38   : > { %s5122_s18 = scalar_lea.vmem %s286_s13, 8192  ;;  %p5130_p0 = scmp.lt.s32.totalorder %s286_s13, %s286_s13 }
  0x39   : > { %p5123_p7 = scmp.ne.s32.totalorder %s286_s13, %s5122_s18  ;;  %p5131_p2 = scmp.lt.s32.totalorder %s5122_s18, %s5122_s18 }
  0x3b   : > { %p5125_p8 = pnand %p5123_p7, %p5035_p13  ;;  %p5132_p1 = por %p5131_p2, %p5130_p0 }
  0x3d   : > { %p5126_p11 = pneg %p5125_p8 }
  0x3f   : > { %p5133_p3 = pnand %p5132_p1, %p5126_p11 }
  0x41   : > { %5136 = shalt.err (!%p5133_p3)
}
  0x42   : > { %4460 = dma.hbm_to_vmem [thread:$0]  (!%p5323_p12), %s7809_s6, 8192, %s286_s13, [#allocation11], %s5214_s26, %s5214_s26, %s5215_s10  }
  0x43   : > { %313 = sbr.rel (%p5315_p10) target bundleno = 2564 (0xa04), region = 52 }
  0x48   : > { %5180 = dma.done.wait (%p4465_p9), [#allocation5], 8192  }
  0x49   : > { %5182 = vsyncadd (%p4465_p9), [#allocation5], 4294959104 }
  0x4a   : > { %5184 = dma.done.wait (%p4465_p9), [#allocation8], 16384  }
  0x4b   : > { %5186 = vsyncadd (%p4465_p9), [#allocation8], 4294950912 }
  0x4c   : > { %5188 = dma.done.wait (%p4465_p9), [#allocation11], 8192  }
  0x4d   : > { %5190 = vsyncadd (%p4465_p9), [#allocation11], 4294959104  ;;  %s4290_s17 = sshll.u32 %s5287_s9, 3  ;;  %v5217_v0 = vmov 0   ;;  %v438_v5 = vld [vmem:[%s7804_s1 + $0x78] sm:$0xff]  ;;  %v437_v6 = vld [vmem:[%s7804_s1 + $0x70] sm:$0xff]  ;;  %v7812_v56 = vlaneseq }
  0x4e   : > { %4516 = vset.pattern.permute.xlu1 %v5217_v0  ;;  %4515 = vset.pattern.permute.xlu0 %v5217_v0  ;;  %p360_p10 = scmp.lt.s32.totalorder %s4290_s17, 15  ;;  %v436_v7 = vld [vmem:[%s7804_s1 + $0x68] sm:$0xff]  ;;  %v435_v10 = vld [vmem:[%s7804_s1 + $0x60] sm:$0xff]  ;;  %v434_v13 = vld [vmem:[%s7804_s1 + $0x58] sm:$0xff]  ;;  %v5218_v60 = vmov 1.0   ;;  %s356_s26 = sand.u32 1, %s5201_s28  }
  0x4f   : > { %4386 = vmatprep.subr.mxu0 %v438_v5  ;;  %v433_v14 = vld [vmem:[%s7804_s1 + $0x50] sm:$0xff]  ;;  %v605_v15 = vld [vmem:[#allocation4 + $0x1e8] sm:$0xff]  ;;  %v604_v16 = vld [vmem:[#allocation4 + $0x1e0] sm:$0xff]  ;;  %v374_v57 = vand.u32 127, %v7812_v56  ;;  %s4289_s10 = sshll.u32 %s356_s26, 4  ;;  %s4361_s25 = sshll.u32 %s5287_s9, 8 }
  0x50   : > { %s8927_s17 = smov (!%p360_p10, %s4290_s17), 15  ;;  %4387 = vmatpush3.msra.mxu0 %v438_v5  ;;  %v432_v17 = vld [vmem:[%s7804_s1 + $0x48] sm:$0xff]  ;;  %630 = vmatprep.subr.mxu1 %v605_v15  ;;  %v600_v19 = vld [vmem:[#allocation4 + $0x1c0] sm:$0xff]  ;;  %v430_v24 = vld [vmem:[%s7804_s1 + $0x38] sm:$0xff]  ;;  %s358_s19 = scalar_lea.vmem [#allocation12], %s4289_s10 }
  0x51   : > { %s4291_s20 = sshll.u32 %s8927_s17, 3  ;;  %4388 = vmatprep.subr.mxu0 %v437_v6  ;;  %v601_v18 = vld [vmem:[#allocation4 + $0x1c8] sm:$0xff]  ;;  %631 = vmatpush1.msra.mxu1 %v604_v16  ;;  %v431_v21 = vld [vmem:[%s7804_s1 + $0x40] sm:$0xff]  ;;  %v429_v27 = vld [vmem:[%s7804_s1 + $0x30] sm:$0xff]  ;;  %s7768_s13 = scalar_lea.hbm %s7811_s8, %s4361_s25 }
  0x52   : > { %s363_s23 = scalar_lea.vmem %s7803_s0, %s4291_s20  ;;  %4389 = vmatpush3.msra.mxu0 %v437_v6  ;;  %v597_v20 = vld [vmem:[#allocation4 + $0x1a8] sm:$0xff]  ;;  %632 = vmatprep.subr.mxu1 %v601_v18  ;;  %v596_v22 = vld [vmem:[#allocation4 + $0x1a0] sm:$0xff]  ;;  %v426_v36 = vld [vmem:[%s7804_s1 + $0x18] sm:$0xff]  ;;  %s4163_s18 = scalar_lea.sflag [#allocation6], %s356_s26 }
  0x53   : > { %v367_v1 = vld [vmem:[%s363_s23 + $0x10] sm:$0xff]  ;;  %v365_v2 = vld [vmem:[%s363_s23] sm:$0xff]  ;;  %v368_v3 = vld [vmem:[%s363_s23 + $0x18] sm:$0xff]  ;;  %4390 = vmatprep.subr.mxu0 %v436_v7  ;;  %633 = vmatpush1.msra.mxu1 %v600_v19  ;;  %s5220_s21 = smov [#allocation12]  }
  0x54   : > { %382 = vperm.xlu1 %4516, %v367_v1   ;;  %376 = vperm.xlu0 %4515, %v365_v2   ;;  %v366_v4 = vld [vmem:[%s363_s23 + $0x8] sm:$0xff]  ;;  %v369_v9 = vld [vmem:[%s363_s23 + $0x20] sm:$0xff]  ;;  %v372_v11 = vld [vmem:[%s363_s23 + $0x38] sm:$0xff]  ;;  %s5141_s17 = sshll.u32 %s5220_s21, 4  ;;  %s5142_s17 = int_to_ptr.vmem [resolvable:$false] %s5141_s17 }
  0x55   : > { %v370_v8 = vld [vmem:[%s363_s23 + $0x28] sm:$0xff]  ;;  %v371_v12 = vld [vmem:[%s363_s23 + $0x30] sm:$0xff]  ;;  %4391 = vmatpush3.msra.mxu0 %v436_v7  ;;  %634 = vmatprep.subr.mxu1 %v597_v20  ;;  %v592_v25 = vld [vmem:[#allocation4 + $0x180] sm:$0xff]  ;;  %s4177_s23 = sshll.u32 %s358_s19, 4  ;;  %s5143_s20 = scalar_lea.vmem %s5142_s17, 512  ;;  %s4178_s23 = int_to_ptr.vmem [resolvable:$true] %s4177_s23 }
  0x56   : > { %4392 = vmatprep.subr.mxu0 %v435_v10  ;;  %v593_v23 = vld [vmem:[#allocation4 + $0x188] sm:$0xff]  ;;  %635 = vmatpush1.msra.mxu1 %v596_v22  ;;  %v588_v28 = vld [vmem:[#allocation4 + $0x160] sm:$0xff]  ;;  %v425_v39 = vld [vmem:[%s7804_s1 + $0x10] sm:$0xff]  ;;  %s5137_s24 = scalar_lea.vmem %s4178_s23, 256  ;;  %p5144_p4 = scmp.lt.s32.totalorder %s4178_s23, %s5142_s17 }
  0x57   : > { %4393 = vmatpush3.msra.mxu0 %v435_v10  ;;  %v589_v26 = vld [vmem:[#allocation4 + $0x168] sm:$0xff]  ;;  %636 = vmatprep.subr.mxu1 %v593_v23  ;;  %v584_v31 = vld [vmem:[#allocation4 + $0x140] sm:$0xff]  ;;  %v607_v48 = vld [vmem:[#allocation4 + $0x1f8] sm:$0xff]  ;;  %p5138_p9 = scmp.ne.s32.totalorder %s4178_s23, %s5137_s24  ;;  %p5145_p7 = scmp.lt.s32.totalorder %s5143_s20, %s5137_s24 }
  0x58   : > { %385 = vperm.xlu1 %4516, %v368_v3   ;;  %379 = vperm.xlu0 %4515, %v366_v4   ;;  %v585_v29 = vld [vmem:[#allocation4 + $0x148] sm:$0xff]  ;;  %v427_v33 = vld [vmem:[%s7804_s1 + $0x20] sm:$0xff]  ;;  %v606_v63 = vld [vmem:[#allocation4 + $0x1f0] sm:$0xff] }
  0x59   : > { %4394 = vmatprep.subr.mxu0 %v434_v13  ;;  %637 = vmatpush1.msra.mxu1 %v592_v25  ;;  %v428_v30 = vld [vmem:[%s7804_s1 + $0x28] sm:$0xff]  ;;  %v580_v34 = vld [vmem:[#allocation4 + $0x120] sm:$0xff]  ;;  %v603_v0 = vld [vmem:[#allocation4 + $0x1d8] sm:$0xff]  ;;  %p5139_p12 = pnand %p5138_p9, %p5304_p5  ;;  %p5146_p8 = por %p5145_p7, %p5144_p4 }
  0x5a   : > { %4395 = vmatpush3.msra.mxu0 %v434_v13  ;;  %638 = vmatprep.subr.mxu1 %v589_v26  ;;  %v581_v32 = vld [vmem:[#allocation4 + $0x128] sm:$0xff]  ;;  %v576_v37 = vld [vmem:[#allocation4 + $0x100] sm:$0xff]  ;;  %v602_v1 = vld [vmem:[#allocation4 + $0x1d0] sm:$0xff] }
  0x5b   : > { %4396 = vmatprep.subr.mxu0 %v433_v14  ;;  %639 = vmatpush1.msra.mxu1 %v588_v28  ;;  %v577_v35 = vld [vmem:[#allocation4 + $0x108] sm:$0xff]  ;;  %v572_v40 = vld [vmem:[#allocation4 + $0xe0] sm:$0xff]  ;;  %v599_v2 = vld [vmem:[#allocation4 + $0x1b8] sm:$0xff]  ;;  %p5140_p13 = pneg %p5139_p12 }
  0x5c   : > { %391 = vperm.xlu1 %4516, %v370_v8   ;;  %388 = vperm.xlu0 %4515, %v369_v9   ;;  %v573_v38 = vld [vmem:[#allocation4 + $0xe8] sm:$0xff]  ;;  %v568_v43 = vld [vmem:[#allocation4 + $0xc0] sm:$0xff]  ;;  %v598_v5 = vld [vmem:[#allocation4 + $0x1b0] sm:$0xff] }
  0x5d   : > { %4397 = vmatpush3.msra.mxu0 %v433_v14  ;;  %640 = vmatprep.subr.mxu1 %v585_v29  ;;  %v569_v41 = vld [vmem:[#allocation4 + $0xc8] sm:$0xff]  ;;  %v423_v45 = vld [vmem:[%s7804_s1] sm:$0xff]  ;;  %v595_v6 = vld [vmem:[#allocation4 + $0x198] sm:$0xff]  ;;  %p5147_p11 = pnand %p5146_p8, %p5140_p13 }
  0x5e   : > { %4398 = vmatprep.subr.mxu0 %v432_v17  ;;  %641 = vmatpush1.msra.mxu1 %v584_v31  ;;  %v424_v42 = vld [vmem:[%s7804_s1 + $0x8] sm:$0xff]  ;;  %v564_v46 = vld [vmem:[#allocation4 + $0xa0] sm:$0xff]  ;;  %v594_v7 = vld [vmem:[#allocation4 + $0x190] sm:$0xff] }
  0x5f   : > { %4399 = vmatpush3.msra.mxu0 %v432_v17  ;;  %642 = vmatprep.subr.mxu1 %v581_v32  ;;  %v565_v44 = vld [vmem:[#allocation4 + $0xa8] sm:$0xff]  ;;  %v560_v49 = vld [vmem:[#allocation4 + $0x80] sm:$0xff]  ;;  %v591_v8 = vld [vmem:[#allocation4 + $0x178] sm:$0xff] }
  0x60   : > { %397 = vperm.xlu1 %4516, %v372_v11   ;;  %394 = vperm.xlu0 %4515, %v371_v12   ;;  %v561_v47 = vld [vmem:[#allocation4 + $0x88] sm:$0xff]  ;;  %v556_v51 = vld [vmem:[#allocation4 + $0x60] sm:$0xff]  ;;  %v590_v10 = vld [vmem:[#allocation4 + $0x170] sm:$0xff] }
  0x61   : > { %4400 = vmatprep.subr.mxu0 %v431_v21  ;;  %643 = vmatpush1.msra.mxu1 %v580_v34  ;;  %v557_v50 = vld [vmem:[#allocation4 + $0x68] sm:$0xff]  ;;  %v552_v53 = vld [vmem:[#allocation4 + $0x40] sm:$0xff]  ;;  %v587_v11 = vld [vmem:[#allocation4 + $0x158] sm:$0xff] }
  0x62   : > { %4401 = vmatpush3.msra.mxu0 %v431_v21  ;;  %644 = vmatprep.subr.mxu1 %v577_v35  ;;  %v553_v52 = vld [vmem:[#allocation4 + $0x48] sm:$0xff]  ;;  %v548_v55 = vld [vmem:[#allocation4 + $0x20] sm:$0xff]  ;;  %v586_v13 = vld [vmem:[#allocation4 + $0x150] sm:$0xff] }
  0x63   : > { %4402 = vmatprep.subr.mxu0 %v430_v24  ;;  %645 = vmatpush1.msra.mxu1 %v576_v37  ;;  %v549_v54 = vld [vmem:[#allocation4 + $0x28] sm:$0xff]  ;;  %v583_v14 = vld [vmem:[#allocation4 + $0x138] sm:$0xff]  ;;  %v582_v15 = vld [vmem:[#allocation4 + $0x130] sm:$0xff] }
  0x64   : > { %4403 = vmatpush3.msra.mxu0 %v430_v24  ;;  %646 = vmatprep.subr.mxu1 %v573_v38  ;;  %v579_v16 = vld [vmem:[#allocation4 + $0x118] sm:$0xff]  ;;  %v578_v17 = vld [vmem:[#allocation4 + $0x110] sm:$0xff]  ;;  %v545_v32 = vld [vmem:[#allocation4 + $0x8] sm:$0xff]  ;;  %v7815_v38 = vmov 0.0  }
  0x65   : > { %4404 = vmatprep.subr.mxu0 %v429_v27  ;;  %647 = vmatpush1.msra.mxu1 %v572_v40  ;;  %v575_v18 = vld [vmem:[#allocation4 + $0xf8] sm:$0xff]  ;;  %v574_v19 = vld [vmem:[#allocation4 + $0xf0] sm:$0xff]  ;;  %v544_v34 = vld [vmem:[#allocation4] sm:$0xff] }
  0x66   : > { %4405 = vmatpush3.msra.mxu0 %v429_v27  ;;  %648 = vmatprep.subr.mxu1 %v569_v41  ;;  %v571_v20 = vld [vmem:[#allocation4 + $0xd8] sm:$0xff]  ;;  %v570_v21 = vld [vmem:[#allocation4 + $0xd0] sm:$0xff]  ;;  %v948_v40 = vld [vmem:[#allocation9 + $0x1e0] sm:$0xff] }
  0x67   : > { %4406 = vmatprep.subr.mxu0 %v428_v30  ;;  %649 = vmatpush1.msra.mxu1 %v568_v43  ;;  %v567_v22 = vld [vmem:[#allocation4 + $0xb8] sm:$0xff]  ;;  %v566_v23 = vld [vmem:[#allocation4 + $0xb0] sm:$0xff]  ;;  %v945_v43 = vld [vmem:[#allocation9 + $0x1c8] sm:$0xff] }
  0x68   : > { %4407 = vmatpush3.msra.mxu0 %v428_v30  ;;  %650 = vmatprep.subr.mxu1 %v565_v44  ;;  %v563_v24 = vld [vmem:[#allocation4 + $0x98] sm:$0xff]  ;;  %v562_v25 = vld [vmem:[#allocation4 + $0x90] sm:$0xff] }
  0x69   : > { %4408 = vmatprep.subr.mxu0 %v427_v33  ;;  %651 = vmatpush1.msra.mxu1 %v564_v46  ;;  %v559_v26 = vld [vmem:[#allocation4 + $0x78] sm:$0xff]  ;;  %v558_v27 = vld [vmem:[#allocation4 + $0x70] sm:$0xff] }
  0x6a   : > { %4409 = vmatpush3.msra.mxu0 %v427_v33  ;;  %652 = vmatprep.subr.mxu1 %v561_v47  ;;  %v555_v28 = vld [vmem:[#allocation4 + $0x58] sm:$0xff]  ;;  %v554_v29 = vld [vmem:[#allocation4 + $0x50] sm:$0xff]  ;;  %v941_v47 = vld [vmem:[#allocation9 + $0x1a8] sm:$0xff] }
  0x6b   : > { %4410 = vmatprep.subr.mxu0 %v426_v36  ;;  %653 = vmatpush1.msra.mxu1 %v560_v49  ;;  %v551_v30 = vld [vmem:[#allocation4 + $0x38] sm:$0xff]  ;;  %v550_v31 = vld [vmem:[#allocation4 + $0x30] sm:$0xff]  ;;  %v940_v49 = vld [vmem:[#allocation9 + $0x1a0] sm:$0xff] }
  0x6c   : > { %4411 = vmatpush3.msra.mxu0 %v426_v36  ;;  %654 = vmatprep.subr.mxu1 %v557_v50  ;;  %v547_v33 = vld [vmem:[#allocation4 + $0x18] sm:$0xff]  ;;  %v546_v35 = vld [vmem:[#allocation4 + $0x10] sm:$0xff]  ;;  %v949_v36 = vld [vmem:[#allocation9 + $0x1e8] sm:$0xff] }
  0x6d   : > { %4412 = vmatprep.subr.mxu0 %v425_v39  ;;  %655 = vmatpush1.msra.mxu1 %v556_v51  ;;  %v951_v37 = vld [vmem:[#allocation9 + $0x1f8] sm:$0xff]  ;;  %v950_v41 = vld [vmem:[#allocation9 + $0x1f0] sm:$0xff]  ;;  %v937_v51 = vld [vmem:[#allocation9 + $0x188] sm:$0xff] }
  0x6e   : > { %4413 = vmatpush3.msra.mxu0 %v425_v39  ;;  %656 = vmatprep.subr.mxu1 %v553_v52  ;;  %v947_v44 = vld [vmem:[#allocation9 + $0x1d8] sm:$0xff]  ;;  %v946_v46 = vld [vmem:[#allocation9 + $0x1d0] sm:$0xff] }
  0x6f   : > { %4414 = vmatprep.subr.mxu0 %v424_v42  ;;  %657 = vmatpush1.msra.mxu1 %v552_v53  ;;  %v942_v50 = vld [vmem:[#allocation9 + $0x1b0] sm:$0xff]  ;;  %v939_v52 = vld [vmem:[#allocation9 + $0x198] sm:$0xff]  ;;  %v936_v53 = vld [vmem:[#allocation9 + $0x180] sm:$0xff] }
  0x70   : > { %4415 = vmatpush3.msra.mxu0 %v424_v42  ;;  %658 = vmatprep.subr.mxu1 %v549_v54  ;;  %v938_v54 = vld [vmem:[#allocation9 + $0x190] sm:$0xff]  ;;  %v5698_v56 = vld [vmem:[#allocation7 + $0x18] sm:$0xff] }
  0x71   : > { %4416 = vmatprep.subr.mxu0 %v423_v45  ;;  %659 = vmatpush1.msra.mxu1 %v548_v55  ;;  %8221 = vst [vmem:[#allocation26_spill] sm:$0xff] %v5698_v56 }
  0x72   : > { %4417 = vmatpush3.msra.mxu0 %v423_v45  ;;  %660 = vmatprep.subr.mxu1 %v545_v32  ;;  %v944_v45 = vld [vmem:[#allocation9 + $0x1c0] sm:$0xff]  ;;  %v902_v32 = vld [vmem:[#allocation9 + $0x70] sm:$0xff] }
  0x73   : > { %743 = vmatprep.subr.mxu0 %v607_v48  ;;  %661 = vmatpush1.msra.mxu1 %v544_v34  ;;  %v943_v48 = vld [vmem:[#allocation9 + $0x1b8] sm:$0xff]  ;;  %v897_v34 = vld [vmem:[#allocation9 + $0x48] sm:$0xff] }
  0x74   : > { %694 = vmatprep.mubr.f32.mxu1 %v7815_v38  ;;  %974 = vmatprep.subr.mxu1 %v949_v36  ;;  %v896_v36 = vld [vmem:[#allocation9 + $0x40] sm:$0xff] }
  0xcf   : > { %v383_v58 = vpop.permute.xlu1 %382  ;;  %v377_v59 = vpop.permute.xlu0 %376 }
  0xd0   : > { %vm399_vm0 = vcmp.eq.s32.totalorder %v377_v59, %v374_v57  ;;  %vm401_vm1 = vcmp.eq.s32.totalorder %v383_v58, %v374_v57  ;;  %v935_v58 = vld [vmem:[#allocation9 + $0x178] sm:$0xff]  ;;  %v932_v59 = vld [vmem:[#allocation9 + $0x160] sm:$0xff] }
  0xd1   : > { %4418 = vmatprep.mubr.msk.f32.mxu0 %vm399_vm0, %v5218_v60 }
  0xd3   : > { %v386_v61 = vpop.permute.xlu1 %385  ;;  %v380_v62 = vpop.permute.xlu0 %379 }
  0xd4   : > { %vm400_vm2 = vcmp.eq.s32.totalorder %v380_v62, %v374_v57  ;;  %vm402_vm3 = vcmp.eq.s32.totalorder %v386_v61, %v374_v57  ;;  %v929_v62 = vld [vmem:[#allocation9 + $0x148] sm:$0xff] }
  0xd5   : > { %4419 = vmatmul.mubr.msk.f32.vlgmr.msra.gmra.mxu0 %vm400_vm2, %v5218_v60 }
  0xd6   : > { %4421 = vmatprep.mubr.msk.f32.mxu0 %vm401_vm1, %v5218_v60  ;;  %744 = vmatpush1.msra.mxu0 %v606_v63  ;;  %v931_v63 = vld [vmem:[#allocation9 + $0x158] sm:$0xff] }
  0xd7   : > { %v392_v3 = vpop.permute.xlu1 %391  ;;  %v389_v4 = vpop.permute.xlu0 %388  ;;  %745 = vmatprep.subr.mxu0 %v603_v0  ;;  %v928_v0 = vld [vmem:[#allocation9 + $0x140] sm:$0xff] }
  0xd8   : > { %vm403_vm4 = vcmp.eq.s32.totalorder %v389_v4, %v374_v57  ;;  %746 = vmatpush1.msra.mxu0 %v602_v1  ;;  %vm404_vm5 = vcmp.eq.s32.totalorder %v392_v3, %v374_v57  ;;  %v930_v1 = vld [vmem:[#allocation9 + $0x150] sm:$0xff]  ;;  %v927_v3 = vld [vmem:[#allocation9 + $0x138] sm:$0xff]  ;;  %v924_v4 = vld [vmem:[#allocation9 + $0x120] sm:$0xff] }
  0xd9   : > { %4422 = vmatmul.mubr.msk.f32.gmra.mxu0 %vm402_vm3, %v5218_v60  ;;  %747 = vmatprep.subr.mxu0 %v599_v2  ;;  %v925_v2 = vld [vmem:[#allocation9 + $0x128] sm:$0xff] }
  0xda   : > { %4424 = vmatprep.mubr.msk.f32.mxu0 %vm403_vm4, %v5218_v60  ;;  %748 = vmatpush1.msra.mxu0 %v598_v5  ;;  %v926_v5 = vld [vmem:[#allocation9 + $0x130] sm:$0xff] }
  0xdb   : > { %v395_v9 = vpop.permute.xlu0 %394  ;;  %749 = vmatprep.subr.mxu0 %v595_v6  ;;  %v398_v12 = vpop.permute.xlu1 %397  ;;  %v921_v6 = vld [vmem:[#allocation9 + $0x108] sm:$0xff] }
  0xdc   : > { %vm405_vm6 = vcmp.eq.s32.totalorder %v395_v9, %v374_v57  ;;  %750 = vmatpush1.msra.mxu0 %v594_v7  ;;  %vm406_vm7 = vcmp.eq.s32.totalorder %v398_v12, %v374_v57  ;;  %v933_v57 = vld [vmem:[#allocation9 + $0x168] sm:$0xff]  ;;  %v923_v7 = vld [vmem:[#allocation9 + $0x118] sm:$0xff]  ;;  %v922_v9 = vld [vmem:[#allocation9 + $0x110] sm:$0xff] }
  0xdd   : > { %4425 = vmatmul.mubr.msk.f32.gmra.mxu0 %vm404_vm5, %v5218_v60  ;;  %751 = vmatprep.subr.mxu0 %v591_v8  ;;  %v920_v8 = vld [vmem:[#allocation9 + $0x100] sm:$0xff]  ;;  %v919_v12 = vld [vmem:[#allocation9 + $0xf8] sm:$0xff] }
  0xde   : > { %4427 = vmatprep.mubr.msk.f32.mxu0 %vm405_vm6, %v5218_v60  ;;  %752 = vmatpush1.msra.mxu0 %v590_v10 }
  0xdf   : > { %753 = vmatprep.subr.mxu0 %v587_v11  ;;  %v917_v11 = vld [vmem:[#allocation9 + $0xe8] sm:$0xff] }
  0xe0   : > { %754 = vmatpush1.msra.mxu0 %v586_v13  ;;  %v916_v13 = vld [vmem:[#allocation9 + $0xe0] sm:$0xff] }
  0xe1   : > { %4428 = vmatmul.mubr.msk.f32.gmra.mxu0 %vm406_vm7, %v5218_v60  ;;  %755 = vmatprep.subr.mxu0 %v583_v14  ;;  %v934_v60 = vld [vmem:[#allocation9 + $0x170] sm:$0xff] }
  0xe2   : > { %756 = vmatpush1.msra.mxu0 %v582_v15  ;;  %807 = vmatprep.mubr.f32.mxu0 %v7815_v38  ;;  %v918_v14 = vld [vmem:[#allocation9 + $0xf0] sm:$0xff] }
  0xe3   : > { %757 = vmatprep.subr.mxu0 %v579_v16  ;;  %v913_v16 = vld [vmem:[#allocation9 + $0xc8] sm:$0xff] }
  0xe4   : > { %758 = vmatpush1.msra.mxu0 %v578_v17  ;;  %v915_v17 = vld [vmem:[#allocation9 + $0xd8] sm:$0xff] }
  0xe5   : > { %759 = vmatprep.subr.mxu0 %v575_v18  ;;  %v912_v18 = vld [vmem:[#allocation9 + $0xc0] sm:$0xff] }
  0xe6   : > { %760 = vmatpush1.msra.mxu0 %v574_v19  ;;  %v914_v19 = vld [vmem:[#allocation9 + $0xd0] sm:$0xff] }
  0xe7   : > { %761 = vmatprep.subr.mxu0 %v571_v20  ;;  %v909_v20 = vld [vmem:[#allocation9 + $0xa8] sm:$0xff] }
  0xe8   : > { %762 = vmatpush1.msra.mxu0 %v570_v21  ;;  %v911_v21 = vld [vmem:[#allocation9 + $0xb8] sm:$0xff] }
  0xe9   : > { %763 = vmatprep.subr.mxu0 %v567_v22  ;;  %v908_v22 = vld [vmem:[#allocation9 + $0xa0] sm:$0xff] }
  0xea   : > { %764 = vmatpush1.msra.mxu0 %v566_v23  ;;  %v910_v23 = vld [vmem:[#allocation9 + $0xb0] sm:$0xff] }
  0xeb   : > { %765 = vmatprep.subr.mxu0 %v563_v24  ;;  %v905_v24 = vld [vmem:[#allocation9 + $0x88] sm:$0xff] }
  0xec   : > { %766 = vmatpush1.msra.mxu0 %v562_v25  ;;  %v907_v25 = vld [vmem:[#allocation9 + $0x98] sm:$0xff] }
  0xed   : > { %767 = vmatprep.subr.mxu0 %v559_v26  ;;  %v904_v26 = vld [vmem:[#allocation9 + $0x80] sm:$0xff] }
  0xee   : > { %768 = vmatpush1.msra.mxu0 %v558_v27  ;;  %v906_v27 = vld [vmem:[#allocation9 + $0x90] sm:$0xff] }
  0xef   : > { %769 = vmatprep.subr.mxu0 %v555_v28 }
  0xf0   : > { %770 = vmatpush1.msra.mxu0 %v554_v29  ;;  %v901_v29 = vld [vmem:[#allocation9 + $0x68] sm:$0xff] }
  0xf1   : > { %771 = vmatprep.subr.mxu0 %v551_v30  ;;  %v903_v30 = vld [vmem:[#allocation9 + $0x78] sm:$0xff] }
  0xf2   : > { %772 = vmatpush1.msra.mxu0 %v550_v31  ;;  %v900_v31 = vld [vmem:[#allocation9 + $0x60] sm:$0xff] }
  0xf3   : > { %773 = vmatprep.subr.mxu0 %v547_v33 }
  0xf4   : > { %774 = vmatpush1.msra.mxu0 %v546_v35  ;;  %v899_v35 = vld [vmem:[#allocation9 + $0x58] sm:$0xff] }
  0xf5   : > { %1087 = vmatprep.subr.mxu0 %v951_v37  ;;  %v898_v37 = vld [vmem:[#allocation9 + $0x50] sm:$0xff] }
 0x195   : > { %v5442_v39 = vpop.f32.mrf.mxu0 }
 0x197   : > { %v5444_v42 = vpop.f32.mrf.mxu0 }
 0x198   : > { %695 = vmatmul.mubr.f32.vlgmr.msra.gmra.mxu1 %v5444_v42  ;;  %808 = vmatmul.mubr.f32.vlgmr.msra.gmra.mxu0 %v5444_v42 }
 0x199   : > { %975 = vmatpush1.msra.mxu1 %v948_v40  ;;  %1088 = vmatpush1.msra.mxu0 %v950_v41  ;;  %v5452_v55 = vpop.f32.mrf.mxu0  ;;  %v893_v40 = vld [vmem:[#allocation9 + $0x28] sm:$0xff]  ;;  %v895_v41 = vld [vmem:[#allocation9 + $0x38] sm:$0xff] }
 0x19a   : > { %976 = vmatprep.subr.mxu1 %v945_v43  ;;  %1089 = vmatprep.subr.mxu0 %v947_v44  ;;  %v892_v43 = vld [vmem:[#allocation9 + $0x20] sm:$0xff]  ;;  %v894_v44 = vld [vmem:[#allocation9 + $0x30] sm:$0xff] }
 0x19b   : > { %977 = vmatpush1.msra.mxu1 %v944_v45  ;;  %1090 = vmatpush1.msra.mxu0 %v946_v46  ;;  %v5456_v61 = vpop.f32.mrf.mxu0  ;;  %v889_v45 = vld [vmem:[#allocation9 + $0x8] sm:$0xff]  ;;  %v891_v46 = vld [vmem:[#allocation9 + $0x18] sm:$0xff] }
 0x19c   : > { %700 = vmatprep.mubr.f32.mxu1 %v7815_v38  ;;  %813 = vmatprep.mubr.f32.mxu0 %v7815_v38 }
 0x19d   : > { %978 = vmatprep.subr.mxu1 %v941_v47  ;;  %1091 = vmatprep.subr.mxu0 %v943_v48  ;;  %v5464_v10 = vpop.f32.mrf.mxu0  ;;  %v888_v47 = vld [vmem:[#allocation9] sm:$0xff]  ;;  %v890_v48 = vld [vmem:[#allocation9 + $0x10] sm:$0xff] }
 0x19e   : > { %701 = vmatmul.mubr.f32.gmra.mxu1 %v5442_v39  ;;  %814 = vmatmul.mubr.f32.gmra.mxu0 %v5442_v39 }
 0x19f   : > { %979 = vmatpush1.msra.mxu1 %v940_v49  ;;  %1092 = vmatpush1.msra.mxu0 %v942_v50  ;;  %v5468_v15 = vpop.f32.mrf.mxu0  ;;  %v5488_v49 = vld [vmem:[#allocation7 + $0x1e8] sm:$0xff]  ;;  %v5490_v50 = vld [vmem:[#allocation7 + $0x1f8] sm:$0xff] }
 0x1a0   : > { %980 = vmatprep.subr.mxu1 %v937_v51  ;;  %1093 = vmatprep.subr.mxu0 %v939_v52  ;;  %v5494_v51 = vld [vmem:[#allocation7 + $0x1e0] sm:$0xff]  ;;  %v5496_v52 = vld [vmem:[#allocation7 + $0x1f0] sm:$0xff] }
 0x1a1   : > { %981 = vmatpush1.msra.mxu1 %v936_v53  ;;  %1094 = vmatpush1.msra.mxu0 %v938_v54  ;;  %v5476_v28 = vpop.f32.mrf.mxu0  ;;  %v5500_v53 = vld [vmem:[#allocation7 + $0x1c8] sm:$0xff]  ;;  %v5502_v54 = vld [vmem:[#allocation7 + $0x1d8] sm:$0xff] }
 0x1a2   : > { %706 = vmatprep.mubr.f32.mxu1 %v7815_v38  ;;  %819 = vmatprep.mubr.f32.mxu0 %v7815_v38 }
 0x1a3   : > { %982 = vmatprep.subr.mxu1 %v933_v57  ;;  %1095 = vmatprep.subr.mxu0 %v935_v58  ;;  %v5480_v33 = vpop.f32.mrf.mxu0  ;;  %v5506_v57 = vld [vmem:[#allocation7 + $0x1c0] sm:$0xff]  ;;  %v5508_v58 = vld [vmem:[#allocation7 + $0x1d0] sm:$0xff] }
 0x1a4   : > { %707 = vmatmul.mubr.f32.gmra.mxu1 %v5456_v61  ;;  %820 = vmatmul.mubr.f32.gmra.mxu0 %v5456_v61 }
 0x1a5   : > { %983 = vmatpush1.msra.mxu1 %v932_v59  ;;  %1096 = vmatpush1.msra.mxu0 %v934_v60  ;;  %v5514_v59 = vld [vmem:[#allocation7 + $0x1a8] sm:$0xff]  ;;  %v5516_v60 = vld [vmem:[#allocation7 + $0x1b8] sm:$0xff] }
 0x1a6   : > { %984 = vmatprep.subr.mxu1 %v929_v62  ;;  %1097 = vmatprep.subr.mxu0 %v931_v63  ;;  %v5524_v62 = vld [vmem:[#allocation7 + $0x1b0] sm:$0xff]  ;;  %v5528_v63 = vld [vmem:[#allocation7 + $0x188] sm:$0xff] }
 0x1a7   : > { %985 = vmatpush1.msra.mxu1 %v928_v0  ;;  %1098 = vmatpush1.msra.mxu0 %v930_v1  ;;  %v5530_v0 = vld [vmem:[#allocation7 + $0x198] sm:$0xff]  ;;  %v5534_v1 = vld [vmem:[#allocation7 + $0x180] sm:$0xff] }
 0x1a8   : > { %712 = vmatprep.mubr.f32.mxu1 %v7815_v38  ;;  %825 = vmatprep.mubr.f32.mxu0 %v7815_v38 }
 0x1a9   : > { %986 = vmatprep.subr.mxu1 %v925_v2  ;;  %1099 = vmatprep.subr.mxu0 %v927_v3  ;;  %v5536_v2 = vld [vmem:[#allocation7 + $0x190] sm:$0xff]  ;;  %v5542_v3 = vld [vmem:[#allocation7 + $0x168] sm:$0xff] }
 0x1aa   : > { %713 = vmatmul.mubr.f32.gmra.mxu1 %v5452_v55  ;;  %826 = vmatmul.mubr.f32.gmra.mxu0 %v5452_v55 }
 0x1ab   : > { %987 = vmatpush1.msra.mxu1 %v924_v4  ;;  %1100 = vmatpush1.msra.mxu0 %v926_v5  ;;  %v5544_v4 = vld [vmem:[#allocation7 + $0x178] sm:$0xff]  ;;  %v5552_v5 = vld [vmem:[#allocation7 + $0x170] sm:$0xff] }
 0x1ac   : > { %988 = vmatprep.subr.mxu1 %v921_v6  ;;  %1101 = vmatprep.subr.mxu0 %v923_v7  ;;  %v5556_v6 = vld [vmem:[#allocation7 + $0x148] sm:$0xff]  ;;  %v5558_v7 = vld [vmem:[#allocation7 + $0x158] sm:$0xff] }
 0x1ad   : > { %989 = vmatpush1.msra.mxu1 %v920_v8  ;;  %1102 = vmatpush1.msra.mxu0 %v922_v9  ;;  %v5562_v8 = vld [vmem:[#allocation7 + $0x140] sm:$0xff]  ;;  %v5564_v9 = vld [vmem:[#allocation7 + $0x150] sm:$0xff] }
 0x1ae   : > { %718 = vmatprep.mubr.f32.mxu1 %v7815_v38  ;;  %831 = vmatprep.mubr.f32.mxu0 %v7815_v38 }
 0x1af   : > { %990 = vmatprep.subr.mxu1 %v917_v11  ;;  %1103 = vmatprep.subr.mxu0 %v919_v12  ;;  %v5570_v11 = vld [vmem:[#allocation7 + $0x128] sm:$0xff]  ;;  %v5572_v12 = vld [vmem:[#allocation7 + $0x138] sm:$0xff] }
 0x1b0   : > { %719 = vmatmul.mubr.f32.gmra.mxu1 %v5468_v15  ;;  %832 = vmatmul.mubr.f32.gmra.mxu0 %v5468_v15 }
 0x1b1   : > { %991 = vmatpush1.msra.mxu1 %v916_v13  ;;  %1104 = vmatpush1.msra.mxu0 %v918_v14  ;;  %v5580_v13 = vld [vmem:[#allocation7 + $0x130] sm:$0xff]  ;;  %v5584_v14 = vld [vmem:[#allocation7 + $0x108] sm:$0xff] }
 0x1b2   : > { %992 = vmatprep.subr.mxu1 %v913_v16  ;;  %1105 = vmatprep.subr.mxu0 %v915_v17  ;;  %v5586_v16 = vld [vmem:[#allocation7 + $0x118] sm:$0xff]  ;;  %v5590_v17 = vld [vmem:[#allocation7 + $0x100] sm:$0xff] }
 0x1b3   : > { %993 = vmatpush1.msra.mxu1 %v912_v18  ;;  %1106 = vmatpush1.msra.mxu0 %v914_v19  ;;  %v5592_v18 = vld [vmem:[#allocation7 + $0x110] sm:$0xff]  ;;  %v5598_v19 = vld [vmem:[#allocation7 + $0xe8] sm:$0xff] }
 0x1b4   : > { %724 = vmatprep.mubr.f32.mxu1 %v7815_v38  ;;  %837 = vmatprep.mubr.f32.mxu0 %v7815_v38 }
 0x1b5   : > { %994 = vmatprep.subr.mxu1 %v909_v20  ;;  %1107 = vmatprep.subr.mxu0 %v911_v21  ;;  %v5600_v20 = vld [vmem:[#allocation7 + $0xf8] sm:$0xff]  ;;  %v5608_v21 = vld [vmem:[#allocation7 + $0xf0] sm:$0xff] }
 0x1b6   : > { %725 = vmatmul.mubr.f32.gmra.mxu1 %v5464_v10  ;;  %838 = vmatmul.mubr.f32.gmra.mxu0 %v5464_v10 }
 0x1b7   : > { %995 = vmatpush1.msra.mxu1 %v908_v22  ;;  %1108 = vmatpush1.msra.mxu0 %v910_v23  ;;  %v5612_v22 = vld [vmem:[#allocation7 + $0xc8] sm:$0xff]  ;;  %v5614_v23 = vld [vmem:[#allocation7 + $0xd8] sm:$0xff] }
 0x1b8   : > { %996 = vmatprep.subr.mxu1 %v905_v24  ;;  %1109 = vmatprep.subr.mxu0 %v907_v25  ;;  %v5618_v24 = vld [vmem:[#allocation7 + $0xc0] sm:$0xff]  ;;  %v5620_v25 = vld [vmem:[#allocation7 + $0xd0] sm:$0xff] }
 0x1b9   : > { %997 = vmatpush1.msra.mxu1 %v904_v26  ;;  %1110 = vmatpush1.msra.mxu0 %v906_v27  ;;  %v5626_v26 = vld [vmem:[#allocation7 + $0xa8] sm:$0xff]  ;;  %v5628_v27 = vld [vmem:[#allocation7 + $0xb8] sm:$0xff] }
 0x1ba   : > { %730 = vmatprep.mubr.f32.mxu1 %v7815_v38  ;;  %843 = vmatprep.mubr.f32.mxu0 %v7815_v38 }
 0x1bb   : > { %998 = vmatprep.subr.mxu1 %v901_v29  ;;  %1111 = vmatprep.subr.mxu0 %v903_v30  ;;  %v5636_v29 = vld [vmem:[#allocation7 + $0xb0] sm:$0xff]  ;;  %v5640_v30 = vld [vmem:[#allocation7 + $0x88] sm:$0xff] }
 0x1bc   : > { %731 = vmatmul.mubr.f32.gmra.mxu1 %v5480_v33  ;;  %844 = vmatmul.mubr.f32.gmra.mxu0 %v5480_v33 }
 0x1bd   : > { %999 = vmatpush1.msra.mxu1 %v900_v31  ;;  %1112 = vmatpush1.msra.mxu0 %v902_v32  ;;  %v5642_v31 = vld [vmem:[#allocation7 + $0x98] sm:$0xff]  ;;  %v5646_v32 = vld [vmem:[#allocation7 + $0x80] sm:$0xff] }
 0x1be   : > { %1000 = vmatprep.subr.mxu1 %v897_v34  ;;  %1113 = vmatprep.subr.mxu0 %v899_v35  ;;  %v5648_v34 = vld [vmem:[#allocation7 + $0x90] sm:$0xff]  ;;  %v5654_v35 = vld [vmem:[#allocation7 + $0x68] sm:$0xff] }
 0x1bf   : > { %1001 = vmatpush1.msra.mxu1 %v896_v36  ;;  %1114 = vmatpush1.msra.mxu0 %v898_v37  ;;  %v5656_v36 = vld [vmem:[#allocation7 + $0x78] sm:$0xff]  ;;  %v5664_v37 = vld [vmem:[#allocation7 + $0x70] sm:$0xff] }
 0x1c0   : > { %736 = vmatprep.mubr.f32.mxu1 %v7815_v38  ;;  %849 = vmatprep.mubr.f32.mxu0 %v7815_v38 }
 0x1c1   : > { %1002 = vmatprep.subr.mxu1 %v893_v40  ;;  %1115 = vmatprep.subr.mxu0 %v895_v41  ;;  %v5668_v40 = vld [vmem:[#allocation7 + $0x48] sm:$0xff]  ;;  %v5670_v41 = vld [vmem:[#allocation7 + $0x58] sm:$0xff] }
 0x1c2   : > { %737 = vmatmul.mubr.f32.gmra.mxu1 %v5476_v28  ;;  %850 = vmatmul.mubr.f32.gmra.mxu0 %v5476_v28  ;;  %8212 = vst [vmem:[#allocation17_spill] sm:$0xff] %v5668_v40  ;;  %8213 = vst [vmem:[#allocation18_spill] sm:$0xff] %v5670_v41 }
 0x1c3   : > { %1003 = vmatpush1.msra.mxu1 %v892_v43  ;;  %1116 = vmatpush1.msra.mxu0 %v894_v44  ;;  %v5674_v43 = vld [vmem:[#allocation7 + $0x40] sm:$0xff]  ;;  %v5676_v44 = vld [vmem:[#allocation7 + $0x50] sm:$0xff] }
 0x1c4   : > { %1004 = vmatprep.subr.mxu1 %v889_v45  ;;  %1117 = vmatprep.subr.mxu0 %v891_v46  ;;  %8214 = vst [vmem:[#allocation19_spill] sm:$0xff] %v5674_v43  ;;  %8215 = vst [vmem:[#allocation20_spill] sm:$0xff] %v5676_v44  ;;  %v5682_v45 = vld [vmem:[#allocation7 + $0x28] sm:$0xff]  ;;  %v5684_v46 = vld [vmem:[#allocation7 + $0x38] sm:$0xff] }
 0x1c5   : > { %1005 = vmatpush1.msra.mxu1 %v888_v47  ;;  %1118 = vmatpush1.msra.mxu0 %v890_v48  ;;  %8216 = vst [vmem:[#allocation21_spill] sm:$0xff] %v5682_v45  ;;  %8217 = vst [vmem:[#allocation22_spill] sm:$0xff] %v5684_v46  ;;  %v5692_v47 = vld [vmem:[#allocation7 + $0x30] sm:$0xff]  ;;  %v5696_v48 = vld [vmem:[#allocation7 + $0x8] sm:$0xff] }
 0x1c6   : > { %1038 = vmatprep.mubr.f32.mxu1 %v7815_v38  ;;  %1151 = vmatprep.mubr.f32.mxu0 %v7815_v38  ;;  %8219 = vst [vmem:[#allocation24_spill] sm:$0xff] %v5692_v47  ;;  %8220 = vst [vmem:[#allocation25_spill] sm:$0xff] %v5696_v48 }
 0x1c7   : > { %1300 = vmatprep.subr.mxu1 %v5488_v49  ;;  %1371 = vmatprep.subr.mxu0 %v5490_v50 }
 0x1c8   : > { %1039 = vmatmul.mubr.f32.vlgmr.msra.gmra.mxu1 %v5444_v42  ;;  %1152 = vmatmul.mubr.f32.vlgmr.msra.gmra.mxu0 %v5444_v42  ;;  %v5522_v42 = vld [vmem:[#allocation7 + $0x1a0] sm:$0xff] }
 0x1c9   : > { %1301 = vmatpush1.msra.mxu1 %v5494_v51  ;;  %1372 = vmatpush1.msra.mxu0 %v5496_v52 }
 0x1ca   : > { %1302 = vmatprep.subr.mxu1 %v5500_v53  ;;  %1373 = vmatprep.subr.mxu0 %v5502_v54 }
 0x1cb   : > { %1303 = vmatpush1.msra.mxu1 %v5506_v57  ;;  %1374 = vmatpush1.msra.mxu0 %v5508_v58 }
 0x1cc   : > { %1044 = vmatprep.mubr.f32.mxu1 %v7815_v38  ;;  %1157 = vmatprep.mubr.f32.mxu0 %v7815_v38 }
 0x1cd   : > { %1304 = vmatprep.subr.mxu1 %v5514_v59  ;;  %1375 = vmatprep.subr.mxu0 %v5516_v60 }
 0x1ce   : > { %1045 = vmatmul.mubr.f32.gmra.mxu1 %v5442_v39  ;;  %1158 = vmatmul.mubr.f32.gmra.mxu0 %v5442_v39  ;;  %v5550_v39 = vld [vmem:[#allocation7 + $0x160] sm:$0xff] }
 0x1cf   : > { %1305 = vmatpush1.msra.mxu1 %v5522_v42  ;;  %1376 = vmatpush1.msra.mxu0 %v5524_v62 }
 0x1d0   : > { %1306 = vmatprep.subr.mxu1 %v5528_v63  ;;  %1377 = vmatprep.subr.mxu0 %v5530_v0 }
 0x1d1   : > { %1307 = vmatpush1.msra.mxu1 %v5534_v1  ;;  %1378 = vmatpush1.msra.mxu0 %v5536_v2 }
 0x1d2   : > { %1050 = vmatprep.mubr.f32.mxu1 %v7815_v38  ;;  %1163 = vmatprep.mubr.f32.mxu0 %v7815_v38 }
 0x1d3   : > { %1308 = vmatprep.subr.mxu1 %v5542_v3  ;;  %1379 = vmatprep.subr.mxu0 %v5544_v4 }
 0x1d4   : > { %1051 = vmatmul.mubr.f32.gmra.mxu1 %v5456_v61  ;;  %1164 = vmatmul.mubr.f32.gmra.mxu0 %v5456_v61  ;;  %v5578_v61 = vld [vmem:[#allocation7 + $0x120] sm:$0xff] }
 0x1d5   : > { %1309 = vmatpush1.msra.mxu1 %v5550_v39  ;;  %1380 = vmatpush1.msra.mxu0 %v5552_v5 }
 0x1d6   : > { %1310 = vmatprep.subr.mxu1 %v5556_v6  ;;  %1381 = vmatprep.subr.mxu0 %v5558_v7 }
 0x1d7   : > { %1311 = vmatpush1.msra.mxu1 %v5562_v8  ;;  %1382 = vmatpush1.msra.mxu0 %v5564_v9 }
 0x1d8   : > { %1056 = vmatprep.mubr.f32.mxu1 %v7815_v38  ;;  %1169 = vmatprep.mubr.f32.mxu0 %v7815_v38 }
 0x1d9   : > { %1312 = vmatprep.subr.mxu1 %v5570_v11  ;;  %1383 = vmatprep.subr.mxu0 %v5572_v12 }
 0x1da   : > { %1057 = vmatmul.mubr.f32.gmra.mxu1 %v5452_v55  ;;  %1170 = vmatmul.mubr.f32.gmra.mxu0 %v5452_v55  ;;  %v5606_v55 = vld [vmem:[#allocation7 + $0xe0] sm:$0xff] }
 0x1db   : > { %1313 = vmatpush1.msra.mxu1 %v5578_v61  ;;  %1384 = vmatpush1.msra.mxu0 %v5580_v13 }
 0x1dc   : > { %1314 = vmatprep.subr.mxu1 %v5584_v14  ;;  %1385 = vmatprep.subr.mxu0 %v5586_v16 }
 0x1dd   : > { %1315 = vmatpush1.msra.mxu1 %v5590_v17  ;;  %1386 = vmatpush1.msra.mxu0 %v5592_v18 }
 0x1de   : > { %1062 = vmatprep.mubr.f32.mxu1 %v7815_v38  ;;  %1175 = vmatprep.mubr.f32.mxu0 %v7815_v38 }
 0x1df   : > { %1316 = vmatprep.subr.mxu1 %v5598_v19  ;;  %1387 = vmatprep.subr.mxu0 %v5600_v20 }
 0x1e0   : > { %1063 = vmatmul.mubr.f32.gmra.mxu1 %v5468_v15  ;;  %1176 = vmatmul.mubr.f32.gmra.mxu0 %v5468_v15  ;;  %v5634_v15 = vld [vmem:[#allocation7 + $0xa0] sm:$0xff] }
 0x1e1   : > { %1317 = vmatpush1.msra.mxu1 %v5606_v55  ;;  %1388 = vmatpush1.msra.mxu0 %v5608_v21 }
 0x1e2   : > { %1318 = vmatprep.subr.mxu1 %v5612_v22  ;;  %1389 = vmatprep.subr.mxu0 %v5614_v23 }
 0x1e3   : > { %1319 = vmatpush1.msra.mxu1 %v5618_v24  ;;  %1390 = vmatpush1.msra.mxu0 %v5620_v25 }
 0x1e4   : > { %1068 = vmatprep.mubr.f32.mxu1 %v7815_v38  ;;  %1181 = vmatprep.mubr.f32.mxu0 %v7815_v38 }
 0x1e5   : > { %1320 = vmatprep.subr.mxu1 %v5626_v26  ;;  %1391 = vmatprep.subr.mxu0 %v5628_v27 }
 0x1e6   : > { %1069 = vmatmul.mubr.f32.gmra.mxu1 %v5464_v10  ;;  %1182 = vmatmul.mubr.f32.gmra.mxu0 %v5464_v10  ;;  %v5662_v10 = vld [vmem:[#allocation7 + $0x60] sm:$0xff] }
 0x1e7   : > { %1321 = vmatpush1.msra.mxu1 %v5634_v15  ;;  %1392 = vmatpush1.msra.mxu0 %v5636_v29 }
 0x1e8   : > { %1322 = vmatprep.subr.mxu1 %v5640_v30  ;;  %1393 = vmatprep.subr.mxu0 %v5642_v31 }
 0x1e9   : > { %1323 = vmatpush1.msra.mxu1 %v5646_v32  ;;  %1394 = vmatpush1.msra.mxu0 %v5648_v34 }
 0x1ea   : > { %1074 = vmatprep.mubr.f32.mxu1 %v7815_v38  ;;  %1187 = vmatprep.mubr.f32.mxu0 %v7815_v38 }
 0x1eb   : > { %1324 = vmatprep.subr.mxu1 %v5654_v35  ;;  %1395 = vmatprep.subr.mxu0 %v5656_v36 }
 0x1ec   : > { %1075 = vmatmul.mubr.f32.gmra.mxu1 %v5480_v33  ;;  %1188 = vmatmul.mubr.f32.gmra.mxu0 %v5480_v33  ;;  %v5690_v33 = vld [vmem:[#allocation7 + $0x20] sm:$0xff] }
 0x1ed   : > { %1325 = vmatpush1.msra.mxu1 %v5662_v10  ;;  %1396 = vmatpush1.msra.mxu0 %v5664_v37  ;;  %8218 = vst [vmem:[#allocation23_spill] sm:$0xff] %v5690_v33 }
 0x1ee   : > { %1326 = vmatprep.subr.mxu1 %v5668_v40  ;;  %1397 = vmatprep.subr.mxu0 %v5670_v41  ;;  %v5744_v41 = vld [vmem:[#allocation10 + $0x1b0] sm:$0xff]  ;;  %v5748_v40 = vld [vmem:[#allocation10 + $0x188] sm:$0xff] }
 0x1ef   : > { %1327 = vmatpush1.msra.mxu1 %v5674_v43  ;;  %1398 = vmatpush1.msra.mxu0 %v5676_v44  ;;  %v5702_v44 = vld [vmem:[#allocation7] sm:$0xff]  ;;  %v5704_v43 = vld [vmem:[#allocation7 + $0x10] sm:$0xff]  ;;  %8236 = vst [vmem:[#allocation40_spill] sm:$0xff] %v5744_v41  ;;  %8237 = vst [vmem:[#allocation41_spill] sm:$0xff] %v5748_v40 }
 0x1f0   : > { %1080 = vmatprep.mubr.f32.mxu1 %v7815_v38  ;;  %1193 = vmatprep.mubr.f32.mxu0 %v7815_v38  ;;  %8222 = vst [vmem:[#allocation27_spill] sm:$0xff] %v5702_v44  ;;  %8223 = vst [vmem:[#allocation28_spill] sm:$0xff] %v5704_v43  ;;  %v5710_v38 = vld [vmem:[#allocation10 + $0x1e8] sm:$0xff] }
 0x1f1   : > { %1328 = vmatprep.subr.mxu1 %v5682_v45  ;;  %1399 = vmatprep.subr.mxu0 %v5684_v46  ;;  %8224 = vst [vmem:[#allocation29_spill] sm:$0xff] %v5710_v38  ;;  %v5712_v46 = vld [vmem:[#allocation10 + $0x1f8] sm:$0xff]  ;;  %v5718_v45 = vld [vmem:[#allocation10 + $0x1e0] sm:$0xff] }
 0x1f2   : > { %1081 = vmatmul.mubr.f32.gmra.mxu1 %v5476_v28  ;;  %1194 = vmatmul.mubr.f32.gmra.mxu0 %v5476_v28  ;;  %8225 = vst [vmem:[#allocation30_spill] sm:$0xff] %v5712_v46  ;;  %v8226_v28 = vmov 0.0   ;;  %8227 = vst [vmem:[#allocation31_spill] sm:$0xff] %v5718_v45 }
 0x1f3   : > { %1329 = vmatpush1.msra.mxu1 %v5690_v33  ;;  %1400 = vmatpush1.msra.mxu0 %v5692_v47  ;;  %v5720_v33 = vld [vmem:[#allocation10 + $0x1f0] sm:$0xff]  ;;  %v5736_v47 = vld [vmem:[#allocation10 + $0x1a8] sm:$0xff] }
 0x1f4   : > { %1330 = vmatprep.subr.mxu1 %v5696_v48  ;;  %1401 = vmatprep.subr.mxu0 %v5698_v56  ;;  %8228 = vst [vmem:[#allocation32_spill] sm:$0xff] %v5720_v33  ;;  %v5724_v56 = vld [vmem:[#allocation10 + $0x1c8] sm:$0xff]  ;;  %v5726_v48 = vld [vmem:[#allocation10 + $0x1d8] sm:$0xff]  ;;  %8233 = vst [vmem:[#allocation37_spill] sm:$0xff] %v5736_v47 }
 0x1f5   : > { %1331 = vmatpush1.msra.mxu1 %v5702_v44  ;;  %1402 = vmatpush1.msra.mxu0 %v5704_v43  ;;  %8229 = vst [vmem:[#allocation33_spill] sm:$0xff] %v5724_v56  ;;  %8230 = vst [vmem:[#allocation34_spill] sm:$0xff] %v5726_v48  ;;  %v5730_v43 = vld [vmem:[#allocation10 + $0x1c0] sm:$0xff]  ;;  %v5732_v44 = vld [vmem:[#allocation10 + $0x1d0] sm:$0xff] }
 0x1f6   : > { %1364 = vmatprep.mubr.f32.mxu1 %v8226_v28  ;;  %1435 = vmatprep.mubr.f32.mxu0 %v8226_v28  ;;  %8231 = vst [vmem:[#allocation35_spill] sm:$0xff] %v5730_v43  ;;  %8232 = vst [vmem:[#allocation36_spill] sm:$0xff] %v5732_v44 }
 0x1f7   : > { %1538 = vmatprep.subr.mxu1 %v5710_v38  ;;  %1609 = vmatprep.subr.mxu0 %v5712_v46  ;;  %v5738_v38 = vld [vmem:[#allocation10 + $0x1b8] sm:$0xff]  ;;  %v5742_v46 = vld [vmem:[#allocation10 + $0x1a0] sm:$0xff] }
 0x1f8   : > { %1365 = vmatmul.mubr.f32.vlgmr.msra.gmra.mxu1 %v8226_v28  ;;  %1436 = vmatmul.mubr.f32.vlgmr.msra.gmra.mxu0 %v8226_v28  ;;  %8234 = vst [vmem:[#allocation38_spill] sm:$0xff] %v5738_v38  ;;  %8235 = vst [vmem:[#allocation39_spill] sm:$0xff] %v5742_v46 }
 0x1f9   : > { %1539 = vmatpush1.msra.mxu1 %v5718_v45  ;;  %1610 = vmatpush1.msra.mxu0 %v5720_v33  ;;  %v5750_v45 = vld [vmem:[#allocation10 + $0x198] sm:$0xff]  ;;  %v5754_v33 = vld [vmem:[#allocation10 + $0x180] sm:$0xff] }
 0x1fa   : > { %1540 = vmatprep.subr.mxu1 %v5724_v56  ;;  %1611 = vmatprep.subr.mxu0 %v5726_v48  ;;  %8238 = vst [vmem:[#allocation42_spill] sm:$0xff] %v5750_v45  ;;  %8239 = vst [vmem:[#allocation43_spill] sm:$0xff] %v5754_v33  ;;  %v5756_v56 = vld [vmem:[#allocation10 + $0x190] sm:$0xff]  ;;  %v5760_v48 = vld [vmem:[#allocation10 + $0x168] sm:$0xff] }
 0x1fb   : > { %1541 = vmatpush1.msra.mxu1 %v5730_v43  ;;  %1612 = vmatpush1.msra.mxu0 %v5732_v44  ;;  %8240 = vst [vmem:[#allocation44_spill] sm:$0xff] %v5756_v56  ;;  %8241 = vst [vmem:[#allocation45_spill] sm:$0xff] %v5760_v48  ;;  %v5762_v43 = vld [vmem:[#allocation10 + $0x178] sm:$0xff]  ;;  %v5766_v44 = vld [vmem:[#allocation10 + $0x160] sm:$0xff] }
 0x1fc   : > { %1542 = vmatprep.subr.mxu1 %v5736_v47  ;;  %1613 = vmatprep.subr.mxu0 %v5738_v38  ;;  %8242 = vst [vmem:[#allocation46_spill] sm:$0xff] %v5762_v43  ;;  %8243 = vst [vmem:[#allocation47_spill] sm:$0xff] %v5766_v44  ;;  %v5768_v47 = vld [vmem:[#allocation10 + $0x170] sm:$0xff]  ;;  %v5772_v38 = vld [vmem:[#allocation10 + $0x148] sm:$0xff] }
 0x1fd   : > { %1543 = vmatpush1.msra.mxu1 %v5742_v46  ;;  %1614 = vmatpush1.msra.mxu0 %v5744_v41  ;;  %8244 = vst [vmem:[#allocation48_spill] sm:$0xff] %v5768_v47  ;;  %8245 = vst [vmem:[#allocation49_spill] sm:$0xff] %v5772_v38  ;;  %v5774_v46 = vld [vmem:[#allocation10 + $0x158] sm:$0xff]  ;;  %v5778_v41 = vld [vmem:[#allocation10 + $0x140] sm:$0xff] }
 0x1fe   : > { %1544 = vmatprep.subr.mxu1 %v5748_v40  ;;  %1615 = vmatprep.subr.mxu0 %v5750_v45  ;;  %8246 = vst [vmem:[#allocation50_spill] sm:$0xff] %v5774_v46  ;;  %8247 = vst [vmem:[#allocation51_spill] sm:$0xff] %v5778_v41  ;;  %v5780_v40 = vld [vmem:[#allocation10 + $0x150] sm:$0xff]  ;;  %v5784_v45 = vld [vmem:[#allocation10 + $0x128] sm:$0xff] }
 0x1ff   : > { %1545 = vmatpush1.msra.mxu1 %v5754_v33  ;;  %1616 = vmatpush1.msra.mxu0 %v5756_v56  ;;  %8248 = vst [vmem:[#allocation52_spill] sm:$0xff] %v5780_v40  ;;  %8249 = vst [vmem:[#allocation53_spill] sm:$0xff] %v5784_v45  ;;  %v5786_v33 = vld [vmem:[#allocation10 + $0x138] sm:$0xff]  ;;  %v5790_v56 = vld [vmem:[#allocation10 + $0x120] sm:$0xff] }
 0x200   : > { %1546 = vmatprep.subr.mxu1 %v5760_v48  ;;  %1617 = vmatprep.subr.mxu0 %v5762_v43  ;;  %8250 = vst [vmem:[#allocation54_spill] sm:$0xff] %v5786_v33  ;;  %8251 = vst [vmem:[#allocation55_spill] sm:$0xff] %v5790_v56  ;;  %v5792_v48 = vld [vmem:[#allocation10 + $0x130] sm:$0xff]  ;;  %v5796_v43 = vld [vmem:[#allocation10 + $0x108] sm:$0xff] }
 0x201   : > { %1547 = vmatpush1.msra.mxu1 %v5766_v44  ;;  %1618 = vmatpush1.msra.mxu0 %v5768_v47  ;;  %8252 = vst [vmem:[#allocation56_spill] sm:$0xff] %v5792_v48  ;;  %8253 = vst [vmem:[#allocation57_spill] sm:$0xff] %v5796_v43  ;;  %v5798_v44 = vld [vmem:[#allocation10 + $0x118] sm:$0xff]  ;;  %v5802_v47 = vld [vmem:[#allocation10 + $0x100] sm:$0xff] }
 0x202   : > { %1548 = vmatprep.subr.mxu1 %v5772_v38  ;;  %1619 = vmatprep.subr.mxu0 %v5774_v46  ;;  %8254 = vst [vmem:[#allocation58_spill] sm:$0xff] %v5798_v44  ;;  %8255 = vst [vmem:[#allocation59_spill] sm:$0xff] %v5802_v47  ;;  %v5804_v38 = vld [vmem:[#allocation10 + $0x110] sm:$0xff]  ;;  %v5808_v46 = vld [vmem:[#allocation10 + $0xe8] sm:$0xff] }
 0x203   : > { %1549 = vmatpush1.msra.mxu1 %v5778_v41  ;;  %1620 = vmatpush1.msra.mxu0 %v5780_v40  ;;  %8256 = vst [vmem:[#allocation60_spill] sm:$0xff] %v5804_v38  ;;  %8257 = vst [vmem:[#allocation61_spill] sm:$0xff] %v5808_v46  ;;  %v5810_v41 = vld [vmem:[#allocation10 + $0xf8] sm:$0xff]  ;;  %v5814_v40 = vld [vmem:[#allocation10 + $0xe0] sm:$0xff] }
 0x204   : > { %1550 = vmatprep.subr.mxu1 %v5784_v45  ;;  %1621 = vmatprep.subr.mxu0 %v5786_v33  ;;  %8258 = vst [vmem:[#allocation62_spill] sm:$0xff] %v5810_v41  ;;  %8259 = vst [vmem:[#allocation63_spill] sm:$0xff] %v5814_v40  ;;  %v5816_v45 = vld [vmem:[#allocation10 + $0xf0] sm:$0xff]  ;;  %v5820_v33 = vld [vmem:[#allocation10 + $0xc8] sm:$0xff] }
 0x205   : > { %1551 = vmatpush1.msra.mxu1 %v5790_v56  ;;  %1622 = vmatpush1.msra.mxu0 %v5792_v48  ;;  %8260 = vst [vmem:[#allocation64_spill] sm:$0xff] %v5816_v45  ;;  %8261 = vst [vmem:[#allocation65_spill] sm:$0xff] %v5820_v33  ;;  %v5822_v56 = vld [vmem:[#allocation10 + $0xd8] sm:$0xff]  ;;  %v5826_v48 = vld [vmem:[#allocation10 + $0xc0] sm:$0xff] }
 0x206   : > { %1552 = vmatprep.subr.mxu1 %v5796_v43  ;;  %1623 = vmatprep.subr.mxu0 %v5798_v44  ;;  %8262 = vst [vmem:[#allocation66_spill] sm:$0xff] %v5822_v56  ;;  %8263 = vst [vmem:[#allocation67_spill] sm:$0xff] %v5826_v48  ;;  %v5828_v43 = vld [vmem:[#allocation10 + $0xd0] sm:$0xff]  ;;  %v5832_v44 = vld [vmem:[#allocation10 + $0xa8] sm:$0xff] }
 0x207   : > { %1553 = vmatpush1.msra.mxu1 %v5802_v47  ;;  %1624 = vmatpush1.msra.mxu0 %v5804_v38  ;;  %8264 = vst [vmem:[#allocation68_spill] sm:$0xff] %v5828_v43  ;;  %8265 = vst [vmem:[#allocation69_spill] sm:$0xff] %v5832_v44  ;;  %v5834_v47 = vld [vmem:[#allocation10 + $0xb8] sm:$0xff]  ;;  %v5838_v38 = vld [vmem:[#allocation10 + $0xa0] sm:$0xff] }
 0x208   : > { %1554 = vmatprep.subr.mxu1 %v5808_v46  ;;  %1625 = vmatprep.subr.mxu0 %v5810_v41  ;;  %8266 = vst [vmem:[#allocation70_spill] sm:$0xff] %v5834_v47  ;;  %8267 = vst [vmem:[#allocation71_spill] sm:$0xff] %v5838_v38  ;;  %v5840_v46 = vld [vmem:[#allocation10 + $0xb0] sm:$0xff]  ;;  %v5844_v41 = vld [vmem:[#allocation10 + $0x88] sm:$0xff] }
 0x209   : > { %1555 = vmatpush1.msra.mxu1 %v5814_v40  ;;  %1626 = vmatpush1.msra.mxu0 %v5816_v45  ;;  %8268 = vst [vmem:[#allocation72_spill] sm:$0xff] %v5840_v46  ;;  %8269 = vst [vmem:[#allocation73_spill] sm:$0xff] %v5844_v41  ;;  %v5846_v40 = vld [vmem:[#allocation10 + $0x98] sm:$0xff]  ;;  %v5850_v45 = vld [vmem:[#allocation10 + $0x80] sm:$0xff] }
 0x20a   : > { %1556 = vmatprep.subr.mxu1 %v5820_v33  ;;  %1627 = vmatprep.subr.mxu0 %v5822_v56  ;;  %8270 = vst [vmem:[#allocation74_spill] sm:$0xff] %v5846_v40  ;;  %8271 = vst [vmem:[#allocation75_spill] sm:$0xff] %v5850_v45  ;;  %v5852_v33 = vld [vmem:[#allocation10 + $0x90] sm:$0xff]  ;;  %v5856_v56 = vld [vmem:[#allocation10 + $0x68] sm:$0xff] }
 0x20b   : > { %1557 = vmatpush1.msra.mxu1 %v5826_v48  ;;  %1628 = vmatpush1.msra.mxu0 %v5828_v43  ;;  %8272 = vst [vmem:[#allocation76_spill] sm:$0xff] %v5852_v33  ;;  %8273 = vst [vmem:[#allocation77_spill] sm:$0xff] %v5856_v56  ;;  %v5858_v48 = vld [vmem:[#allocation10 + $0x78] sm:$0xff]  ;;  %v5862_v43 = vld [vmem:[#allocation10 + $0x60] sm:$0xff] }
 0x20c   : > { %1558 = vmatprep.subr.mxu1 %v5832_v44  ;;  %1629 = vmatprep.subr.mxu0 %v5834_v47  ;;  %8274 = vst [vmem:[#allocation78_spill] sm:$0xff] %v5858_v48  ;;  %8275 = vst [vmem:[#allocation79_spill] sm:$0xff] %v5862_v43  ;;  %v5864_v44 = vld [vmem:[#allocation10 + $0x70] sm:$0xff]  ;;  %v5868_v47 = vld [vmem:[#allocation10 + $0x48] sm:$0xff] }
 0x20d   : > { %1559 = vmatpush1.msra.mxu1 %v5838_v38  ;;  %1630 = vmatpush1.msra.mxu0 %v5840_v46  ;;  %8276 = vst [vmem:[#allocation80_spill] sm:$0xff] %v5864_v44  ;;  %v5870_v38 = vld [vmem:[#allocation10 + $0x58] sm:$0xff]  ;;  %v5874_v46 = vld [vmem:[#allocation10 + $0x40] sm:$0xff] }
 0x20e   : > { %1560 = vmatprep.subr.mxu1 %v5844_v41  ;;  %1631 = vmatprep.subr.mxu0 %v5846_v40  ;;  %8277 = vst [vmem:[#allocation81_spill] sm:$0xff] %v5870_v38  ;;  %v5876_v41 = vld [vmem:[#allocation10 + $0x50] sm:$0xff]  ;;  %v5880_v40 = vld [vmem:[#allocation10 + $0x28] sm:$0xff] }
 0x20f   : > { %1561 = vmatpush1.msra.mxu1 %v5850_v45  ;;  %1632 = vmatpush1.msra.mxu0 %v5852_v33  ;;  %v5882_v45 = vld [vmem:[#allocation10 + $0x38] sm:$0xff]  ;;  %v5886_v33 = vld [vmem:[#allocation10 + $0x20] sm:$0xff] }
 0x210   : > { %1562 = vmatprep.subr.mxu1 %v5856_v56  ;;  %1633 = vmatprep.subr.mxu0 %v5858_v48  ;;  %v5888_v56 = vld [vmem:[#allocation10 + $0x30] sm:$0xff]  ;;  %v5892_v48 = vld [vmem:[#allocation10 + $0x8] sm:$0xff] }
 0x211   : > { %1563 = vmatpush1.msra.mxu1 %v5862_v43  ;;  %1634 = vmatpush1.msra.mxu0 %v5864_v44  ;;  %v5894_v43 = vld [vmem:[#allocation10 + $0x18] sm:$0xff]  ;;  %v5898_v44 = vld [vmem:[#allocation10] sm:$0xff] }
 0x212   : > { %1564 = vmatprep.subr.mxu1 %v5868_v47  ;;  %1635 = vmatprep.subr.mxu0 %v5870_v38  ;;  %v5902_v38 = vld [vmem:[#allocation10 + $0x10] sm:$0xff] }
 0x213   : > { %1565 = vmatpush1.msra.mxu1 %v5874_v46  ;;  %1636 = vmatpush1.msra.mxu0 %v5876_v41 }
 0x214   : > { %1566 = vmatprep.subr.mxu1 %v5880_v40  ;;  %1637 = vmatprep.subr.mxu0 %v5882_v45 }
 0x215   : > { %1567 = vmatpush1.msra.mxu1 %v5886_v33  ;;  %1638 = vmatpush1.msra.mxu0 %v5888_v56 }
 0x216   : > { %1568 = vmatprep.subr.mxu1 %v5892_v48  ;;  %1639 = vmatprep.subr.mxu0 %v5894_v43 }
 0x217   : > { %1569 = vmatpush1.msra.mxu1 %v5898_v44  ;;  %1602 = vmatprep.mubr.f32.mxu1 %v8226_v28 }
 0x218   : > { %1640 = vmatpush1.msra.mxu0 %v5902_v38  ;;  %1673 = vmatprep.mubr.f32.mxu0 %v8226_v28 }
 0x219   : > { %1603 = vmatmul.mubr.f32.vlgmr.msra.gmra.mxu1 %v8226_v28  ;;  %1674 = vmatmul.mubr.f32.vlgmr.msra.gmra.mxu0 %v8226_v28 }
 0x21a   : > { %1712 = vmatprep.subr.mxu1 %v5488_v49  ;;  %1783 = vmatprep.subr.mxu0 %v5490_v50  ;;  %v8278_v49 = vld [vmem:[#allocation17_spill] sm:$0xff]  ;;  %v8279_v50 = vld [vmem:[#allocation18_spill] sm:$0xff] }
 0x21b   : > { %1713 = vmatpush1.msra.mxu1 %v5494_v51  ;;  %1784 = vmatpush1.msra.mxu0 %v5496_v52  ;;  %v8280_v51 = vld [vmem:[#allocation19_spill] sm:$0xff]  ;;  %v8281_v52 = vld [vmem:[#allocation20_spill] sm:$0xff] }
 0x21c   : > { %1714 = vmatprep.subr.mxu1 %v5500_v53  ;;  %1785 = vmatprep.subr.mxu0 %v5502_v54  ;;  %v8282_v53 = vld [vmem:[#allocation21_spill] sm:$0xff]  ;;  %v8283_v54 = vld [vmem:[#allocation22_spill] sm:$0xff] }
 0x21d   : > { %1715 = vmatpush1.msra.mxu1 %v5506_v57  ;;  %1786 = vmatpush1.msra.mxu0 %v5508_v58  ;;  %v8284_v57 = vld [vmem:[#allocation23_spill] sm:$0xff]  ;;  %v8285_v58 = vld [vmem:[#allocation24_spill] sm:$0xff] }
 0x21e   : > { %1716 = vmatprep.subr.mxu1 %v5514_v59  ;;  %1787 = vmatprep.subr.mxu0 %v5516_v60  ;;  %v8286_v59 = vld [vmem:[#allocation25_spill] sm:$0xff]  ;;  %v8287_v60 = vld [vmem:[#allocation26_spill] sm:$0xff] }
 0x21f   : > { %1717 = vmatpush1.msra.mxu1 %v5522_v42  ;;  %1788 = vmatpush1.msra.mxu0 %v5524_v62  ;;  %v8288_v42 = vld [vmem:[#allocation27_spill] sm:$0xff]  ;;  %v8289_v62 = vld [vmem:[#allocation28_spill] sm:$0xff] }
 0x220   : > { %1718 = vmatprep.subr.mxu1 %v5528_v63  ;;  %1789 = vmatprep.subr.mxu0 %v5530_v0  ;;  %v8290_v63 = vld [vmem:[#allocation29_spill] sm:$0xff]  ;;  %v8291_v0 = vld [vmem:[#allocation30_spill] sm:$0xff] }
 0x221   : > { %1719 = vmatpush1.msra.mxu1 %v5534_v1  ;;  %1790 = vmatpush1.msra.mxu0 %v5536_v2  ;;  %v8292_v1 = vlaneseq }
 0x222   : > { %1720 = vmatprep.subr.mxu1 %v5542_v3  ;;  %1791 = vmatprep.subr.mxu0 %v5544_v4 }
 0x223   : > { %1721 = vmatpush1.msra.mxu1 %v5550_v39  ;;  %1792 = vmatpush1.msra.mxu0 %v5552_v5  ;;  %v5981_v2 = vshrl.u32 %v8292_v1, 7  ;;  %v608_v39 = vld [vmem:[%s7807_s4] sm:$0xf] }
 0x224   : > { %1722 = vmatprep.subr.mxu1 %v5556_v6  ;;  %1793 = vmatprep.subr.mxu0 %v5558_v7 }
 0x225   : > { %1723 = vmatpush1.msra.mxu1 %v5562_v8  ;;  %1794 = vmatpush1.msra.mxu0 %v5564_v9  ;;  %v612_v3 = vsub.s32 0, %v5981_v2  ;;  %v620_v4 = vsub.s32 2, %v5981_v2 }
 0x226   : > { %1724 = vmatprep.subr.mxu1 %v5570_v11  ;;  %1795 = vmatprep.subr.mxu0 %v5572_v12 }
 0x227   : > { %1725 = vmatpush1.msra.mxu1 %v5578_v61  ;;  %1796 = vmatpush1.msra.mxu0 %v5580_v13  ;;  %v5990_v5 = vrot.slane %v608_v39, %v612_v3  ;;  %v5994_v6 = vrot.slane %v608_v39, %v620_v4  ;;  %v616_v13 = vsub.s32 1, %v5981_v2 }
 0x228   : > { %1726 = vmatprep.subr.mxu1 %v5584_v14  ;;  %1797 = vmatprep.subr.mxu0 %v5586_v16  ;;  %v624_v14 = vsub.s32 3, %v5981_v2 }
 0x229   : > { %1727 = vmatpush1.msra.mxu1 %v5590_v17  ;;  %1798 = vmatpush1.msra.mxu0 %v5592_v18  ;;  %v6010_v18 = vrot.slane %v608_v39, %v616_v13 }
 0x22a   : > { %1728 = vmatprep.subr.mxu1 %v5598_v19  ;;  %1799 = vmatprep.subr.mxu0 %v5600_v20  ;;  %v6014_v19 = vrot.slane %v608_v39, %v624_v14 }
 0x22b   : > { %1729 = vmatpush1.msra.mxu1 %v5606_v55  ;;  %1800 = vmatpush1.msra.mxu0 %v5608_v21 }
 0x22c   : > { %1730 = vmatprep.subr.mxu1 %v5612_v22  ;;  %1801 = vmatprep.subr.mxu0 %v5614_v23 }
 0x22d   : > { %1731 = vmatpush1.msra.mxu1 %v5618_v24  ;;  %1802 = vmatpush1.msra.mxu0 %v5620_v25 }
 0x22e   : > { %1732 = vmatprep.subr.mxu1 %v5626_v26  ;;  %1803 = vmatprep.subr.mxu0 %v5628_v27 }
 0x22f   : > { %1733 = vmatpush1.msra.mxu1 %v5634_v15  ;;  %1804 = vmatpush1.msra.mxu0 %v5636_v29 }
 0x230   : > { %1734 = vmatprep.subr.mxu1 %v5640_v30  ;;  %1805 = vmatprep.subr.mxu0 %v5642_v31 }
 0x231   : > { %1735 = vmatpush1.msra.mxu1 %v5646_v32  ;;  %1806 = vmatpush1.msra.mxu0 %v5648_v34 }
 0x232   : > { %1736 = vmatprep.subr.mxu1 %v5654_v35  ;;  %1807 = vmatprep.subr.mxu0 %v5656_v36 }
 0x233   : > { %1737 = vmatpush1.msra.mxu1 %v5662_v10  ;;  %1808 = vmatpush1.msra.mxu0 %v5664_v37 }
 0x234   : > { %1738 = vmatprep.subr.mxu1 %v8278_v49  ;;  %1809 = vmatprep.subr.mxu0 %v8279_v50 }
 0x235   : > { %1739 = vmatpush1.msra.mxu1 %v8280_v51  ;;  %1810 = vmatpush1.msra.mxu0 %v8281_v52 }
 0x236   : > { %1740 = vmatprep.subr.mxu1 %v8282_v53  ;;  %1811 = vmatprep.subr.mxu0 %v8283_v54 }
 0x237   : > { %1741 = vmatpush1.msra.mxu1 %v8284_v57  ;;  %1812 = vmatpush1.msra.mxu0 %v8285_v58 }
 0x238   : > { %1742 = vmatprep.subr.mxu1 %v8286_v59  ;;  %1813 = vmatprep.subr.mxu0 %v8287_v60 }
 0x239   : > { %1743 = vmatpush1.msra.mxu1 %v8288_v42  ;;  %1814 = vmatpush1.msra.mxu0 %v8289_v62 }
 0x23a   : > { %1776 = vmatprep.mubr.f32.mxu1 %v8226_v28  ;;  %1847 = vmatprep.mubr.f32.mxu0 %v8226_v28 }
 0x23b   : > { %1887 = vmatprep.subr.mxu1 %v8290_v63  ;;  %1958 = vmatprep.subr.mxu0 %v8291_v0 }
 0x258   : > { %v696_v7 = vpop.f32.mrf.mxu1  ;;  %v809_v8 = vpop.f32.mrf.mxu0 }
 0x259   : > { %v5997_v9 = vadd.f32 %v696_v7, %v5990_v5  ;;  %v6000_v11 = vadd.f32 %v809_v8, %v5994_v6 }
 0x25a   : > { %v6002_v12 = vpop.f32.mrf.mxu1  ;;  %v6004_v61 = vpop.f32.mrf.mxu0 }
 0x25e   : > { %v702_v16 = vpop.f32.mrf.mxu1  ;;  %v815_v17 = vpop.f32.mrf.mxu0 }
 0x25f   : > { %v6017_v20 = vadd.f32 %v702_v16, %v5990_v5  ;;  %v6020_v55 = vadd.f32 %v815_v17, %v5994_v6 }
 0x260   : > { %v704_v21 = vpop.f32.mrf.mxu1  ;;  %v817_v22 = vpop.f32.mrf.mxu0 }
 0x261   : > { %v6023_v23 = vadd.f32 %v704_v21, %v6010_v18  ;;  %v6026_v24 = vadd.f32 %v817_v22, %v6014_v19 }
 0x264   : > { %v708_v25 = vpop.f32.mrf.mxu1  ;;  %v821_v26 = vpop.f32.mrf.mxu0 }
 0x265   : > { %v6029_v27 = vadd.f32 %v708_v25, %v5990_v5  ;;  %v6032_v15 = vadd.f32 %v821_v26, %v5994_v6 }
 0x266   : > { %v710_v29 = vpop.f32.mrf.mxu1  ;;  %v823_v30 = vpop.f32.mrf.mxu0 }
 0x267   : > { %8293 = vst [vmem:[#allocation17_spill] sm:$0xff] %v6029_v27  ;;  %8294 = vst [vmem:[#allocation18_spill] sm:$0xff] %v6032_v15  ;;  %v6035_v31 = vadd.f32 %v710_v29, %v6010_v18  ;;  %v6038_v32 = vadd.f32 %v823_v30, %v6014_v19  ;;  %v6438_v15 = vld [vmem:[#allocation7 + $0x78] sm:$0xff]  ;;  %v6447_v27 = vld [vmem:[#allocation7 + $0x48] sm:$0xff] }
 0x269   : > { %8295 = vst [vmem:[#allocation19_spill] sm:$0xff] %v6035_v31  ;;  %8296 = vst [vmem:[#allocation20_spill] sm:$0xff] %v6038_v32  ;;  %v6441_v32 = vld [vmem:[#allocation7 + $0x60] sm:$0xff]  ;;  %v6444_v31 = vld [vmem:[#allocation7 + $0x70] sm:$0xff] }
 0x26a   : > { %v714_v34 = vpop.f32.mrf.mxu1  ;;  %v827_v35 = vpop.f32.mrf.mxu0 }
 0x26b   : > { %v6041_v36 = vadd.f32 %v714_v34, %v5990_v5  ;;  %v6044_v10 = vadd.f32 %v827_v35, %v5994_v6 }
 0x26c   : > { %v716_v37 = vpop.f32.mrf.mxu1  ;;  %v829_v49 = vpop.f32.mrf.mxu0 }
 0x26d   : > { %8297 = vst [vmem:[#allocation21_spill] sm:$0xff] %v6041_v36  ;;  %8298 = vst [vmem:[#allocation22_spill] sm:$0xff] %v6044_v10  ;;  %v6047_v50 = vadd.f32 %v716_v37, %v6010_v18  ;;  %v6050_v51 = vadd.f32 %v829_v49, %v6014_v19  ;;  %v952_v49 = vld [vmem:[%s7810_s7] sm:$0xf]  ;;  %v6408_v10 = vld [vmem:[#allocation7 + $0xd0] sm:$0xff] }
 0x26e   : > { %v6417_v36 = vld [vmem:[#allocation7 + $0xa0] sm:$0xff] }
 0x26f   : > { %8299 = vst [vmem:[#allocation23_spill] sm:$0xff] %v6047_v50  ;;  %8300 = vst [vmem:[#allocation24_spill] sm:$0xff] %v6050_v51  ;;  %v6411_v51 = vld [vmem:[#allocation7 + $0xa8] sm:$0xff]  ;;  %v6414_v50 = vld [vmem:[#allocation7 + $0xb8] sm:$0xff] }
 0x270   : > { %v720_v52 = vpop.f32.mrf.mxu1  ;;  %v833_v53 = vpop.f32.mrf.mxu0 }
 0x271   : > { %v6053_v54 = vadd.f32 %v720_v52, %v5990_v5  ;;  %v6056_v57 = vadd.f32 %v833_v53, %v5994_v6 }
 0x272   : > { %v722_v58 = vpop.f32.mrf.mxu1  ;;  %v835_v59 = vpop.f32.mrf.mxu0 }
 0x273   : > { %8301 = vst [vmem:[#allocation25_spill] sm:$0xff] %v6053_v54  ;;  %8302 = vst [vmem:[#allocation26_spill] sm:$0xff] %v6056_v57  ;;  %v6059_v60 = vadd.f32 %v722_v58, %v6010_v18  ;;  %v6062_v42 = vadd.f32 %v835_v59, %v6014_v19 }
 0x275   : > { %8303 = vst [vmem:[#allocation27_spill] sm:$0xff] %v6059_v60  ;;  %8304 = vst [vmem:[#allocation28_spill] sm:$0xff] %v6062_v42 }
 0x276   : > { %v726_v62 = vpop.f32.mrf.mxu1  ;;  %v839_v63 = vpop.f32.mrf.mxu0 }
 0x277   : > { %v6065_v0 = vadd.f32 %v726_v62, %v5990_v5  ;;  %v6068_v1 = vadd.f32 %v839_v63, %v5994_v6 }
 0x278   : > { %v728_v39 = vpop.f32.mrf.mxu1  ;;  %v841_v7 = vpop.f32.mrf.mxu0 }
 0x279   : > { %8305 = vst [vmem:[#allocation29_spill] sm:$0xff] %v6065_v0  ;;  %8306 = vst [vmem:[#allocation30_spill] sm:$0xff] %v6068_v1  ;;  %v6071_v8 = vadd.f32 %v728_v39, %v6010_v18  ;;  %v6074_v16 = vadd.f32 %v841_v7, %v6014_v19  ;;  %v6105_v39 = vrot.slane %v952_v49, %v612_v3 }
 0x27a   : > { %v6109_v7 = vrot.slane %v952_v49, %v620_v4 }
 0x27b   : > { %8307 = vst [vmem:[#allocation82_spill] sm:$0xff] %v6071_v8  ;;  %8308 = vst [vmem:[#allocation83_spill] sm:$0xff] %v6074_v16 }
 0x27c   : > { %v732_v17 = vpop.f32.mrf.mxu1  ;;  %v845_v21 = vpop.f32.mrf.mxu0 }
 0x27d   : > { %v6077_v22 = vadd.f32 %v732_v17, %v5990_v5  ;;  %v6080_v25 = vadd.f32 %v845_v21, %v5994_v6 }
 0x27e   : > { %v734_v26 = vpop.f32.mrf.mxu1  ;;  %v847_v29 = vpop.f32.mrf.mxu0 }
 0x27f   : > { %8309 = vst [vmem:[#allocation84_spill] sm:$0xff] %v6077_v22  ;;  %8310 = vst [vmem:[#allocation85_spill] sm:$0xff] %v6080_v25  ;;  %v6083_v30 = vadd.f32 %v734_v26, %v6010_v18  ;;  %v6086_v34 = vadd.f32 %v847_v29, %v6014_v19 }
 0x281   : > { %8311 = vst [vmem:[#allocation86_spill] sm:$0xff] %v6083_v30  ;;  %8312 = vst [vmem:[#allocation87_spill] sm:$0xff] %v6086_v34 }
 0x282   : > { %v738_v35 = vpop.f32.mrf.mxu1  ;;  %v851_v37 = vpop.f32.mrf.mxu0 }
 0x283   : > { %v6092_v52 = vadd.f32 %v738_v35, %v5990_v5  ;;  %v6095_v53 = vadd.f32 %v851_v37, %v5994_v6  ;;  %v6113_v5 = vrot.slane %v952_v49, %v616_v13  ;;  %v6117_v6 = vrot.slane %v952_v49, %v624_v14 }
 0x284   : > { %v740_v58 = vpop.f32.mrf.mxu1  ;;  %v853_v59 = vpop.f32.mrf.mxu0 }
 0x285   : > { %8313 = vst [vmem:[#allocation88_spill] sm:$0xff] %v6092_v52  ;;  %8314 = vst [vmem:[#allocation89_spill] sm:$0xff] %v6095_v53  ;;  %v6098_v62 = vadd.f32 %v740_v58, %v6010_v18  ;;  %v6101_v63 = vadd.f32 %v853_v59, %v6014_v19 }
 0x287   : > { %8315 = vst [vmem:[#allocation90_spill] sm:$0xff] %v6098_v62  ;;  %8316 = vst [vmem:[#allocation91_spill] sm:$0xff] %v6101_v63 }
 0x288   : > { %v1040_v17 = vpop.f32.mrf.mxu1  ;;  %v1153_v21 = vpop.f32.mrf.mxu0 }
 0x289   : > { %v6120_v26 = vadd.f32 %v1040_v17, %v6105_v39  ;;  %v6123_v3 = vadd.f32 %v1153_v21, %v6109_v7 }
 0x28a   : > { %v1042_v29 = vpop.f32.mrf.mxu1  ;;  %v1155_v35 = vpop.f32.mrf.mxu0 }
 0x28b   : > { %8317 = vst [vmem:[#allocation92_spill] sm:$0xff] %v6120_v26  ;;  %8318 = vst [vmem:[#allocation93_spill] sm:$0xff] %v6123_v3  ;;  %v6126_v4 = vadd.f32 %v1042_v29, %v6113_v5  ;;  %v6129_v13 = vadd.f32 %v1155_v35, %v6117_v6 }
 0x28d   : > { %8319 = vst [vmem:[#allocation94_spill] sm:$0xff] %v6126_v4  ;;  %8320 = vst [vmem:[#allocation95_spill] sm:$0xff] %v6129_v13 }
 0x28e   : > { %v1046_v37 = vpop.f32.mrf.mxu1  ;;  %v1159_v2 = vpop.f32.mrf.mxu0 }
 0x28f   : > { %v6132_v14 = vadd.f32 %v1046_v37, %v6105_v39  ;;  %v6135_v49 = vadd.f32 %v1159_v2, %v6109_v7 }
 0x290   : > { %v1048_v58 = vpop.f32.mrf.mxu1  ;;  %v1161_v59 = vpop.f32.mrf.mxu0 }
 0x291   : > { %8321 = vst [vmem:[#allocation96_spill] sm:$0xff] %v6132_v14  ;;  %8322 = vst [vmem:[#allocation97_spill] sm:$0xff] %v6135_v49  ;;  %v6138_v17 = vadd.f32 %v1048_v58, %v6113_v5  ;;  %v6141_v21 = vadd.f32 %v1161_v59, %v6117_v6 }
 0x293   : > { %8323 = vst [vmem:[#allocation98_spill] sm:$0xff] %v6138_v17  ;;  %8324 = vst [vmem:[#allocation99_spill] sm:$0xff] %v6141_v21 }
 0x294   : > { %v1052_v29 = vpop.f32.mrf.mxu1  ;;  %v1165_v3 = vpop.f32.mrf.mxu0 }
 0x295   : > { %v6144_v35 = vadd.f32 %v1052_v29, %v6105_v39  ;;  %v6147_v13 = vadd.f32 %v1165_v3, %v6109_v7 }
 0x296   : > { %v1054_v37 = vpop.f32.mrf.mxu1  ;;  %v1167_v4 = vpop.f32.mrf.mxu0 }
 0x297   : > { %8325 = vst [vmem:[#allocation100_spill] sm:$0xff] %v6144_v35  ;;  %8326 = vst [vmem:[#allocation101_spill] sm:$0xff] %v6147_v13  ;;  %v6150_v2 = vadd.f32 %v1054_v37, %v6113_v5  ;;  %v6153_v26 = vadd.f32 %v1167_v4, %v6117_v6 }
 0x299   : > { %8327 = vst [vmem:[#allocation102_spill] sm:$0xff] %v6150_v2  ;;  %8328 = vst [vmem:[#allocation103_spill] sm:$0xff] %v6153_v26 }
 0x29a   : > { %v1058_v58 = vpop.f32.mrf.mxu1  ;;  %v1171_v53 = vpop.f32.mrf.mxu0 }
 0x29b   : > { %v6156_v59 = vadd.f32 %v1058_v58, %v6105_v39  ;;  %v6159_v63 = vadd.f32 %v1171_v53, %v6109_v7 }
 0x29c   : > { %v1060_v29 = vpop.f32.mrf.mxu1  ;;  %v1173_v62 = vpop.f32.mrf.mxu0 }
 0x29d   : > { %8329 = vst [vmem:[#allocation104_spill] sm:$0xff] %v6156_v59  ;;  %8330 = vst [vmem:[#allocation105_spill] sm:$0xff] %v6159_v63  ;;  %v6162_v3 = vadd.f32 %v1060_v29, %v6113_v5  ;;  %v6165_v52 = vadd.f32 %v1173_v62, %v6117_v6 }
 0x29f   : > { %8331 = vst [vmem:[#allocation106_spill] sm:$0xff] %v6162_v3  ;;  %8332 = vst [vmem:[#allocation107_spill] sm:$0xff] %v6165_v52 }
 0x2a0   : > { %v1064_v37 = vpop.f32.mrf.mxu1  ;;  %v1177_v49 = vpop.f32.mrf.mxu0 }
 0x2a1   : > { %v6168_v4 = vadd.f32 %v1064_v37, %v6105_v39  ;;  %v6171_v21 = vadd.f32 %v1177_v49, %v6109_v7 }
 0x2a2   : > { %v1066_v58 = vpop.f32.mrf.mxu1  ;;  %v1179_v17 = vpop.f32.mrf.mxu0 }
 0x2a3   : > { %8333 = vst [vmem:[#allocation108_spill] sm:$0xff] %v6168_v4  ;;  %8334 = vst [vmem:[#allocation109_spill] sm:$0xff] %v6171_v21  ;;  %v6174_v53 = vadd.f32 %v1066_v58, %v6113_v5  ;;  %v6177_v14 = vadd.f32 %v1179_v17, %v6117_v6  ;;  %v6405_v4 = vld [vmem:[#allocation7 + $0xc0] sm:$0xff] }
 0x2a5   : > { %8335 = vst [vmem:[#allocation110_spill] sm:$0xff] %v6174_v53  ;;  %8336 = vst [vmem:[#allocation111_spill] sm:$0xff] %v6177_v14  ;;  %v6399_v14 = vld [vmem:[#allocation7 + $0xc8] sm:$0xff]  ;;  %v6402_v53 = vld [vmem:[#allocation7 + $0xd8] sm:$0xff] }
 0x2a6   : > { %v1070_v29 = vpop.f32.mrf.mxu1  ;;  %v1183_v25 = vpop.f32.mrf.mxu0 }
 0x2a7   : > { %v6180_v62 = vadd.f32 %v1070_v29, %v6105_v39  ;;  %v6183_v34 = vadd.f32 %v1183_v25, %v6109_v7 }
 0x2a8   : > { %v1072_v37 = vpop.f32.mrf.mxu1  ;;  %v1185_v30 = vpop.f32.mrf.mxu0 }
 0x2a9   : > { %8337 = vst [vmem:[#allocation112_spill] sm:$0xff] %v6180_v62  ;;  %8338 = vst [vmem:[#allocation113_spill] sm:$0xff] %v6183_v34  ;;  %v6186_v49 = vadd.f32 %v1072_v37, %v6113_v5  ;;  %v6189_v22 = vadd.f32 %v1185_v30, %v6117_v6  ;;  %v6426_v34 = vld [vmem:[#allocation7 + $0x98] sm:$0xff]  ;;  %v6435_v62 = vld [vmem:[#allocation7 + $0x68] sm:$0xff] }
 0x2ab   : > { %8339 = vst [vmem:[#allocation114_spill] sm:$0xff] %v6186_v49  ;;  %8340 = vst [vmem:[#allocation115_spill] sm:$0xff] %v6189_v22  ;;  %v6429_v22 = vld [vmem:[#allocation7 + $0x80] sm:$0xff]  ;;  %v6432_v49 = vld [vmem:[#allocation7 + $0x90] sm:$0xff] }
 0x2ac   : > { %v1076_v58 = vpop.f32.mrf.mxu1  ;;  %v1189_v13 = vpop.f32.mrf.mxu0 }
 0x2ad   : > { %v6192_v17 = vadd.f32 %v1076_v58, %v6105_v39  ;;  %v6195_v26 = vadd.f32 %v1189_v13, %v6109_v7  ;;  %v699_v58 = vadd.f32 %v6002_v12, %v6010_v18 }
 0x2ae   : > { %v1078_v29 = vpop.f32.mrf.mxu1  ;;  %v1191_v2 = vpop.f32.mrf.mxu0 }
 0x2af   : > { %v6198_v25 = vadd.f32 %v1078_v29, %v6113_v5  ;;  %v6201_v35 = vadd.f32 %v1191_v2, %v6117_v6  ;;  %v812_v2 = vadd.f32 %v6004_v61, %v6014_v19 }
 0x2b2   : > { %v1082_v37 = vpop.f32.mrf.mxu1  ;;  %v1195_v1 = vpop.f32.mrf.mxu0 }
 0x2b4   : > { %v1084_v30 = vpop.f32.mrf.mxu1  ;;  %v1197_v16 = vpop.f32.mrf.mxu0 }
 0x2b5   : > { %v1085_v61 = vadd.f32 %v1084_v30, %v6113_v5  ;;  %v1198_v5 = vadd.f32 %v1197_v16, %v6117_v6  ;;  %v1196_v30 = vadd.f32 %v1195_v1, %v6109_v7  ;;  %v8342_v16 = vld [vmem:[#allocation31_spill] sm:$0xff]  ;;  %v8343_v1 = vld [vmem:[#allocation32_spill] sm:$0xff]  ;;  %v8344_v7 = vld [vmem:[#allocation33_spill] sm:$0xff] }
 0x2b6   : > { %v8345_v6 = vld [vmem:[#allocation34_spill] sm:$0xff] }
 0x2b8   : > { %v1366_v8 = vpop.f32.mrf.mxu1  ;;  %v1437_v3 = vpop.f32.mrf.mxu0 }
 0x2b9   : > { %v1442_v0 = vadd.f32 %v1366_v8, %v5997_v9  ;;  %v1444_v60 = vadd.f32 %v1437_v3, %v6000_v11 }
 0x2ba   : > { %v1368_v13 = vpop.f32.mrf.mxu1  ;;  %v1439_v59 = vpop.f32.mrf.mxu0 }
 0x2bb   : > { %v4308_v63 = vmul.f32 -1.442695, %v1442_v0  ;;  %v1443_v52 = vadd.f32 %v1368_v13, %v699_v58  ;;  %v1445_v57 = vadd.f32 %v1439_v59, %v812_v2  ;;  %v1083_v0 = vadd.f32 %v1082_v37, %v6105_v39 }
 0x2bd   : > { %4517 = vpow2.f32 %v4308_v63  ;;  %v4309_v29 = vmul.f32 -1.442695, %v1443_v52  ;;  %v4310_v42 = vmul.f32 -1.442695, %v1445_v57 }
 0x2bf   : > { %4519 = vpow2.f32 %v4309_v29 }
 0x2c0   : > { %4521 = vpow2.f32 %v4310_v42 }
 0x2c1   : > { %4523 = vtanh.f32 %v1444_v60 }
 0x2ca   : > { %v4518_v54 = vpop.eup %4517 }
 0x2cb   : > { %v1449_v21 = vadd.f32 1.0, %v4518_v54 }
 0x2cc   : > { %v4520_v12 = vpop.eup %4519 }
 0x2cd   : > { %4525 = vrcp.f32 %v1449_v21  ;;  %v1455_v9 = vadd.f32 1.0, %v4520_v12  ;;  %v4522_v18 = vpop.eup %4521 }
 0x2ce   : > { %v4524_v8 = vpop.eup %4523  ;;  %v1462_v59 = vadd.f32 1.0, %v4522_v18 }
 0x2cf   : > { %4527 = vrcp.f32 %v1455_v9 }
 0x2d9   : > { %v1604_v52 = vpop.f32.mrf.mxu1  ;;  %v1675_v60 = vpop.f32.mrf.mxu0 }
 0x2da   : > { %v4526_v63 = vpop.eup %4525  ;;  %v1680_v19 = vadd.f32 %v1604_v52, %v1083_v0  ;;  %v1682_v12 = vadd.f32 %v1675_v60, %v1196_v30  ;;  %v8355_v60 = vld [vmem:[#allocation44_spill] sm:$0xff] }
 0x2db   : > { %v1466_v57 = vmul.f32 %v4526_v63, %v4524_v8  ;;  %v1606_v11 = vpop.f32.mrf.mxu1  ;;  %v1677_v39 = vpop.f32.mrf.mxu0  ;;  %v8359_v30 = vld [vmem:[#allocation48_spill] sm:$0xff] }
 0x2dc   : > { %v4528_v3 = vpop.eup %4527  ;;  %v4311_v54 = vmul.f32 -1.442695, %v1680_v19  ;;  %v1681_v42 = vadd.f32 %v1606_v11, %v1085_v61  ;;  %v1683_v37 = vadd.f32 %v1677_v39, %v1198_v5  ;;  %v8346_v61 = vld [vmem:[#allocation35_spill] sm:$0xff]  ;;  %v8347_v19 = vld [vmem:[#allocation36_spill] sm:$0xff]  ;;  %v8357_v39 = vld [vmem:[#allocation46_spill] sm:$0xff]  ;;  %8410 = vst [vmem:[#allocation48_spill] sm:$0xff] %v6405_v4 }
 0x2dd   : > { %v1465_v58 = vmul.f32 0.0, %v4528_v3  ;;  %v8350_v11 = vld [vmem:[#allocation39_spill] sm:$0xff]  ;;  %v8351_v3 = vld [vmem:[#allocation40_spill] sm:$0xff]  ;;  %8408 = vst [vmem:[#allocation46_spill] sm:$0xff] %v6399_v14 }
 0x2de   : > { %4529 = vpow2.f32 %v4311_v54  ;;  %v4312_v21 = vmul.f32 -1.442695, %v1681_v42  ;;  %v4313_v29 = vmul.f32 -1.442695, %v1683_v37  ;;  %v8352_v54 = vld [vmem:[#allocation41_spill] sm:$0xff]  ;;  %v8353_v42 = vld [vmem:[#allocation42_spill] sm:$0xff] }
 0x2df   : > { %v6211_v13 = vadd.f32 %v1466_v57, %v1465_v58  ;;  %4531 = vrcp.f32 %v1462_v59  ;;  %v8348_v57 = vld [vmem:[#allocation37_spill] sm:$0xff]  ;;  %v8349_v59 = vld [vmem:[#allocation38_spill] sm:$0xff]  ;;  %v8354_v58 = vld [vmem:[#allocation43_spill] sm:$0xff] }
 0x2e0   : > { %4533 = vpow2.f32 %v4312_v21  ;;  %v8356_v21 = vld [vmem:[#allocation45_spill] sm:$0xff]  ;;  %v8358_v37 = vld [vmem:[#allocation47_spill] sm:$0xff] }
 0x2e1   : > { %4535 = vtanh.f32 %v6211_v13  ;;  %8409 = vst [vmem:[#allocation47_spill] sm:$0xff] %v6402_v53 }
 0x2e2   : > { %4537 = vpow2.f32 %v4313_v29 }
 0x2eb   : > { %v4530_v2 = vpop.eup %4529 }
 0x2ec   : > { %v4532_v9 = vpop.eup %4531  ;;  %v1687_v18 = vadd.f32 1.0, %v4530_v2  ;;  %v8360_v2 = vld [vmem:[#allocation49_spill] sm:$0xff] }
 0x2ed   : > { %v4534_v0 = vpop.eup %4533  ;;  %8411 = vst [vmem:[#allocation49_spill] sm:$0xff] %v6408_v10 }
 0x2ee   : > { %v4536_v8 = vpop.eup %4535  ;;  %4539 = vrcp.f32 %v1687_v18  ;;  %v1693_v52 = vadd.f32 1.0, %v4534_v0  ;;  %v8362_v18 = vld [vmem:[#allocation51_spill] sm:$0xff]  ;;  %v8363_v0 = vld [vmem:[#allocation52_spill] sm:$0xff] }
 0x2ef   : > { %4541 = vtanh.f32 %v1682_v12  ;;  %v6216_v63 = vmul.f32 %v4536_v8, %v4532_v9  ;;  %v4538_v5 = vpop.eup %4537  ;;  %v8361_v12 = vld [vmem:[#allocation50_spill] sm:$0xff]  ;;  %8413 = vst [vmem:[#allocation51_spill] sm:$0xff] %v6414_v50  ;;  %8414 = vst [vmem:[#allocation52_spill] sm:$0xff] %v6417_v36 }
 0x2f0   : > { %4543 = vrcp.f32 %v1693_v52  ;;  %v1700_v52 = vadd.f32 1.0, %v4538_v5  ;;  %v8377_v5 = vld [vmem:[#allocation66_spill] sm:$0xff]  ;;  %8412 = vst [vmem:[#allocation50_spill] sm:$0xff] %v6411_v51 }
 0x2f1   : > { %8341 = vst [vmem:[#allocation116_spill] sm:$0xff] %v6216_v63  ;;  %1777 = vmatmul.mubr.f32.vlgmr.msra.gmra.mxu1 %v6216_v63  ;;  %1848 = vmatmul.mubr.f32.vlgmr.msra.gmra.mxu0 %v6216_v63  ;;  %v6423_v63 = vld [vmem:[#allocation7 + $0x88] sm:$0xff] }
 0x2f2   : > { %1888 = vmatpush1.msra.mxu1 %v8342_v16  ;;  %1959 = vmatpush1.msra.mxu0 %v8343_v1  ;;  %v8364_v16 = vld [vmem:[#allocation53_spill] sm:$0xff]  ;;  %v8365_v1 = vld [vmem:[#allocation54_spill] sm:$0xff]  ;;  %4545 = vrcp.f32 %v1700_v52  ;;  %v8387_v52 = vld [vmem:[#allocation76_spill] sm:$0xff] }
 0x2f3   : > { %1889 = vmatprep.subr.mxu1 %v8344_v7  ;;  %1960 = vmatprep.subr.mxu0 %v8345_v6  ;;  %8416 = vst [vmem:[#allocation54_spill] sm:$0xff] %v6423_v63 }
 0x2f4   : > { %1890 = vmatpush1.msra.mxu1 %v8346_v61  ;;  %1961 = vmatpush1.msra.mxu0 %v8347_v19  ;;  %v8366_v61 = vld [vmem:[#allocation55_spill] sm:$0xff]  ;;  %v8367_v19 = vld [vmem:[#allocation56_spill] sm:$0xff] }
 0x2f5   : > { %1891 = vmatprep.subr.mxu1 %v8348_v57  ;;  %1962 = vmatprep.subr.mxu0 %v8349_v59  ;;  %v8368_v57 = vld [vmem:[#allocation57_spill] sm:$0xff]  ;;  %v8369_v59 = vld [vmem:[#allocation58_spill] sm:$0xff]  ;;  %8417 = vst [vmem:[#allocation55_spill] sm:$0xff] %v6426_v34  ;;  %8418 = vst [vmem:[#allocation56_spill] sm:$0xff] %v6429_v22 }
 0x2f6   : > { %1892 = vmatpush1.msra.mxu1 %v8350_v11  ;;  %1963 = vmatpush1.msra.mxu0 %v8351_v3  ;;  %v8370_v3 = vld [vmem:[#allocation59_spill] sm:$0xff]  ;;  %8419 = vst [vmem:[#allocation57_spill] sm:$0xff] %v6432_v49  ;;  %8420 = vst [vmem:[#allocation58_spill] sm:$0xff] %v6435_v62 }
 0x2f7   : > { %1893 = vmatprep.subr.mxu1 %v8352_v54  ;;  %1964 = vmatprep.subr.mxu0 %v8353_v42  ;;  %v8371_v54 = vld [vmem:[#allocation60_spill] sm:$0xff]  ;;  %v8372_v42 = vld [vmem:[#allocation61_spill] sm:$0xff]  ;;  %8421 = vst [vmem:[#allocation59_spill] sm:$0xff] %v6438_v15 }
 0x2f8   : > { %1894 = vmatpush1.msra.mxu1 %v8354_v58  ;;  %1965 = vmatpush1.msra.mxu0 %v8355_v60  ;;  %v8373_v58 = vld [vmem:[#allocation62_spill] sm:$0xff]  ;;  %v8374_v60 = vld [vmem:[#allocation63_spill] sm:$0xff]  ;;  %8422 = vst [vmem:[#allocation60_spill] sm:$0xff] %v6441_v32  ;;  %8423 = vst [vmem:[#allocation61_spill] sm:$0xff] %v6444_v31 }
 0x2f9   : > { %1895 = vmatprep.subr.mxu1 %v8356_v21  ;;  %1966 = vmatprep.subr.mxu0 %v8357_v39  ;;  %v8375_v21 = vld [vmem:[#allocation64_spill] sm:$0xff]  ;;  %v8376_v39 = vld [vmem:[#allocation65_spill] sm:$0xff]  ;;  %8424 = vst [vmem:[#allocation62_spill] sm:$0xff] %v6447_v27 }
 0x2fa   : > { %1896 = vmatpush1.msra.mxu1 %v8358_v37  ;;  %1967 = vmatpush1.msra.mxu0 %v8359_v30  ;;  %v8378_v37 = vld [vmem:[#allocation67_spill] sm:$0xff]  ;;  %v8379_v30 = vld [vmem:[#allocation68_spill] sm:$0xff] }
 0x2fb   : > { %v4540_v29 = vpop.eup %4539  ;;  %1897 = vmatprep.subr.mxu1 %v8360_v2  ;;  %1968 = vmatprep.subr.mxu0 %v8361_v12  ;;  %v8381_v2 = vld [vmem:[#allocation70_spill] sm:$0xff]  ;;  %v8382_v12 = vld [vmem:[#allocation71_spill] sm:$0xff] }
 0x2fc   : > { %v4542_v9 = vpop.eup %4541  ;;  %1898 = vmatpush1.msra.mxu1 %v8362_v18  ;;  %1969 = vmatpush1.msra.mxu0 %v8363_v0  ;;  %v8384_v18 = vld [vmem:[#allocation73_spill] sm:$0xff]  ;;  %v8385_v0 = vld [vmem:[#allocation74_spill] sm:$0xff] }
 0x2fd   : > { %v4544_v8 = vpop.eup %4543  ;;  %1899 = vmatprep.subr.mxu1 %v8364_v16  ;;  %1970 = vmatprep.subr.mxu0 %v8365_v1  ;;  %v1704_v6 = vmul.f32 %v4542_v9, %v4540_v29  ;;  %v8380_v29 = vld [vmem:[#allocation69_spill] sm:$0xff]  ;;  %v8383_v9 = vld [vmem:[#allocation72_spill] sm:$0xff]  ;;  %v8389_v1 = vld [vmem:[#allocation78_spill] sm:$0xff] }
 0x2fe   : > { %v1703_v7 = vmul.f32 0.0, %v4544_v8  ;;  %1900 = vmatpush1.msra.mxu1 %v8366_v61  ;;  %1971 = vmatpush1.msra.mxu0 %v8367_v19  ;;  %v8386_v8 = vld [vmem:[#allocation75_spill] sm:$0xff]  ;;  %v8388_v16 = vld [vmem:[#allocation77_spill] sm:$0xff] }
 0x2ff   : > { %1901 = vmatprep.subr.mxu1 %v8368_v57  ;;  %1972 = vmatprep.subr.mxu0 %v8369_v59  ;;  %v8392_v61 = vld [vmem:[#allocation81_spill] sm:$0xff]  ;;  %v4546_v19 = vpop.eup %4545 }
 0x300   : > { %v6248_v11 = vadd.f32 %v1704_v6, %v1703_v7  ;;  %1902 = vmatpush1.msra.mxu1 %v8370_v3  ;;  %1973 = vmatpush1.msra.mxu0 %v8371_v54  ;;  %v8390_v7 = vld [vmem:[#allocation79_spill] sm:$0xff]  ;;  %v8391_v6 = vld [vmem:[#allocation80_spill] sm:$0xff]  ;;  %v6321_v59 = vld [vmem:[#allocation7 + $0x1a0] sm:$0xff] }
 0x301   : > { %1903 = vmatprep.subr.mxu1 %v8372_v42  ;;  %1974 = vmatprep.subr.mxu0 %v8373_v58  ;;  %v6324_v3 = vld [vmem:[#allocation7 + $0x1b0] sm:$0xff]  ;;  %v6327_v54 = vld [vmem:[#allocation7 + $0x188] sm:$0xff]  ;;  %v6330_v42 = vld [vmem:[#allocation7 + $0x198] sm:$0xff] }
 0x302   : > { %4547 = vtanh.f32 %v6248_v11  ;;  %1904 = vmatpush1.msra.mxu1 %v8374_v60  ;;  %1975 = vmatpush1.msra.mxu0 %v8375_v21  ;;  %v6333_v58 = vld [vmem:[#allocation7 + $0x180] sm:$0xff]  ;;  %v6336_v60 = vld [vmem:[#allocation7 + $0x190] sm:$0xff]  ;;  %v6339_v21 = vld [vmem:[#allocation7 + $0x168] sm:$0xff] }
 0x303   : > { %1905 = vmatprep.subr.mxu1 %v8376_v39  ;;  %1976 = vmatprep.subr.mxu0 %v8377_v5  ;;  %v6342_v39 = vld [vmem:[#allocation7 + $0x178] sm:$0xff]  ;;  %v6345_v5 = vld [vmem:[#allocation7 + $0x160] sm:$0xff] }
 0x304   : > { %1906 = vmatpush1.msra.mxu1 %v8378_v37  ;;  %1977 = vmatpush1.msra.mxu0 %v8379_v30  ;;  %v6348_v37 = vld [vmem:[#allocation7 + $0x170] sm:$0xff]  ;;  %v6351_v30 = vld [vmem:[#allocation7 + $0x148] sm:$0xff] }
 0x305   : > { %1907 = vmatprep.subr.mxu1 %v8380_v29  ;;  %1978 = vmatprep.subr.mxu0 %v8381_v2  ;;  %v6354_v29 = vld [vmem:[#allocation7 + $0x158] sm:$0xff]  ;;  %v6357_v2 = vld [vmem:[#allocation7 + $0x140] sm:$0xff] }
 0x306   : > { %1908 = vmatpush1.msra.mxu1 %v8382_v12  ;;  %1979 = vmatpush1.msra.mxu0 %v8383_v9  ;;  %8394 = vst [vmem:[#allocation32_spill] sm:$0xff] %v6357_v2  ;;  %v6360_v12 = vld [vmem:[#allocation7 + $0x150] sm:$0xff]  ;;  %v6363_v9 = vld [vmem:[#allocation7 + $0x128] sm:$0xff] }
 0x307   : > { %1909 = vmatprep.subr.mxu1 %v8384_v18  ;;  %1980 = vmatprep.subr.mxu0 %v8385_v0  ;;  %8395 = vst [vmem:[#allocation33_spill] sm:$0xff] %v6360_v12  ;;  %8396 = vst [vmem:[#allocation34_spill] sm:$0xff] %v6363_v9  ;;  %v6366_v18 = vld [vmem:[#allocation7 + $0x138] sm:$0xff]  ;;  %v6369_v0 = vld [vmem:[#allocation7 + $0x120] sm:$0xff] }
 0x308   : > { %1910 = vmatpush1.msra.mxu1 %v8386_v8  ;;  %1981 = vmatpush1.msra.mxu0 %v8387_v52  ;;  %8397 = vst [vmem:[#allocation35_spill] sm:$0xff] %v6366_v18  ;;  %8398 = vst [vmem:[#allocation36_spill] sm:$0xff] %v6369_v0  ;;  %v6372_v8 = vld [vmem:[#allocation7 + $0x130] sm:$0xff]  ;;  %v6375_v52 = vld [vmem:[#allocation7 + $0x108] sm:$0xff] }
 0x309   : > { %1911 = vmatprep.subr.mxu1 %v8388_v16  ;;  %1982 = vmatprep.subr.mxu0 %v8389_v1  ;;  %8399 = vst [vmem:[#allocation37_spill] sm:$0xff] %v6372_v8  ;;  %8400 = vst [vmem:[#allocation38_spill] sm:$0xff] %v6375_v52  ;;  %v6378_v16 = vld [vmem:[#allocation7 + $0x118] sm:$0xff]  ;;  %v6381_v1 = vld [vmem:[#allocation7 + $0x100] sm:$0xff] }
 0x30a   : > { %1912 = vmatpush1.msra.mxu1 %v8390_v7  ;;  %1983 = vmatpush1.msra.mxu0 %v8391_v6  ;;  %8401 = vst [vmem:[#allocation39_spill] sm:$0xff] %v6378_v16  ;;  %8402 = vst [vmem:[#allocation40_spill] sm:$0xff] %v6381_v1  ;;  %v6384_v7 = vld [vmem:[#allocation7 + $0x110] sm:$0xff]  ;;  %v6387_v6 = vld [vmem:[#allocation7 + $0xe8] sm:$0xff] }
 0x30b   : > { %1913 = vmatprep.subr.mxu1 %v5868_v47  ;;  %1984 = vmatprep.subr.mxu0 %v8392_v61  ;;  %v6315_v47 = vld [vmem:[#allocation7 + $0x1a8] sm:$0xff]  ;;  %8403 = vst [vmem:[#allocation41_spill] sm:$0xff] %v6384_v7  ;;  %8404 = vst [vmem:[#allocation42_spill] sm:$0xff] %v6387_v6  ;;  %v6390_v61 = vld [vmem:[#allocation7 + $0xf8] sm:$0xff] }
 0x30c   : > { %1914 = vmatpush1.msra.mxu1 %v5874_v46  ;;  %1985 = vmatpush1.msra.mxu0 %v5876_v41  ;;  %v6297_v41 = vld [vmem:[#allocation7 + $0x1e0] sm:$0xff]  ;;  %8405 = vst [vmem:[#allocation43_spill] sm:$0xff] %v6390_v61 }
 0x30d   : > { %1915 = vmatprep.subr.mxu1 %v5880_v40  ;;  %1986 = vmatprep.subr.mxu0 %v5882_v45  ;;  %v6294_v40 = vld [vmem:[#allocation7 + $0x1f8] sm:$0xff]  ;;  %v6309_v45 = vld [vmem:[#allocation7 + $0x1c0] sm:$0xff] }
 0x30e   : > { %1916 = vmatpush1.msra.mxu1 %v5886_v33  ;;  %1987 = vmatpush1.msra.mxu0 %v5888_v56  ;;  %v6291_v56 = vld [vmem:[#allocation7 + $0x1e8] sm:$0xff]  ;;  %v6312_v33 = vld [vmem:[#allocation7 + $0x1d0] sm:$0xff] }
 0x30f   : > { %v4548_v57 = vpop.eup %4547  ;;  %1917 = vmatprep.subr.mxu1 %v5892_v48  ;;  %1988 = vmatprep.subr.mxu0 %v5894_v43  ;;  %v6300_v43 = vld [vmem:[#allocation7 + $0x1f0] sm:$0xff]  ;;  %v6318_v48 = vld [vmem:[#allocation7 + $0x1b8] sm:$0xff] }
 0x310   : > { %1918 = vmatpush1.msra.mxu1 %v5898_v44  ;;  %1951 = vmatprep.mubr.f32.mxu1 %v8226_v28  ;;  %v6285_v46 = vmul.f32 %v4548_v57, %v4546_v19  ;;  %v6306_v44 = vld [vmem:[#allocation7 + $0x1d8] sm:$0xff]  ;;  %v6393_v19 = vld [vmem:[#allocation7 + $0xe0] sm:$0xff]  ;;  %v6396_v57 = vld [vmem:[#allocation7 + $0xf0] sm:$0xff] }
 0x311   : > { %1989 = vmatpush1.msra.mxu0 %v5902_v38  ;;  %2022 = vmatprep.mubr.f32.mxu0 %v8226_v28  ;;  %v6303_v38 = vld [vmem:[#allocation7 + $0x1c8] sm:$0xff]  ;;  %8406 = vst [vmem:[#allocation44_spill] sm:$0xff] %v6393_v19  ;;  %8407 = vst [vmem:[#allocation45_spill] sm:$0xff] %v6396_v57 }
 0x312   : > { %8393 = vst [vmem:[#allocation31_spill] sm:$0xff] %v6285_v46  ;;  %1952 = vmatmul.mubr.f32.vlgmr.msra.gmra.mxu1 %v6285_v46  ;;  %2023 = vmatmul.mubr.f32.vlgmr.msra.gmra.mxu0 %v6285_v46  ;;  %v6420_v46 = vld [vmem:[#allocation7 + $0xb0] sm:$0xff] }
 0x313   : > { %2062 = vmatprep.subr.mxu1 %v6291_v56  ;;  %2133 = vmatprep.subr.mxu0 %v6294_v40  ;;  %8415 = vst [vmem:[#allocation53_spill] sm:$0xff] %v6420_v46 }
 0x314   : > { %2063 = vmatpush1.msra.mxu1 %v6297_v41  ;;  %2134 = vmatpush1.msra.mxu0 %v6300_v43 }
 0x315   : > { %2064 = vmatprep.subr.mxu1 %v6303_v38  ;;  %2135 = vmatprep.subr.mxu0 %v6306_v44 }
 0x316   : > { %2065 = vmatpush1.msra.mxu1 %v6309_v45  ;;  %2136 = vmatpush1.msra.mxu0 %v6312_v33 }
 0x317   : > { %2066 = vmatprep.subr.mxu1 %v6315_v47  ;;  %2137 = vmatprep.subr.mxu0 %v6318_v48 }
 0x318   : > { %2067 = vmatpush1.msra.mxu1 %v6321_v59  ;;  %2138 = vmatpush1.msra.mxu0 %v6324_v3 }
 0x319   : > { %2068 = vmatprep.subr.mxu1 %v6327_v54  ;;  %2139 = vmatprep.subr.mxu0 %v6330_v42 }
 0x31a   : > { %2069 = vmatpush1.msra.mxu1 %v6333_v58  ;;  %2140 = vmatpush1.msra.mxu0 %v6336_v60 }
 0x31b   : > { %2070 = vmatprep.subr.mxu1 %v6339_v21  ;;  %2141 = vmatprep.subr.mxu0 %v6342_v39 }
 0x31c   : > { %2071 = vmatpush1.msra.mxu1 %v6345_v5  ;;  %2142 = vmatpush1.msra.mxu0 %v6348_v37 }
 0x31d   : > { %2072 = vmatprep.subr.mxu1 %v6351_v30  ;;  %2143 = vmatprep.subr.mxu0 %v6354_v29 }
 0x31e   : > { %2073 = vmatpush1.msra.mxu1 %v6357_v2  ;;  %2144 = vmatpush1.msra.mxu0 %v6360_v12 }
 0x31f   : > { %2074 = vmatprep.subr.mxu1 %v6363_v9  ;;  %2145 = vmatprep.subr.mxu0 %v6366_v18 }
 0x320   : > { %2075 = vmatpush1.msra.mxu1 %v6369_v0  ;;  %2146 = vmatpush1.msra.mxu0 %v6372_v8 }
 0x321   : > { %2076 = vmatprep.subr.mxu1 %v6375_v52  ;;  %2147 = vmatprep.subr.mxu0 %v6378_v16 }
 0x322   : > { %2077 = vmatpush1.msra.mxu1 %v6381_v1  ;;  %2148 = vmatpush1.msra.mxu0 %v6384_v7 }
 0x323   : > { %2078 = vmatprep.subr.mxu1 %v6387_v6  ;;  %2149 = vmatprep.subr.mxu0 %v6390_v61 }
 0x324   : > { %2079 = vmatpush1.msra.mxu1 %v6393_v19  ;;  %2150 = vmatpush1.msra.mxu0 %v6396_v57 }
 0x325   : > { %2080 = vmatprep.subr.mxu1 %v6399_v14  ;;  %2151 = vmatprep.subr.mxu0 %v6402_v53 }
 0x326   : > { %2081 = vmatpush1.msra.mxu1 %v6405_v4  ;;  %2152 = vmatpush1.msra.mxu0 %v6408_v10 }
 0x327   : > { %2082 = vmatprep.subr.mxu1 %v6411_v51  ;;  %2153 = vmatprep.subr.mxu0 %v6414_v50 }
 0x328   : > { %2083 = vmatpush1.msra.mxu1 %v6417_v36  ;;  %2154 = vmatpush1.msra.mxu0 %v6420_v46 }
 0x329   : > { %2084 = vmatprep.subr.mxu1 %v6423_v63  ;;  %2155 = vmatprep.subr.mxu0 %v6426_v34 }
 0x32a   : > { %2085 = vmatpush1.msra.mxu1 %v6429_v22  ;;  %2156 = vmatpush1.msra.mxu0 %v6432_v49  ;;  %v6450_v49 = vld [vmem:[#allocation7 + $0x58] sm:$0xff] }
 0x32b   : > { %2086 = vmatprep.subr.mxu1 %v6435_v62  ;;  %2157 = vmatprep.subr.mxu0 %v6438_v15  ;;  %8425 = vst [vmem:[#allocation63_spill] sm:$0xff] %v6450_v49  ;;  %v6453_v62 = vld [vmem:[#allocation7 + $0x40] sm:$0xff]  ;;  %v6456_v15 = vld [vmem:[#allocation7 + $0x50] sm:$0xff] }
 0x32c   : > { %2087 = vmatpush1.msra.mxu1 %v6441_v32  ;;  %2158 = vmatpush1.msra.mxu0 %v6444_v31  ;;  %8426 = vst [vmem:[#allocation64_spill] sm:$0xff] %v6453_v62  ;;  %8427 = vst [vmem:[#allocation65_spill] sm:$0xff] %v6456_v15  ;;  %v6459_v32 = vld [vmem:[#allocation7 + $0x28] sm:$0xff]  ;;  %v6462_v31 = vld [vmem:[#allocation7 + $0x38] sm:$0xff] }
 0x32d   : > { %2088 = vmatprep.subr.mxu1 %v6447_v27  ;;  %2159 = vmatprep.subr.mxu0 %v6450_v49  ;;  %8428 = vst [vmem:[#allocation66_spill] sm:$0xff] %v6459_v32  ;;  %8429 = vst [vmem:[#allocation67_spill] sm:$0xff] %v6462_v31  ;;  %v6465_v27 = vld [vmem:[#allocation7 + $0x20] sm:$0xff]  ;;  %v6468_v49 = vld [vmem:[#allocation7 + $0x30] sm:$0xff] }
 0x32e   : > { %2089 = vmatpush1.msra.mxu1 %v6453_v62  ;;  %2160 = vmatpush1.msra.mxu0 %v6456_v15  ;;  %8430 = vst [vmem:[#allocation68_spill] sm:$0xff] %v6465_v27  ;;  %8431 = vst [vmem:[#allocation69_spill] sm:$0xff] %v6468_v49  ;;  %v6471_v62 = vld [vmem:[#allocation7 + $0x8] sm:$0xff]  ;;  %v6474_v15 = vld [vmem:[#allocation7 + $0x18] sm:$0xff] }
 0x32f   : > { %2090 = vmatprep.subr.mxu1 %v6459_v32  ;;  %2161 = vmatprep.subr.mxu0 %v6462_v31  ;;  %8432 = vst [vmem:[#allocation70_spill] sm:$0xff] %v6471_v62  ;;  %8433 = vst [vmem:[#allocation71_spill] sm:$0xff] %v6474_v15  ;;  %v6477_v32 = vld [vmem:[#allocation7] sm:$0xff]  ;;  %v6480_v31 = vld [vmem:[#allocation7 + $0x10] sm:$0xff] }
 0x330   : > { %2091 = vmatpush1.msra.mxu1 %v6465_v27  ;;  %2162 = vmatpush1.msra.mxu0 %v6468_v49  ;;  %8434 = vst [vmem:[#allocation72_spill] sm:$0xff] %v6477_v32  ;;  %8435 = vst [vmem:[#allocation73_spill] sm:$0xff] %v6480_v31  ;;  %v6485_v49 = vld [vmem:[#allocation10 + $0x1e8] sm:$0xff] }
 0x331   : > { %2092 = vmatprep.subr.mxu1 %v6471_v62  ;;  %2163 = vmatprep.subr.mxu0 %v6474_v15  ;;  %8436 = vst [vmem:[#allocation74_spill] sm:$0xff] %v6485_v49  ;;  %v6488_v62 = vld [vmem:[#allocation10 + $0x1f8] sm:$0xff] }
 0x332   : > { %2093 = vmatpush1.msra.mxu1 %v6477_v32  ;;  %2164 = vmatpush1.msra.mxu0 %v6480_v31  ;;  %8437 = vst [vmem:[#allocation75_spill] sm:$0xff] %v6488_v62 }
 0x333   : > { %2126 = vmatprep.mubr.f32.mxu1 %v8226_v28  ;;  %2197 = vmatprep.mubr.f32.mxu0 %v8226_v28 }
 0x334   : > { %2237 = vmatprep.subr.mxu1 %v6485_v49  ;;  %2308 = vmatprep.subr.mxu0 %v6488_v62 }
 0x3b1   : > { %v1778_v15 = vpop.f32.mrf.mxu1  ;;  %v1849_v31 = vpop.f32.mrf.mxu0 }
 0x3b2   : > { %v1854_v27 = vadd.f32 %v1778_v15, %v6017_v20  ;;  %v1856_v49 = vadd.f32 %v1849_v31, %v6020_v55 }
 0x3b3   : > { %v1780_v32 = vpop.f32.mrf.mxu1  ;;  %v1851_v46 = vpop.f32.mrf.mxu0 }
 0x3b4   : > { %v4314_v22 = vmul.f32 -1.442695, %v1854_v27  ;;  %v1855_v34 = vadd.f32 %v1780_v32, %v6023_v23  ;;  %v1857_v36 = vadd.f32 %v1851_v46, %v6026_v24 }
 0x3b6   : > { %4549 = vpow2.f32 %v4314_v22  ;;  %v4315_v63 = vmul.f32 -1.442695, %v1855_v34  ;;  %v4316_v50 = vmul.f32 -1.442695, %v1857_v36 }
 0x3b8   : > { %4551 = vpow2.f32 %v4315_v63 }
 0x3b9   : > { %4553 = vtanh.f32 %v1856_v49 }
 0x3ba   : > { %4555 = vpow2.f32 %v4316_v50 }
 0x3c3   : > { %v4550_v51 = vpop.eup %4549 }
 0x3c4   : > { %v1861_v10 = vadd.f32 1.0, %v4550_v51 }
 0x3c5   : > { %v4552_v62 = vpop.eup %4551 }
 0x3c6   : > { %4557 = vrcp.f32 %v1861_v10  ;;  %v1867_v20 = vadd.f32 1.0, %v4552_v62  ;;  %v4554_v27 = vpop.eup %4553 }
 0x3c7   : > { %v4556_v23 = vpop.eup %4555 }
 0x3c8   : > { %4559 = vrcp.f32 %v1867_v20  ;;  %v1874_v36 = vadd.f32 1.0, %v4556_v23 }
 0x3d2   : > { %v1953_v15 = vpop.f32.mrf.mxu1  ;;  %v2024_v50 = vpop.f32.mrf.mxu0 }
 0x3d3   : > { %v4558_v32 = vpop.eup %4557  ;;  %v2029_v22 = vadd.f32 %v1953_v15, %v6192_v17  ;;  %v2031_v17 = vadd.f32 %v2024_v50, %v6195_v26  ;;  %v6510_v26 = vld [vmem:[#allocation10 + $0x1f0] sm:$0xff] }
 0x3d4   : > { %v1878_v34 = vmul.f32 %v4558_v32, %v4554_v27  ;;  %v1955_v63 = vpop.f32.mrf.mxu1  ;;  %v2026_v62 = vpop.f32.mrf.mxu0  ;;  %v6534_v50 = vld [vmem:[#allocation10 + $0x1b0] sm:$0xff] }
 0x3d5   : > { %v4560_v24 = vpop.eup %4559  ;;  %v4317_v46 = vmul.f32 -1.442695, %v2029_v22  ;;  %v2030_v55 = vadd.f32 %v1955_v63, %v6198_v25  ;;  %v2032_v49 = vadd.f32 %v2026_v62, %v6201_v35  ;;  %v6507_v35 = vld [vmem:[#allocation10 + $0x1e0] sm:$0xff]  ;;  %v6516_v63 = vld [vmem:[#allocation10 + $0x1d8] sm:$0xff] }
 0x3d6   : > { %v1877_v31 = vmul.f32 %v4560_v24, %v6211_v13  ;;  %v6519_v24 = vld [vmem:[#allocation10 + $0x1c0] sm:$0xff]  ;;  %v6540_v62 = vld [vmem:[#allocation10 + $0x198] sm:$0xff] }
 0x3d7   : > { %4561 = vpow2.f32 %v4317_v46  ;;  %v4318_v10 = vmul.f32 -1.442695, %v2030_v55  ;;  %v4319_v20 = vmul.f32 -1.442695, %v2032_v49  ;;  %v6522_v46 = vld [vmem:[#allocation10 + $0x1d0] sm:$0xff]  ;;  %v6525_v55 = vld [vmem:[#allocation10 + $0x1a8] sm:$0xff] }
 0x3d8   : > { %v6498_v51 = vadd.f32 %v1878_v34, %v1877_v31  ;;  %v6513_v34 = vld [vmem:[#allocation10 + $0x1c8] sm:$0xff]  ;;  %v6528_v31 = vld [vmem:[#allocation10 + $0x1b8] sm:$0xff]  ;;  %8439 = vst [vmem:[#allocation77_spill] sm:$0xff] %v6540_v62 }
 0x3d9   : > { %4563 = vpow2.f32 %v4318_v10  ;;  %v6537_v10 = vld [vmem:[#allocation10 + $0x188] sm:$0xff] }
 0x3da   : > { %4565 = vrcp.f32 %v1874_v36  ;;  %v6531_v36 = vld [vmem:[#allocation10 + $0x1a0] sm:$0xff]  ;;  %8438 = vst [vmem:[#allocation76_spill] sm:$0xff] %v6537_v10 }
 0x3db   : > { %4567 = vtanh.f32 %v6498_v51 }
 0x3dc   : > { %4569 = vtanh.f32 %v2031_v17  ;;  %v6543_v17 = vld [vmem:[#allocation10 + $0x180] sm:$0xff] }
 0x3dd   : > { %4571 = vpow2.f32 %v4319_v20  ;;  %8440 = vst [vmem:[#allocation78_spill] sm:$0xff] %v6543_v17  ;;  %v6546_v20 = vld [vmem:[#allocation10 + $0x190] sm:$0xff] }
 0x3de   : > { %8441 = vst [vmem:[#allocation79_spill] sm:$0xff] %v6546_v20 }
 0x3e4   : > { %v4562_v27 = vpop.eup %4561 }
 0x3e5   : > { %v2036_v25 = vadd.f32 1.0, %v4562_v27 }
 0x3e6   : > { %v4564_v13 = vpop.eup %4563 }
 0x3e7   : > { %v4566_v23 = vpop.eup %4565  ;;  %4573 = vrcp.f32 %v2036_v25  ;;  %v2042_v15 = vadd.f32 1.0, %v4564_v13  ;;  %v6549_v25 = vld [vmem:[#allocation10 + $0x168] sm:$0xff]  ;;  %v6552_v13 = vld [vmem:[#allocation10 + $0x178] sm:$0xff] }
 0x3e8   : > { %v4568_v32 = vpop.eup %4567  ;;  %8442 = vst [vmem:[#allocation80_spill] sm:$0xff] %v6549_v25  ;;  %8443 = vst [vmem:[#allocation81_spill] sm:$0xff] %v6552_v13 }
 0x3e9   : > { %4575 = vrcp.f32 %v2042_v15  ;;  %v6503_v22 = vmul.f32 %v4568_v32, %v4566_v23  ;;  %v4570_v49 = vpop.eup %4569  ;;  %v6555_v15 = vld [vmem:[#allocation10 + $0x160] sm:$0xff]  ;;  %v6558_v32 = vld [vmem:[#allocation10 + $0x170] sm:$0xff] }
 0x3ea   : > { %v4572_v27 = vpop.eup %4571  ;;  %8444 = vst [vmem:[#allocation117_spill] sm:$0xff] %v6555_v15  ;;  %8445 = vst [vmem:[#allocation118_spill] sm:$0xff] %v6558_v32 }
 0x3eb   : > { %2127 = vmatmul.mubr.f32.vlgmr.msra.gmra.mxu1 %v6503_v22  ;;  %2198 = vmatmul.mubr.f32.vlgmr.msra.gmra.mxu0 %v6503_v22 }
 0x3ec   : > { %2238 = vmatpush1.msra.mxu1 %v6507_v35  ;;  %2309 = vmatpush1.msra.mxu0 %v6510_v26 }
 0x3ed   : > { %2239 = vmatprep.subr.mxu1 %v6513_v34  ;;  %2310 = vmatprep.subr.mxu0 %v6516_v63 }
 0x3ee   : > { %2240 = vmatpush1.msra.mxu1 %v6519_v24  ;;  %2311 = vmatpush1.msra.mxu0 %v6522_v46 }
 0x3ef   : > { %2241 = vmatprep.subr.mxu1 %v6525_v55  ;;  %2312 = vmatprep.subr.mxu0 %v6528_v31 }
 0x3f0   : > { %2242 = vmatpush1.msra.mxu1 %v6531_v36  ;;  %2313 = vmatpush1.msra.mxu0 %v6534_v50 }
 0x3f1   : > { %2243 = vmatprep.subr.mxu1 %v6537_v10  ;;  %2314 = vmatprep.subr.mxu0 %v6540_v62  ;;  %v6564_v62 = vld [vmem:[#allocation10 + $0x158] sm:$0xff]  ;;  %v6567_v10 = vld [vmem:[#allocation10 + $0x140] sm:$0xff] }
 0x3f2   : > { %2244 = vmatpush1.msra.mxu1 %v6543_v17  ;;  %2315 = vmatpush1.msra.mxu0 %v6546_v20  ;;  %v6561_v20 = vld [vmem:[#allocation10 + $0x148] sm:$0xff]  ;;  %8447 = vst [vmem:[#allocation120_spill] sm:$0xff] %v6564_v62  ;;  %8448 = vst [vmem:[#allocation121_spill] sm:$0xff] %v6567_v10 }
 0x3f3   : > { %2245 = vmatprep.subr.mxu1 %v6549_v25  ;;  %2316 = vmatprep.subr.mxu0 %v6552_v13  ;;  %8446 = vst [vmem:[#allocation119_spill] sm:$0xff] %v6561_v20  ;;  %v2049_v13 = vadd.f32 1.0, %v4572_v27  ;;  %v6583_v27 = vld [vmem:[#allocation10 + $0x130] sm:$0xff] }
 0x3f4   : > { %v4574_v23 = vpop.eup %4573  ;;  %2246 = vmatpush1.msra.mxu1 %v6555_v15  ;;  %2317 = vmatpush1.msra.mxu0 %v6558_v32  ;;  %v6570_v15 = vld [vmem:[#allocation10 + $0x150] sm:$0xff]  ;;  %8452 = vst [vmem:[#allocation125_spill] sm:$0xff] %v6583_v27 }
 0x3f5   : > { %v2053_v17 = vmul.f32 %v4574_v23, %v4570_v49  ;;  %2247 = vmatprep.subr.mxu1 %v6561_v20  ;;  %2318 = vmatprep.subr.mxu0 %v6564_v62  ;;  %8449 = vst [vmem:[#allocation122_spill] sm:$0xff] %v6570_v15  ;;  %v6574_v23 = vld [vmem:[#allocation10 + $0x128] sm:$0xff]  ;;  %v6577_v20 = vld [vmem:[#allocation10 + $0x138] sm:$0xff]  ;;  %v6580_v62 = vld [vmem:[#allocation10 + $0x120] sm:$0xff]  ;;  %4577 = vrcp.f32 %v2049_v13 }
 0x3f6   : > { %v4576_v25 = vpop.eup %4575  ;;  %2248 = vmatpush1.msra.mxu1 %v6567_v10  ;;  %2319 = vmatpush1.msra.mxu0 %v6570_v15  ;;  %8450 = vst [vmem:[#allocation123_spill] sm:$0xff] %v6577_v20  ;;  %8451 = vst [vmem:[#allocation124_spill] sm:$0xff] %v6580_v62  ;;  %v6588_v15 = vld [vmem:[#allocation10 + $0x108] sm:$0xff]  ;;  %v6610_v13 = vld [vmem:[#allocation10 + $0xf0] sm:$0xff] }
 0x3f7   : > { %v2052_v49 = vmul.f32 %v4576_v25, %v6248_v11  ;;  %2249 = vmatprep.subr.mxu1 %v6574_v23  ;;  %2320 = vmatprep.subr.mxu0 %v6577_v20  ;;  %8453 = vst [vmem:[#allocation126_spill] sm:$0xff] %v6588_v15  ;;  %v6591_v11 = vld [vmem:[#allocation10 + $0x118] sm:$0xff]  ;;  %v6594_v25 = vld [vmem:[#allocation10 + $0x100] sm:$0xff]  ;;  %8460 = vst [vmem:[#allocation133_spill] sm:$0xff] %v6610_v13 }
 0x3f8   : > { %2250 = vmatpush1.msra.mxu1 %v6580_v62  ;;  %2321 = vmatpush1.msra.mxu0 %v6583_v27  ;;  %8454 = vst [vmem:[#allocation127_spill] sm:$0xff] %v6591_v11  ;;  %8455 = vst [vmem:[#allocation128_spill] sm:$0xff] %v6594_v25  ;;  %v6597_v62 = vld [vmem:[#allocation10 + $0x110] sm:$0xff]  ;;  %v6600_v27 = vld [vmem:[#allocation10 + $0xe8] sm:$0xff] }
 0x3f9   : > { %v6586_v10 = vadd.f32 %v2053_v17, %v2052_v49  ;;  %2251 = vmatprep.subr.mxu1 %v6588_v15  ;;  %2322 = vmatprep.subr.mxu0 %v6591_v11  ;;  %8456 = vst [vmem:[#allocation129_spill] sm:$0xff] %v6597_v62  ;;  %8457 = vst [vmem:[#allocation130_spill] sm:$0xff] %v6600_v27  ;;  %v6603_v17 = vld [vmem:[#allocation10 + $0xf8] sm:$0xff]  ;;  %v6607_v49 = vld [vmem:[#allocation10 + $0xe0] sm:$0xff] }
 0x3fa   : > { %2252 = vmatpush1.msra.mxu1 %v6594_v25  ;;  %2323 = vmatpush1.msra.mxu0 %v6597_v62  ;;  %8458 = vst [vmem:[#allocation131_spill] sm:$0xff] %v6603_v17  ;;  %8459 = vst [vmem:[#allocation132_spill] sm:$0xff] %v6607_v49  ;;  %v6613_v25 = vld [vmem:[#allocation10 + $0xc8] sm:$0xff]  ;;  %v6616_v62 = vld [vmem:[#allocation10 + $0xd8] sm:$0xff] }
 0x3fb   : > { %2253 = vmatprep.subr.mxu1 %v6600_v27  ;;  %2324 = vmatprep.subr.mxu0 %v6603_v17  ;;  %4579 = vtanh.f32 %v6586_v10  ;;  %8461 = vst [vmem:[#allocation134_spill] sm:$0xff] %v6613_v25  ;;  %8462 = vst [vmem:[#allocation135_spill] sm:$0xff] %v6616_v62  ;;  %v6619_v27 = vld [vmem:[#allocation10 + $0xc0] sm:$0xff]  ;;  %v6622_v17 = vld [vmem:[#allocation10 + $0xd0] sm:$0xff] }
 0x3fc   : > { %2254 = vmatpush1.msra.mxu1 %v6607_v49  ;;  %2325 = vmatpush1.msra.mxu0 %v6610_v13  ;;  %8463 = vst [vmem:[#allocation136_spill] sm:$0xff] %v6619_v27  ;;  %8464 = vst [vmem:[#allocation137_spill] sm:$0xff] %v6622_v17  ;;  %v6625_v49 = vld [vmem:[#allocation10 + $0xa8] sm:$0xff]  ;;  %v6628_v13 = vld [vmem:[#allocation10 + $0xb8] sm:$0xff] }
 0x3fd   : > { %2255 = vmatprep.subr.mxu1 %v6613_v25  ;;  %2326 = vmatprep.subr.mxu0 %v6616_v62  ;;  %8465 = vst [vmem:[#allocation138_spill] sm:$0xff] %v6625_v49  ;;  %8466 = vst [vmem:[#allocation139_spill] sm:$0xff] %v6628_v13  ;;  %v6631_v25 = vld [vmem:[#allocation10 + $0xa0] sm:$0xff]  ;;  %v6634_v62 = vld [vmem:[#allocation10 + $0xb0] sm:$0xff] }
 0x3fe   : > { %2256 = vmatpush1.msra.mxu1 %v6619_v27  ;;  %2327 = vmatpush1.msra.mxu0 %v6622_v17  ;;  %8467 = vst [vmem:[#allocation140_spill] sm:$0xff] %v6631_v25  ;;  %8468 = vst [vmem:[#allocation141_spill] sm:$0xff] %v6634_v62  ;;  %v6637_v27 = vld [vmem:[#allocation10 + $0x88] sm:$0xff]  ;;  %v6640_v17 = vld [vmem:[#allocation10 + $0x98] sm:$0xff] }
 0x3ff   : > { %2257 = vmatprep.subr.mxu1 %v6625_v49  ;;  %2328 = vmatprep.subr.mxu0 %v6628_v13  ;;  %8469 = vst [vmem:[#allocation142_spill] sm:$0xff] %v6637_v27  ;;  %8470 = vst [vmem:[#allocation143_spill] sm:$0xff] %v6640_v17  ;;  %v6643_v49 = vld [vmem:[#allocation10 + $0x80] sm:$0xff]  ;;  %v6646_v13 = vld [vmem:[#allocation10 + $0x90] sm:$0xff] }
 0x400   : > { %2258 = vmatpush1.msra.mxu1 %v6631_v25  ;;  %2329 = vmatpush1.msra.mxu0 %v6634_v62  ;;  %8471 = vst [vmem:[#allocation144_spill] sm:$0xff] %v6643_v49  ;;  %8472 = vst [vmem:[#allocation145_spill] sm:$0xff] %v6646_v13  ;;  %v6649_v25 = vld [vmem:[#allocation10 + $0x68] sm:$0xff]  ;;  %v6652_v62 = vld [vmem:[#allocation10 + $0x78] sm:$0xff] }
 0x401   : > { %2259 = vmatprep.subr.mxu1 %v6637_v27  ;;  %2330 = vmatprep.subr.mxu0 %v6640_v17  ;;  %8473 = vst [vmem:[#allocation146_spill] sm:$0xff] %v6649_v25  ;;  %8474 = vst [vmem:[#allocation147_spill] sm:$0xff] %v6652_v62  ;;  %v6655_v27 = vld [vmem:[#allocation10 + $0x60] sm:$0xff]  ;;  %v6658_v17 = vld [vmem:[#allocation10 + $0x70] sm:$0xff] }
 0x402   : > { %2260 = vmatpush1.msra.mxu1 %v6643_v49  ;;  %2331 = vmatpush1.msra.mxu0 %v6646_v13  ;;  %8475 = vst [vmem:[#allocation148_spill] sm:$0xff] %v6655_v27  ;;  %8476 = vst [vmem:[#allocation149_spill] sm:$0xff] %v6658_v17  ;;  %v6661_v49 = vld [vmem:[#allocation10 + $0x48] sm:$0xff]  ;;  %v6664_v13 = vld [vmem:[#allocation10 + $0x58] sm:$0xff] }
 0x403   : > { %2261 = vmatprep.subr.mxu1 %v6649_v25  ;;  %2332 = vmatprep.subr.mxu0 %v6652_v62  ;;  %8477 = vst [vmem:[#allocation150_spill] sm:$0xff] %v6661_v49  ;;  %8478 = vst [vmem:[#allocation151_spill] sm:$0xff] %v6664_v13  ;;  %v6667_v25 = vld [vmem:[#allocation10 + $0x40] sm:$0xff]  ;;  %v6670_v62 = vld [vmem:[#allocation10 + $0x50] sm:$0xff] }
 0x404   : > { %2262 = vmatpush1.msra.mxu1 %v6655_v27  ;;  %2333 = vmatpush1.msra.mxu0 %v6658_v17  ;;  %8479 = vst [vmem:[#allocation152_spill] sm:$0xff] %v6667_v25  ;;  %8480 = vst [vmem:[#allocation153_spill] sm:$0xff] %v6670_v62  ;;  %v4578_v27 = vpop.eup %4577  ;;  %v6673_v11 = vld [vmem:[#allocation10 + $0x28] sm:$0xff]  ;;  %v6676_v17 = vld [vmem:[#allocation10 + $0x38] sm:$0xff] }
 0x405   : > { %2263 = vmatprep.subr.mxu1 %v6661_v49  ;;  %2334 = vmatprep.subr.mxu0 %v6664_v13  ;;  %8481 = vst [vmem:[#allocation154_spill] sm:$0xff] %v6673_v11  ;;  %8482 = vst [vmem:[#allocation155_spill] sm:$0xff] %v6676_v17  ;;  %v6679_v15 = vld [vmem:[#allocation10 + $0x20] sm:$0xff]  ;;  %v6682_v13 = vld [vmem:[#allocation10 + $0x30] sm:$0xff] }
 0x406   : > { %2264 = vmatpush1.msra.mxu1 %v6667_v25  ;;  %2335 = vmatpush1.msra.mxu0 %v6670_v62  ;;  %8483 = vst [vmem:[#allocation156_spill] sm:$0xff] %v6679_v15  ;;  %v6685_v25 = vld [vmem:[#allocation10 + $0x8] sm:$0xff]  ;;  %v6688_v62 = vld [vmem:[#allocation10 + $0x18] sm:$0xff] }
 0x407   : > { %2265 = vmatprep.subr.mxu1 %v6673_v11  ;;  %2336 = vmatprep.subr.mxu0 %v6676_v17  ;;  %v6693_v17 = vld [vmem:[#allocation10] sm:$0xff] }
 0x408   : > { %v4580_v49 = vpop.eup %4579  ;;  %2266 = vmatpush1.msra.mxu1 %v6679_v15  ;;  %2337 = vmatpush1.msra.mxu0 %v6682_v13  ;;  %v6697_v15 = vld [vmem:[#allocation10 + $0x10] sm:$0xff] }
 0x409   : > { %2267 = vmatprep.subr.mxu1 %v6685_v25  ;;  %2338 = vmatprep.subr.mxu0 %v6688_v62  ;;  %v6691_v11 = vmul.f32 %v4580_v49, %v4578_v27  ;;  %v8484_v27 = vld [vmem:[#allocation49_spill] sm:$0xff]  ;;  %v8485_v49 = vld [vmem:[#allocation50_spill] sm:$0xff] }
 0x40a   : > { %2268 = vmatpush1.msra.mxu1 %v6693_v17  ;;  %2301 = vmatprep.mubr.f32.mxu1 %v8226_v28 }
 0x40b   : > { %2339 = vmatpush1.msra.mxu0 %v6697_v15  ;;  %2372 = vmatprep.mubr.f32.mxu0 %v8226_v28 }
 0x40c   : > { %2302 = vmatmul.mubr.f32.vlgmr.msra.gmra.mxu1 %v6691_v11  ;;  %2373 = vmatmul.mubr.f32.vlgmr.msra.gmra.mxu0 %v6691_v11 }
 0x40d   : > { %2412 = vmatprep.subr.mxu1 %v6291_v56  ;;  %2483 = vmatprep.subr.mxu0 %v6294_v40 }
 0x40e   : > { %2413 = vmatpush1.msra.mxu1 %v6297_v41  ;;  %2484 = vmatpush1.msra.mxu0 %v6300_v43 }
 0x40f   : > { %2414 = vmatprep.subr.mxu1 %v6303_v38  ;;  %2485 = vmatprep.subr.mxu0 %v6306_v44 }
 0x410   : > { %2415 = vmatpush1.msra.mxu1 %v6309_v45  ;;  %2486 = vmatpush1.msra.mxu0 %v6312_v33 }
 0x411   : > { %2416 = vmatprep.subr.mxu1 %v6315_v47  ;;  %2487 = vmatprep.subr.mxu0 %v6318_v48 }
 0x412   : > { %2417 = vmatpush1.msra.mxu1 %v6321_v59  ;;  %2488 = vmatpush1.msra.mxu0 %v6324_v3 }
 0x413   : > { %2418 = vmatprep.subr.mxu1 %v6327_v54  ;;  %2489 = vmatprep.subr.mxu0 %v6330_v42 }
 0x414   : > { %2419 = vmatpush1.msra.mxu1 %v6333_v58  ;;  %2490 = vmatpush1.msra.mxu0 %v6336_v60 }
 0x415   : > { %2420 = vmatprep.subr.mxu1 %v6339_v21  ;;  %2491 = vmatprep.subr.mxu0 %v6342_v39 }
 0x416   : > { %2421 = vmatpush1.msra.mxu1 %v6345_v5  ;;  %2492 = vmatpush1.msra.mxu0 %v6348_v37 }
 0x417   : > { %2422 = vmatprep.subr.mxu1 %v6351_v30  ;;  %2493 = vmatprep.subr.mxu0 %v6354_v29 }
 0x418   : > { %2423 = vmatpush1.msra.mxu1 %v6357_v2  ;;  %2494 = vmatpush1.msra.mxu0 %v6360_v12 }
 0x419   : > { %2424 = vmatprep.subr.mxu1 %v6363_v9  ;;  %2495 = vmatprep.subr.mxu0 %v6366_v18 }
 0x41a   : > { %2425 = vmatpush1.msra.mxu1 %v6369_v0  ;;  %2496 = vmatpush1.msra.mxu0 %v6372_v8  ;;  %v8514_v0 = vld [vmem:[#allocation18_spill] sm:$0xff] }
 0x41b   : > { %2426 = vmatprep.subr.mxu1 %v6375_v52  ;;  %2497 = vmatprep.subr.mxu0 %v6378_v16  ;;  %v8513_v52 = vld [vmem:[#allocation20_spill] sm:$0xff] }
 0x41c   : > { %2427 = vmatpush1.msra.mxu1 %v6381_v1  ;;  %2498 = vmatpush1.msra.mxu0 %v6384_v7  ;;  %v8486_v1 = vld [vmem:[#allocation51_spill] sm:$0xff]  ;;  %v8487_v7 = vld [vmem:[#allocation52_spill] sm:$0xff] }
 0x41d   : > { %2428 = vmatprep.subr.mxu1 %v6387_v6  ;;  %2499 = vmatprep.subr.mxu0 %v6390_v61  ;;  %v8488_v6 = vld [vmem:[#allocation53_spill] sm:$0xff]  ;;  %v8489_v61 = vld [vmem:[#allocation54_spill] sm:$0xff] }
 0x41e   : > { %2429 = vmatpush1.msra.mxu1 %v6393_v19  ;;  %2500 = vmatpush1.msra.mxu0 %v6396_v57  ;;  %v8490_v19 = vld [vmem:[#allocation55_spill] sm:$0xff]  ;;  %v8491_v57 = vld [vmem:[#allocation56_spill] sm:$0xff] }
 0x41f   : > { %2430 = vmatprep.subr.mxu1 %v6399_v14  ;;  %2501 = vmatprep.subr.mxu0 %v6402_v53  ;;  %v8492_v14 = vld [vmem:[#allocation57_spill] sm:$0xff]  ;;  %v8493_v53 = vld [vmem:[#allocation58_spill] sm:$0xff] }
 0x420   : > { %2431 = vmatpush1.msra.mxu1 %v6405_v4  ;;  %2502 = vmatpush1.msra.mxu0 %v8484_v27  ;;  %v8494_v4 = vld [vmem:[#allocation59_spill] sm:$0xff]  ;;  %v8495_v27 = vld [vmem:[#allocation60_spill] sm:$0xff] }
 0x421   : > { %2432 = vmatprep.subr.mxu1 %v8485_v49  ;;  %2503 = vmatprep.subr.mxu0 %v8486_v1  ;;  %v8496_v49 = vld [vmem:[#allocation61_spill] sm:$0xff]  ;;  %v8497_v1 = vld [vmem:[#allocation62_spill] sm:$0xff] }
 0x422   : > { %2433 = vmatpush1.msra.mxu1 %v8487_v7  ;;  %2504 = vmatpush1.msra.mxu0 %v8488_v6  ;;  %v8498_v7 = vld [vmem:[#allocation63_spill] sm:$0xff]  ;;  %v8499_v6 = vld [vmem:[#allocation64_spill] sm:$0xff] }
 0x423   : > { %2434 = vmatprep.subr.mxu1 %v8489_v61  ;;  %2505 = vmatprep.subr.mxu0 %v8490_v19  ;;  %v8500_v61 = vld [vmem:[#allocation65_spill] sm:$0xff]  ;;  %v8501_v19 = vld [vmem:[#allocation66_spill] sm:$0xff] }
 0x424   : > { %2435 = vmatpush1.msra.mxu1 %v8491_v57  ;;  %2506 = vmatpush1.msra.mxu0 %v8492_v14  ;;  %v8502_v57 = vld [vmem:[#allocation67_spill] sm:$0xff]  ;;  %v8503_v14 = vld [vmem:[#allocation68_spill] sm:$0xff] }
 0x425   : > { %2436 = vmatprep.subr.mxu1 %v8493_v53  ;;  %2507 = vmatprep.subr.mxu0 %v8494_v4  ;;  %v8504_v53 = vld [vmem:[#allocation69_spill] sm:$0xff]  ;;  %v8505_v4 = vld [vmem:[#allocation70_spill] sm:$0xff] }
 0x426   : > { %2437 = vmatpush1.msra.mxu1 %v8495_v27  ;;  %2508 = vmatpush1.msra.mxu0 %v8496_v49  ;;  %v8506_v27 = vld [vmem:[#allocation71_spill] sm:$0xff]  ;;  %v8507_v49 = vld [vmem:[#allocation72_spill] sm:$0xff] }
 0x427   : > { %2438 = vmatprep.subr.mxu1 %v8497_v1  ;;  %2509 = vmatprep.subr.mxu0 %v8498_v7  ;;  %v8508_v1 = vld [vmem:[#allocation73_spill] sm:$0xff] }
 0x428   : > { %2439 = vmatpush1.msra.mxu1 %v8499_v6  ;;  %2510 = vmatpush1.msra.mxu0 %v8500_v61  ;;  %v8509_v61 = vld [vmem:[#allocation74_spill] sm:$0xff] }
 0x429   : > { %2440 = vmatprep.subr.mxu1 %v8501_v19  ;;  %2511 = vmatprep.subr.mxu0 %v8502_v57  ;;  %v8510_v19 = vld [vmem:[#allocation75_spill] sm:$0xff] }
 0x42a   : > { %2441 = vmatpush1.msra.mxu1 %v8503_v14  ;;  %2512 = vmatpush1.msra.mxu0 %v8504_v53  ;;  %v8511_v14 = vld [vmem:[#allocation17_spill] sm:$0xff] }
 0x42b   : > { %2442 = vmatprep.subr.mxu1 %v8505_v4  ;;  %2513 = vmatprep.subr.mxu0 %v8506_v27  ;;  %v8512_v4 = vld [vmem:[#allocation19_spill] sm:$0xff] }
 0x42c   : > { %2443 = vmatpush1.msra.mxu1 %v8507_v49  ;;  %2514 = vmatpush1.msra.mxu0 %v8508_v1 }
 0x42d   : > { %2476 = vmatprep.mubr.f32.mxu1 %v8226_v28  ;;  %2547 = vmatprep.mubr.f32.mxu0 %v8226_v28 }
 0x42e   : > { %2587 = vmatprep.subr.mxu1 %v8509_v61  ;;  %2658 = vmatprep.subr.mxu0 %v8510_v19 }
 0x4ab   : > { %v2128_v57 = vpop.f32.mrf.mxu1  ;;  %v2199_v27 = vpop.f32.mrf.mxu0 }
 0x4ac   : > { %v2204_v6 = vadd.f32 %v2128_v57, %v8511_v14  ;;  %v2206_v18 = vadd.f32 %v2199_v27, %v8514_v0  ;;  %v8516_v0 = vld [vmem:[#allocation114_spill] sm:$0xff] }
 0x4ad   : > { %v2130_v53 = vpop.f32.mrf.mxu1  ;;  %v2201_v1 = vpop.f32.mrf.mxu0 }
 0x4ae   : > { %v4320_v7 = vmul.f32 -1.442695, %v2204_v6  ;;  %v2205_v16 = vadd.f32 %v2130_v53, %v8512_v4  ;;  %v2207_v8 = vadd.f32 %v2201_v1, %v8513_v52 }
 0x4b0   : > { %4581 = vpow2.f32 %v4320_v7  ;;  %v4321_v49 = vmul.f32 -1.442695, %v2205_v16  ;;  %v4322_v9 = vmul.f32 -1.442695, %v2207_v8  ;;  %v8515_v16 = vld [vmem:[#allocation112_spill] sm:$0xff] }
 0x4b2   : > { %4583 = vpow2.f32 %v4321_v49 }
 0x4b3   : > { %4585 = vtanh.f32 %v2206_v18 }
 0x4b4   : > { %4587 = vpow2.f32 %v4322_v9 }
 0x4bd   : > { %v4582_v61 = vpop.eup %4581 }
 0x4be   : > { %v2211_v12 = vadd.f32 1.0, %v4582_v61 }
 0x4bf   : > { %v4584_v19 = vpop.eup %4583 }
 0x4c0   : > { %4589 = vrcp.f32 %v2211_v12  ;;  %v2217_v14 = vadd.f32 1.0, %v4584_v19  ;;  %v4586_v6 = vpop.eup %4585 }
 0x4c1   : > { %v4588_v4 = vpop.eup %4587 }
 0x4c2   : > { %4591 = vrcp.f32 %v2217_v14  ;;  %v2224_v18 = vadd.f32 1.0, %v4588_v4  ;;  %v8517_v14 = vld [vmem:[#allocation115_spill] sm:$0xff] }
 0x4cc   : > { %v2303_v53 = vpop.f32.mrf.mxu1  ;;  %v2374_v9 = vpop.f32.mrf.mxu0 }
 0x4cd   : > { %v4590_v7 = vpop.eup %4589  ;;  %v2379_v57 = vadd.f32 %v2303_v53, %v8515_v16  ;;  %v8518_v53 = vld [vmem:[#allocation113_spill] sm:$0xff] }
 0x4ce   : > { %v2228_v49 = vmul.f32 %v4590_v7, %v4586_v6  ;;  %v2305_v2 = vpop.f32.mrf.mxu1  ;;  %v2376_v27 = vpop.f32.mrf.mxu0  ;;  %v2381_v7 = vadd.f32 %v2374_v9, %v8518_v53  ;;  %v8525_v53 = vld [vmem:[#allocation81_spill] sm:$0xff] }
 0x4cf   : > { %v4592_v52 = vpop.eup %4591  ;;  %v4323_v1 = vmul.f32 -1.442695, %v2379_v57  ;;  %v2380_v8 = vadd.f32 %v2305_v2, %v8516_v0  ;;  %v2382_v6 = vadd.f32 %v2376_v27, %v8517_v14  ;;  %v8523_v27 = vld [vmem:[#allocation79_spill] sm:$0xff] }
 0x4d0   : > { %v2227_v61 = vmul.f32 %v4592_v52, %v6498_v51 }
 0x4d1   : > { %4593 = vpow2.f32 %v4323_v1  ;;  %v4324_v12 = vmul.f32 -1.442695, %v2380_v8  ;;  %v4325_v16 = vmul.f32 -1.442695, %v2382_v6  ;;  %v8519_v1 = vld [vmem:[#allocation116_spill] sm:$0xff] }
 0x4d2   : > { %v6778_v19 = vadd.f32 %v2228_v49, %v2227_v61  ;;  %v1882_v0 = vmax.f32 %v8519_v1, %v6503_v22  ;;  %v8520_v22 = vld [vmem:[#allocation76_spill] sm:$0xff]  ;;  %v8530_v1 = vld [vmem:[#allocation122_spill] sm:$0xff] }
 0x4d3   : > { %4595 = vpow2.f32 %v4324_v12  ;;  %v8522_v12 = vld [vmem:[#allocation78_spill] sm:$0xff]  ;;  %v8524_v6 = vld [vmem:[#allocation80_spill] sm:$0xff] }
 0x4d4   : > { %4597 = vrcp.f32 %v2224_v18  ;;  %v8521_v18 = vld [vmem:[#allocation77_spill] sm:$0xff] }
 0x4d5   : > { %4599 = vtanh.f32 %v6778_v19 }
 0x4d6   : > { %4601 = vtanh.f32 %v2381_v7 }
 0x4d7   : > { %4603 = vpow2.f32 %v4325_v16  ;;  %v8526_v16 = vld [vmem:[#allocation117_spill] sm:$0xff] }
 0x4de   : > { %v4594_v57 = vpop.eup %4593 }
 0x4df   : > { %v2386_v2 = vadd.f32 1.0, %v4594_v57 }
 0x4e0   : > { %v4596_v51 = vpop.eup %4595 }
 0x4e1   : > { %v4598_v4 = vpop.eup %4597  ;;  %4605 = vrcp.f32 %v2386_v2  ;;  %v2392_v52 = vadd.f32 1.0, %v4596_v51  ;;  %v8527_v2 = vld [vmem:[#allocation119_spill] sm:$0xff]  ;;  %v8528_v51 = vld [vmem:[#allocation120_spill] sm:$0xff] }
 0x4e2   : > { %v4600_v49 = vpop.eup %4599 }
 0x4e3   : > { %4607 = vrcp.f32 %v2392_v52  ;;  %v2231_v8 = vmul.f32 %v4600_v49, %v4598_v4  ;;  %v4602_v9 = vpop.eup %4601  ;;  %v8529_v49 = vld [vmem:[#allocation121_spill] sm:$0xff] }
 0x4e4   : > { %v4604_v14 = vpop.eup %4603 }
 0x4e5   : > { %v6785_v61 = vmax.f32 %v1882_v0, %v2231_v8  ;;  %2477 = vmatmul.mubr.f32.vlgmr.msra.gmra.mxu1 %v2231_v8  ;;  %2548 = vmatmul.mubr.f32.vlgmr.msra.gmra.mxu0 %v2231_v8  ;;  %v2399_v52 = vadd.f32 1.0, %v4604_v14  ;;  %v8531_v8 = vld [vmem:[#allocation124_spill] sm:$0xff] }
 0x4e6   : > { %2588 = vmatpush1.msra.mxu1 %v6507_v35  ;;  %2659 = vmatpush1.msra.mxu0 %v6510_v26  ;;  %v8535_v14 = vld [vmem:[#allocation128_spill] sm:$0xff] }
 0x4e7   : > { %2589 = vmatprep.subr.mxu1 %v6513_v34  ;;  %2660 = vmatprep.subr.mxu0 %v6516_v63  ;;  %4609 = vrcp.f32 %v2399_v52  ;;  %v8544_v52 = vld [vmem:[#allocation137_spill] sm:$0xff] }
 0x4e8   : > { %2590 = vmatpush1.msra.mxu1 %v6519_v24  ;;  %2661 = vmatpush1.msra.mxu0 %v6522_v46 }
 0x4e9   : > { %2591 = vmatprep.subr.mxu1 %v6525_v55  ;;  %2662 = vmatprep.subr.mxu0 %v6528_v31 }
 0x4ea   : > { %2592 = vmatpush1.msra.mxu1 %v6531_v36  ;;  %2663 = vmatpush1.msra.mxu0 %v6534_v50 }
 0x4eb   : > { %2593 = vmatprep.subr.mxu1 %v8520_v22  ;;  %2664 = vmatprep.subr.mxu0 %v8521_v18 }
 0x4ec   : > { %2594 = vmatpush1.msra.mxu1 %v8522_v12  ;;  %2665 = vmatpush1.msra.mxu0 %v8523_v27 }
 0x4ed   : > { %2595 = vmatprep.subr.mxu1 %v8524_v6  ;;  %2666 = vmatprep.subr.mxu0 %v8525_v53 }
 0x4ee   : > { %v4606_v7 = vpop.eup %4605  ;;  %2596 = vmatpush1.msra.mxu1 %v8526_v16  ;;  %2667 = vmatpush1.msra.mxu0 %v6558_v32  ;;  %v8532_v32 = vld [vmem:[#allocation125_spill] sm:$0xff] }
 0x4ef   : > { %v2403_v57 = vmul.f32 %v4606_v7, %v4602_v9  ;;  %2597 = vmatprep.subr.mxu1 %v8527_v2  ;;  %2668 = vmatprep.subr.mxu0 %v8528_v51  ;;  %v8533_v7 = vld [vmem:[#allocation126_spill] sm:$0xff]  ;;  %v8534_v51 = vld [vmem:[#allocation127_spill] sm:$0xff] }
 0x4f0   : > { %v4608_v4 = vpop.eup %4607  ;;  %2598 = vmatpush1.msra.mxu1 %v8529_v49  ;;  %2669 = vmatpush1.msra.mxu0 %v8530_v1  ;;  %v8536_v1 = vld [vmem:[#allocation129_spill] sm:$0xff] }
 0x4f1   : > { %v2402_v0 = vmul.f32 %v4608_v4, %v6586_v10  ;;  %2599 = vmatprep.subr.mxu1 %v6574_v23  ;;  %2670 = vmatprep.subr.mxu0 %v6577_v20  ;;  %v8537_v10 = vld [vmem:[#allocation130_spill] sm:$0xff]  ;;  %v8538_v4 = vld [vmem:[#allocation131_spill] sm:$0xff]  ;;  %v8563_v20 = vld [vmem:[#allocation156_spill] sm:$0xff] }
 0x4f2   : > { %2600 = vmatpush1.msra.mxu1 %v8531_v8  ;;  %2671 = vmatpush1.msra.mxu0 %v8532_v32  ;;  %v8539_v8 = vld [vmem:[#allocation132_spill] sm:$0xff]  ;;  %v8540_v32 = vld [vmem:[#allocation133_spill] sm:$0xff] }
 0x4f3   : > { %v6814_v9 = vadd.f32 %v2403_v57, %v2402_v0  ;;  %2601 = vmatprep.subr.mxu1 %v8533_v7  ;;  %2672 = vmatprep.subr.mxu0 %v8534_v51  ;;  %v8541_v57 = vld [vmem:[#allocation134_spill] sm:$0xff]  ;;  %v8542_v0 = vld [vmem:[#allocation135_spill] sm:$0xff]  ;;  %v8543_v51 = vld [vmem:[#allocation136_spill] sm:$0xff] }
 0x4f4   : > { %2602 = vmatpush1.msra.mxu1 %v8535_v14  ;;  %2673 = vmatpush1.msra.mxu0 %v8536_v1  ;;  %v8545_v14 = vld [vmem:[#allocation138_spill] sm:$0xff]  ;;  %v8546_v1 = vld [vmem:[#allocation139_spill] sm:$0xff] }
 0x4f5   : > { %2603 = vmatprep.subr.mxu1 %v8537_v10  ;;  %2674 = vmatprep.subr.mxu0 %v8538_v4  ;;  %4611 = vtanh.f32 %v6814_v9  ;;  %v8547_v10 = vld [vmem:[#allocation140_spill] sm:$0xff]  ;;  %v8548_v4 = vld [vmem:[#allocation141_spill] sm:$0xff]  ;;  %v8549_v7 = vld [vmem:[#allocation142_spill] sm:$0xff] }
 0x4f6   : > { %2604 = vmatpush1.msra.mxu1 %v8539_v8  ;;  %2675 = vmatpush1.msra.mxu0 %v8540_v32  ;;  %v8550_v8 = vld [vmem:[#allocation143_spill] sm:$0xff]  ;;  %v8551_v32 = vld [vmem:[#allocation144_spill] sm:$0xff] }
 0x4f7   : > { %2605 = vmatprep.subr.mxu1 %v8541_v57  ;;  %2676 = vmatprep.subr.mxu0 %v8542_v0  ;;  %v8552_v57 = vld [vmem:[#allocation145_spill] sm:$0xff]  ;;  %v8553_v0 = vld [vmem:[#allocation146_spill] sm:$0xff] }
 0x4f8   : > { %2606 = vmatpush1.msra.mxu1 %v8543_v51  ;;  %2677 = vmatpush1.msra.mxu0 %v8544_v52  ;;  %v8554_v51 = vld [vmem:[#allocation147_spill] sm:$0xff]  ;;  %v8555_v52 = vld [vmem:[#allocation148_spill] sm:$0xff] }
 0x4f9   : > { %2607 = vmatprep.subr.mxu1 %v8545_v14  ;;  %2678 = vmatprep.subr.mxu0 %v8546_v1  ;;  %v8556_v14 = vld [vmem:[#allocation149_spill] sm:$0xff]  ;;  %v8557_v1 = vld [vmem:[#allocation150_spill] sm:$0xff] }
 0x4fa   : > { %2608 = vmatpush1.msra.mxu1 %v8547_v10  ;;  %2679 = vmatpush1.msra.mxu0 %v8548_v4  ;;  %v8558_v10 = vld [vmem:[#allocation151_spill] sm:$0xff]  ;;  %v8559_v4 = vld [vmem:[#allocation152_spill] sm:$0xff] }
 0x4fb   : > { %2609 = vmatprep.subr.mxu1 %v8549_v7  ;;  %2680 = vmatprep.subr.mxu0 %v8550_v8  ;;  %v8560_v7 = vld [vmem:[#allocation153_spill] sm:$0xff]  ;;  %v4610_v8 = vpop.eup %4609 }
 0x4fc   : > { %2610 = vmatpush1.msra.mxu1 %v8551_v32  ;;  %2681 = vmatpush1.msra.mxu0 %v8552_v57  ;;  %v8561_v32 = vld [vmem:[#allocation154_spill] sm:$0xff]  ;;  %v8562_v57 = vld [vmem:[#allocation155_spill] sm:$0xff] }
 0x4fd   : > { %2611 = vmatprep.subr.mxu1 %v8553_v0  ;;  %2682 = vmatprep.subr.mxu0 %v8554_v51 }
 0x4fe   : > { %2612 = vmatpush1.msra.mxu1 %v8555_v52  ;;  %2683 = vmatpush1.msra.mxu0 %v8556_v14  ;;  %v8564_v14 = vld [vmem:[#allocation31_spill] sm:$0xff] }
 0x4ff   : > { %2613 = vmatprep.subr.mxu1 %v8557_v1  ;;  %2684 = vmatprep.subr.mxu0 %v8558_v10  ;;  %v2057_v52 = vmax.f32 %v8564_v14, %v6691_v11  ;;  %v8587_v11 = vld [vmem:[#allocation54_spill] sm:$0xff]  ;;  %v8589_v14 = vld [vmem:[#allocation56_spill] sm:$0xff] }
 0x500   : > { %2614 = vmatpush1.msra.mxu1 %v8559_v4  ;;  %2685 = vmatpush1.msra.mxu0 %v8560_v7 }
 0x501   : > { %2615 = vmatprep.subr.mxu1 %v8561_v32  ;;  %2686 = vmatprep.subr.mxu0 %v8562_v57 }
 0x502   : > { %v4612_v0 = vpop.eup %4611  ;;  %2616 = vmatpush1.msra.mxu1 %v8563_v20  ;;  %2687 = vmatpush1.msra.mxu0 %v6682_v13 }
 0x503   : > { %2617 = vmatprep.subr.mxu1 %v6685_v25  ;;  %2688 = vmatprep.subr.mxu0 %v6688_v62  ;;  %v2406_v4 = vmul.f32 %v4612_v0, %v4610_v8  ;;  %v8588_v8 = vld [vmem:[#allocation55_spill] sm:$0xff]  ;;  %v8591_v0 = vld [vmem:[#allocation58_spill] sm:$0xff] }
 0x504   : > { %2618 = vmatpush1.msra.mxu1 %v6693_v17  ;;  %2651 = vmatprep.mubr.f32.mxu1 %v8226_v28 }
 0x505   : > { %2689 = vmatpush1.msra.mxu0 %v6697_v15  ;;  %2722 = vmatprep.mubr.f32.mxu0 %v8226_v28  ;;  %v6857_v57 = vmax.f32 %v2057_v52, %v2406_v4  ;;  %v8592_v52 = vld [vmem:[#allocation59_spill] sm:$0xff] }
 0x506   : > { %2652 = vmatmul.mubr.f32.vlgmr.msra.gmra.mxu1 %v2406_v4  ;;  %2723 = vmatmul.mubr.f32.vlgmr.msra.gmra.mxu0 %v2406_v4  ;;  %v8590_v4 = vld [vmem:[#allocation57_spill] sm:$0xff] }
 0x507   : > { %2762 = vmatprep.subr.mxu1 %v6291_v56  ;;  %2833 = vmatprep.subr.mxu0 %v6294_v40  ;;  %v8565_v56 = vld [vmem:[#allocation32_spill] sm:$0xff]  ;;  %v8566_v40 = vld [vmem:[#allocation33_spill] sm:$0xff] }
 0x508   : > { %2763 = vmatpush1.msra.mxu1 %v6297_v41  ;;  %2834 = vmatpush1.msra.mxu0 %v6300_v43  ;;  %v8567_v41 = vld [vmem:[#allocation34_spill] sm:$0xff]  ;;  %v8568_v43 = vld [vmem:[#allocation35_spill] sm:$0xff] }
 0x509   : > { %2764 = vmatprep.subr.mxu1 %v6303_v38  ;;  %2835 = vmatprep.subr.mxu0 %v6306_v44  ;;  %v8569_v38 = vld [vmem:[#allocation36_spill] sm:$0xff]  ;;  %v8570_v44 = vld [vmem:[#allocation37_spill] sm:$0xff] }
 0x50a   : > { %2765 = vmatpush1.msra.mxu1 %v6309_v45  ;;  %2836 = vmatpush1.msra.mxu0 %v6312_v33  ;;  %v8571_v45 = vld [vmem:[#allocation38_spill] sm:$0xff]  ;;  %v8572_v33 = vld [vmem:[#allocation39_spill] sm:$0xff] }
 0x50b   : > { %2766 = vmatprep.subr.mxu1 %v6315_v47  ;;  %2837 = vmatprep.subr.mxu0 %v6318_v48  ;;  %v8573_v47 = vld [vmem:[#allocation40_spill] sm:$0xff]  ;;  %v8574_v48 = vld [vmem:[#allocation41_spill] sm:$0xff] }
 0x50c   : > { %2767 = vmatpush1.msra.mxu1 %v6321_v59  ;;  %2838 = vmatpush1.msra.mxu0 %v6324_v3  ;;  %v8575_v59 = vld [vmem:[#allocation42_spill] sm:$0xff]  ;;  %v8576_v3 = vld [vmem:[#allocation43_spill] sm:$0xff] }
 0x50d   : > { %2768 = vmatprep.subr.mxu1 %v6327_v54  ;;  %2839 = vmatprep.subr.mxu0 %v6330_v42  ;;  %v8577_v54 = vld [vmem:[#allocation44_spill] sm:$0xff]  ;;  %v8578_v42 = vld [vmem:[#allocation45_spill] sm:$0xff] }
 0x50e   : > { %2769 = vmatpush1.msra.mxu1 %v6333_v58  ;;  %2840 = vmatpush1.msra.mxu0 %v6336_v60  ;;  %v8579_v58 = vld [vmem:[#allocation46_spill] sm:$0xff]  ;;  %v8580_v60 = vld [vmem:[#allocation47_spill] sm:$0xff] }
 0x50f   : > { %2770 = vmatprep.subr.mxu1 %v6339_v21  ;;  %2841 = vmatprep.subr.mxu0 %v6342_v39  ;;  %v8581_v21 = vld [vmem:[#allocation48_spill] sm:$0xff]  ;;  %v8582_v39 = vld [vmem:[#allocation49_spill] sm:$0xff] }
 0x510   : > { %2771 = vmatpush1.msra.mxu1 %v6345_v5  ;;  %2842 = vmatpush1.msra.mxu0 %v6348_v37  ;;  %v8583_v5 = vld [vmem:[#allocation50_spill] sm:$0xff]  ;;  %v8584_v37 = vld [vmem:[#allocation51_spill] sm:$0xff] }
 0x511   : > { %2772 = vmatprep.subr.mxu1 %v6351_v30  ;;  %2843 = vmatprep.subr.mxu0 %v6354_v29  ;;  %v8585_v30 = vld [vmem:[#allocation52_spill] sm:$0xff]  ;;  %v8586_v29 = vld [vmem:[#allocation53_spill] sm:$0xff] }
 0x512   : > { %2773 = vmatpush1.msra.mxu1 %v8565_v56  ;;  %2844 = vmatpush1.msra.mxu0 %v8566_v40  ;;  %v8593_v56 = vld [vmem:[#allocation60_spill] sm:$0xff]  ;;  %v8594_v40 = vld [vmem:[#allocation61_spill] sm:$0xff] }
 0x513   : > { %2774 = vmatprep.subr.mxu1 %v8567_v41  ;;  %2845 = vmatprep.subr.mxu0 %v8568_v43  ;;  %v8595_v41 = vld [vmem:[#allocation62_spill] sm:$0xff]  ;;  %v8596_v43 = vld [vmem:[#allocation63_spill] sm:$0xff] }
 0x514   : > { %2775 = vmatpush1.msra.mxu1 %v8569_v38  ;;  %2846 = vmatpush1.msra.mxu0 %v8570_v44  ;;  %v8597_v38 = vld [vmem:[#allocation64_spill] sm:$0xff]  ;;  %v8598_v44 = vld [vmem:[#allocation65_spill] sm:$0xff] }
 0x515   : > { %2776 = vmatprep.subr.mxu1 %v8571_v45  ;;  %2847 = vmatprep.subr.mxu0 %v8572_v33  ;;  %v8599_v45 = vld [vmem:[#allocation66_spill] sm:$0xff]  ;;  %v8600_v33 = vld [vmem:[#allocation67_spill] sm:$0xff] }
 0x516   : > { %2777 = vmatpush1.msra.mxu1 %v8573_v47  ;;  %2848 = vmatpush1.msra.mxu0 %v8574_v48  ;;  %v8601_v47 = vld [vmem:[#allocation68_spill] sm:$0xff]  ;;  %v8602_v48 = vld [vmem:[#allocation69_spill] sm:$0xff] }
 0x517   : > { %2778 = vmatprep.subr.mxu1 %v8575_v59  ;;  %2849 = vmatprep.subr.mxu0 %v8576_v3  ;;  %v8603_v59 = vld [vmem:[#allocation70_spill] sm:$0xff]  ;;  %v8604_v3 = vld [vmem:[#allocation71_spill] sm:$0xff] }
 0x518   : > { %2779 = vmatpush1.msra.mxu1 %v8577_v54  ;;  %2850 = vmatpush1.msra.mxu0 %v8578_v42  ;;  %v8605_v54 = vld [vmem:[#allocation72_spill] sm:$0xff]  ;;  %v8606_v42 = vld [vmem:[#allocation73_spill] sm:$0xff] }
 0x519   : > { %2780 = vmatprep.subr.mxu1 %v8579_v58  ;;  %2851 = vmatprep.subr.mxu0 %v8580_v60  ;;  %v8607_v58 = vld [vmem:[#allocation74_spill] sm:$0xff]  ;;  %v8608_v60 = vld [vmem:[#allocation75_spill] sm:$0xff] }
 0x51a   : > { %2781 = vmatpush1.msra.mxu1 %v8581_v21  ;;  %2852 = vmatpush1.msra.mxu0 %v8582_v39  ;;  %v8609_v39 = vld [vmem:[#allocation21_spill] sm:$0xff] }
 0x51b   : > { %2782 = vmatprep.subr.mxu1 %v8583_v5  ;;  %2853 = vmatprep.subr.mxu0 %v8584_v37 }
 0x51c   : > { %2783 = vmatpush1.msra.mxu1 %v8585_v30  ;;  %2854 = vmatpush1.msra.mxu0 %v8586_v29  ;;  %v8610_v29 = vld [vmem:[#allocation23_spill] sm:$0xff] }
 0x51d   : > { %2784 = vmatprep.subr.mxu1 %v8587_v11  ;;  %2855 = vmatprep.subr.mxu0 %v8588_v8 }
 0x51e   : > { %2785 = vmatpush1.msra.mxu1 %v8589_v14  ;;  %2856 = vmatpush1.msra.mxu0 %v8590_v4 }
 0x51f   : > { %2786 = vmatprep.subr.mxu1 %v8591_v0  ;;  %2857 = vmatprep.subr.mxu0 %v8592_v52  ;;  %v8611_v0 = vld [vmem:[#allocation24_spill] sm:$0xff] }
 0x520   : > { %2787 = vmatpush1.msra.mxu1 %v8593_v56  ;;  %2858 = vmatpush1.msra.mxu0 %v8594_v40  ;;  %v8612_v56 = vld [vmem:[#allocation22_spill] sm:$0xff] }
 0x521   : > { %2788 = vmatprep.subr.mxu1 %v8595_v41  ;;  %2859 = vmatprep.subr.mxu0 %v8596_v43 }
 0x522   : > { %2789 = vmatpush1.msra.mxu1 %v8597_v38  ;;  %2860 = vmatpush1.msra.mxu0 %v8598_v44 }
 0x523   : > { %2790 = vmatprep.subr.mxu1 %v8599_v45  ;;  %2861 = vmatprep.subr.mxu0 %v8600_v33 }
 0x524   : > { %2791 = vmatpush1.msra.mxu1 %v8601_v47  ;;  %2862 = vmatpush1.msra.mxu0 %v8602_v48 }
 0x525   : > { %2792 = vmatprep.subr.mxu1 %v8603_v59  ;;  %2863 = vmatprep.subr.mxu0 %v8604_v3  ;;  %v8613_v3 = vld [vmem:[#allocation108_spill] sm:$0xff] }
 0x526   : > { %2793 = vmatpush1.msra.mxu1 %v8605_v54  ;;  %2864 = vmatpush1.msra.mxu0 %v8606_v42 }
 0x527   : > { %2826 = vmatprep.mubr.f32.mxu1 %v8226_v28  ;;  %2897 = vmatprep.mubr.f32.mxu0 %v8226_v28 }
 0x528   : > { %2937 = vmatprep.subr.mxu1 %v8607_v58  ;;  %3008 = vmatprep.subr.mxu0 %v8608_v60 }
 0x5a5   : > { %v2478_v21 = vpop.f32.mrf.mxu1  ;;  %v2549_v8 = vpop.f32.mrf.mxu0 }
 0x5a6   : > { %v2554_v5 = vadd.f32 %v2478_v21, %v8609_v39  ;;  %v2556_v40 = vadd.f32 %v2549_v8, %v8612_v56  ;;  %v8614_v39 = vld [vmem:[#allocation110_spill] sm:$0xff] }
 0x5a7   : > { %v2480_v37 = vpop.f32.mrf.mxu1  ;;  %v2551_v4 = vpop.f32.mrf.mxu0 }
 0x5a8   : > { %v4326_v30 = vmul.f32 -1.442695, %v2554_v5  ;;  %v2555_v11 = vadd.f32 %v2480_v37, %v8610_v29  ;;  %v2557_v52 = vadd.f32 %v2551_v4, %v8611_v0  ;;  %v8615_v4 = vld [vmem:[#allocation111_spill] sm:$0xff] }
 0x5aa   : > { %4613 = vpow2.f32 %v4326_v30  ;;  %v4327_v14 = vmul.f32 -1.442695, %v2555_v11  ;;  %v4328_v41 = vmul.f32 -1.442695, %v2557_v52  ;;  %v8616_v52 = vld [vmem:[#allocation109_spill] sm:$0xff] }
 0x5ac   : > { %4615 = vpow2.f32 %v4327_v14 }
 0x5ad   : > { %4617 = vtanh.f32 %v2556_v40 }
 0x5ae   : > { %4619 = vpow2.f32 %v4328_v41 }
 0x5b7   : > { %v4614_v43 = vpop.eup %4613 }
 0x5b8   : > { %v2561_v38 = vadd.f32 1.0, %v4614_v43 }
 0x5b9   : > { %v4616_v44 = vpop.eup %4615 }
 0x5ba   : > { %4621 = vrcp.f32 %v2561_v38  ;;  %v2567_v45 = vadd.f32 1.0, %v4616_v44  ;;  %v4618_v33 = vpop.eup %4617 }
 0x5bb   : > { %v4620_v47 = vpop.eup %4619 }
 0x5bc   : > { %4623 = vrcp.f32 %v2567_v45  ;;  %v2574_v30 = vadd.f32 1.0, %v4620_v47  ;;  %v7187_v47 = vld [vmem:[#allocation7 + $0x28] sm:$0xff] }
 0x5bd   : > { %8679 = vst [vmem:[#allocation38_spill] sm:$0xff] %v7187_v47 }
 0x5c6   : > { %v2653_v48 = vpop.f32.mrf.mxu1  ;;  %v2724_v29 = vpop.f32.mrf.mxu0 }
 0x5c7   : > { %v4622_v59 = vpop.eup %4621  ;;  %v2729_v54 = vadd.f32 %v2653_v48, %v8613_v3  ;;  %v2731_v56 = vadd.f32 %v2724_v29, %v8616_v52  ;;  %v8630_v48 = vld [vmem:[#allocation133_spill] sm:$0xff]  ;;  %v8632_v3 = vld [vmem:[#allocation135_spill] sm:$0xff] }
 0x5c8   : > { %v2578_v42 = vmul.f32 %v4622_v59, %v4618_v33  ;;  %v2655_v58 = vpop.f32.mrf.mxu1  ;;  %v2726_v14 = vpop.f32.mrf.mxu0  ;;  %v8631_v59 = vld [vmem:[#allocation134_spill] sm:$0xff]  ;;  %v8642_v29 = vld [vmem:[#allocation145_spill] sm:$0xff] }
 0x5c9   : > { %v4624_v60 = vpop.eup %4623  ;;  %v4329_v21 = vmul.f32 -1.442695, %v2729_v54  ;;  %v2730_v5 = vadd.f32 %v2655_v58, %v8614_v39  ;;  %v2732_v0 = vadd.f32 %v2726_v14, %v8615_v4  ;;  %v8633_v54 = vld [vmem:[#allocation136_spill] sm:$0xff]  ;;  %v8635_v58 = vld [vmem:[#allocation138_spill] sm:$0xff]  ;;  %v8638_v39 = vld [vmem:[#allocation141_spill] sm:$0xff] }
 0x5ca   : > { %v2577_v37 = vmul.f32 %v4624_v60, %v6778_v19  ;;  %v8636_v60 = vld [vmem:[#allocation139_spill] sm:$0xff]  ;;  %v8644_v14 = vld [vmem:[#allocation148_spill] sm:$0xff]  ;;  %v8645_v4 = vld [vmem:[#allocation149_spill] sm:$0xff] }
 0x5cb   : > { %4625 = vpow2.f32 %v4329_v21  ;;  %v4330_v11 = vmul.f32 -1.442695, %v2730_v5  ;;  %v4331_v40 = vmul.f32 -1.442695, %v2732_v0  ;;  %v8637_v21 = vld [vmem:[#allocation140_spill] sm:$0xff]  ;;  %v8639_v5 = vld [vmem:[#allocation142_spill] sm:$0xff] }
 0x5cc   : > { %v6934_v8 = vadd.f32 %v2578_v42, %v2577_v37  ;;  %v8634_v42 = vld [vmem:[#allocation137_spill] sm:$0xff]  ;;  %v8640_v37 = vld [vmem:[#allocation143_spill] sm:$0xff]  ;;  %v8646_v0 = vld [vmem:[#allocation152_spill] sm:$0xff] }
 0x5cd   : > { %4627 = vpow2.f32 %v4330_v11  ;;  %v8643_v11 = vld [vmem:[#allocation146_spill] sm:$0xff] }
 0x5ce   : > { %4629 = vrcp.f32 %v2574_v30  ;;  %v8641_v30 = vld [vmem:[#allocation144_spill] sm:$0xff] }
 0x5cf   : > { %4631 = vtanh.f32 %v6934_v8 }
 0x5d0   : > { %4633 = vtanh.f32 %v2731_v56  ;;  %v8647_v56 = vld [vmem:[#allocation155_spill] sm:$0xff] }
 0x5d1   : > { %4635 = vpow2.f32 %v4331_v40 }
 0x5d8   : > { %v4626_v41 = vpop.eup %4625 }
 0x5d9   : > { %v2736_v43 = vadd.f32 1.0, %v4626_v41  ;;  %v7046_v41 = vld [vmem:[#allocation7 + $0x1b8] sm:$0xff] }
 0x5da   : > { %v4628_v19 = vpop.eup %4627 }
 0x5db   : > { %v4630_v38 = vpop.eup %4629  ;;  %4637 = vrcp.f32 %v2736_v43  ;;  %v2742_v44 = vadd.f32 1.0, %v4628_v19  ;;  %v7049_v43 = vld [vmem:[#allocation7 + $0x1a0] sm:$0xff]  ;;  %v7052_v19 = vld [vmem:[#allocation7 + $0x1b0] sm:$0xff] }
 0x5dc   : > { %v4632_v45 = vpop.eup %4631 }
 0x5dd   : > { %4639 = vrcp.f32 %v2742_v44  ;;  %v6939_v33 = vmul.f32 %v4632_v45, %v4630_v38  ;;  %v7055_v38 = vld [vmem:[#allocation7 + $0x188] sm:$0xff]  ;;  %v7058_v44 = vld [vmem:[#allocation7 + $0x198] sm:$0xff]  ;;  %v7061_v45 = vld [vmem:[#allocation7 + $0x180] sm:$0xff] }
 0x5df   : > { %2827 = vmatmul.mubr.f32.vlgmr.msra.gmra.mxu1 %v6939_v33  ;;  %2898 = vmatmul.mubr.f32.vlgmr.msra.gmra.mxu0 %v6939_v33 }
 0x5e0   : > { %2938 = vmatpush1.msra.mxu1 %v6507_v35  ;;  %3009 = vmatpush1.msra.mxu0 %v6510_v26  ;;  %v4634_v35 = vpop.eup %4633 }
 0x5e1   : > { %2939 = vmatprep.subr.mxu1 %v6513_v34  ;;  %3010 = vmatprep.subr.mxu0 %v6516_v63  ;;  %v4636_v26 = vpop.eup %4635  ;;  %v8617_v63 = vld [vmem:[#allocation118_spill] sm:$0xff] }
 0x5e2   : > { %2940 = vmatpush1.msra.mxu1 %v6519_v24  ;;  %3011 = vmatpush1.msra.mxu0 %v6522_v46  ;;  %v8618_v46 = vld [vmem:[#allocation120_spill] sm:$0xff] }
 0x5e3   : > { %2941 = vmatprep.subr.mxu1 %v6525_v55  ;;  %3012 = vmatprep.subr.mxu0 %v6528_v31  ;;  %v2749_v31 = vadd.f32 1.0, %v4636_v26  ;;  %v7067_v26 = vld [vmem:[#allocation7 + $0x168] sm:$0xff] }
 0x5e4   : > { %2942 = vmatpush1.msra.mxu1 %v6531_v36  ;;  %3013 = vmatpush1.msra.mxu0 %v6534_v50  ;;  %v8619_v36 = vld [vmem:[#allocation122_spill] sm:$0xff] }
 0x5e5   : > { %2943 = vmatprep.subr.mxu1 %v8520_v22  ;;  %3014 = vmatprep.subr.mxu0 %v8521_v18  ;;  %v8620_v22 = vld [vmem:[#allocation123_spill] sm:$0xff]  ;;  %v8621_v18 = vld [vmem:[#allocation124_spill] sm:$0xff]  ;;  %4641 = vrcp.f32 %v2749_v31  ;;  %v7085_v31 = vld [vmem:[#allocation7 + $0x140] sm:$0xff] }
 0x5e6   : > { %2944 = vmatpush1.msra.mxu1 %v8522_v12  ;;  %3015 = vmatpush1.msra.mxu0 %v8523_v27  ;;  %v8622_v12 = vld [vmem:[#allocation125_spill] sm:$0xff] }
 0x5e7   : > { %2945 = vmatprep.subr.mxu1 %v8524_v6  ;;  %3016 = vmatprep.subr.mxu0 %v8525_v53  ;;  %v8623_v6 = vld [vmem:[#allocation126_spill] sm:$0xff]  ;;  %v8624_v53 = vld [vmem:[#allocation127_spill] sm:$0xff] }
 0x5e8   : > { %v4638_v34 = vpop.eup %4637  ;;  %2946 = vmatpush1.msra.mxu1 %v8526_v16  ;;  %3017 = vmatpush1.msra.mxu0 %v8617_v63  ;;  %v8625_v16 = vld [vmem:[#allocation128_spill] sm:$0xff]  ;;  %v7073_v63 = vld [vmem:[#allocation7 + $0x160] sm:$0xff] }
 0x5e9   : > { %v2753_v24 = vmul.f32 %v4638_v34, %v4634_v35  ;;  %2947 = vmatprep.subr.mxu1 %v8527_v2  ;;  %3018 = vmatprep.subr.mxu0 %v8618_v46  ;;  %v8626_v2 = vld [vmem:[#allocation129_spill] sm:$0xff]  ;;  %v7064_v35 = vld [vmem:[#allocation7 + $0x190] sm:$0xff]  ;;  %v7070_v34 = vld [vmem:[#allocation7 + $0x178] sm:$0xff] }
 0x5ea   : > { %v4640_v55 = vpop.eup %4639  ;;  %2948 = vmatpush1.msra.mxu1 %v8529_v49  ;;  %3019 = vmatpush1.msra.mxu0 %v8619_v36  ;;  %v8627_v49 = vld [vmem:[#allocation130_spill] sm:$0xff]  ;;  %v7088_v36 = vld [vmem:[#allocation7 + $0x150] sm:$0xff] }
 0x5eb   : > { %v2752_v50 = vmul.f32 %v4640_v55, %v6814_v9  ;;  %2949 = vmatprep.subr.mxu1 %v6574_v23  ;;  %3020 = vmatprep.subr.mxu0 %v8620_v22  ;;  %v8628_v23 = vld [vmem:[#allocation131_spill] sm:$0xff]  ;;  %v8629_v9 = vld [vmem:[#allocation132_spill] sm:$0xff]  ;;  %v7079_v46 = vld [vmem:[#allocation7 + $0x148] sm:$0xff] }
 0x5ec   : > { %2950 = vmatpush1.msra.mxu1 %v8621_v18  ;;  %3021 = vmatpush1.msra.mxu0 %v8622_v12  ;;  %v7082_v55 = vld [vmem:[#allocation7 + $0x158] sm:$0xff]  ;;  %v7097_v18 = vld [vmem:[#allocation7 + $0x120] sm:$0xff]  ;;  %v7100_v12 = vld [vmem:[#allocation7 + $0x130] sm:$0xff] }
 0x5ed   : > { %v6972_v27 = vadd.f32 %v2753_v24, %v2752_v50  ;;  %2951 = vmatprep.subr.mxu1 %v8623_v6  ;;  %3022 = vmatprep.subr.mxu0 %v8624_v53  ;;  %v7076_v24 = vld [vmem:[#allocation7 + $0x170] sm:$0xff]  ;;  %v7091_v50 = vld [vmem:[#allocation7 + $0x128] sm:$0xff]  ;;  %v7094_v22 = vld [vmem:[#allocation7 + $0x138] sm:$0xff]  ;;  %8649 = vst [vmem:[#allocation19_spill] sm:$0xff] %v7097_v18 }
 0x5ee   : > { %2952 = vmatpush1.msra.mxu1 %v8625_v16  ;;  %3023 = vmatpush1.msra.mxu0 %v8626_v2  ;;  %8648 = vst [vmem:[#allocation17_spill] sm:$0xff] %v7094_v22  ;;  %8650 = vst [vmem:[#allocation20_spill] sm:$0xff] %v7100_v12  ;;  %v7103_v6 = vld [vmem:[#allocation7 + $0x108] sm:$0xff]  ;;  %v7106_v53 = vld [vmem:[#allocation7 + $0x118] sm:$0xff] }
 0x5ef   : > { %2953 = vmatprep.subr.mxu1 %v8627_v49  ;;  %3024 = vmatprep.subr.mxu0 %v8628_v23  ;;  %4643 = vtanh.f32 %v6972_v27  ;;  %8651 = vst [vmem:[#allocation18_spill] sm:$0xff] %v7103_v6  ;;  %8652 = vst [vmem:[#allocation112_spill] sm:$0xff] %v7106_v53  ;;  %v7109_v16 = vld [vmem:[#allocation7 + $0x100] sm:$0xff]  ;;  %v7112_v2 = vld [vmem:[#allocation7 + $0x110] sm:$0xff] }
 0x5f0   : > { %2954 = vmatpush1.msra.mxu1 %v8629_v9  ;;  %3025 = vmatpush1.msra.mxu0 %v8630_v48  ;;  %8653 = vst [vmem:[#allocation114_spill] sm:$0xff] %v7109_v16  ;;  %8654 = vst [vmem:[#allocation115_spill] sm:$0xff] %v7112_v2  ;;  %v7115_v49 = vld [vmem:[#allocation7 + $0xe8] sm:$0xff]  ;;  %v7118_v23 = vld [vmem:[#allocation7 + $0xf8] sm:$0xff] }
 0x5f1   : > { %2955 = vmatprep.subr.mxu1 %v8631_v59  ;;  %3026 = vmatprep.subr.mxu0 %v8632_v3  ;;  %8655 = vst [vmem:[#allocation113_spill] sm:$0xff] %v7115_v49  ;;  %8656 = vst [vmem:[#allocation116_spill] sm:$0xff] %v7118_v23  ;;  %v7121_v9 = vld [vmem:[#allocation7 + $0xe0] sm:$0xff]  ;;  %v7124_v48 = vld [vmem:[#allocation7 + $0xf0] sm:$0xff] }
 0x5f2   : > { %2956 = vmatpush1.msra.mxu1 %v8633_v54  ;;  %3027 = vmatpush1.msra.mxu0 %v8634_v42  ;;  %v4642_v52 = vpop.eup %4641  ;;  %8657 = vst [vmem:[#allocation76_spill] sm:$0xff] %v7121_v9  ;;  %8658 = vst [vmem:[#allocation77_spill] sm:$0xff] %v7124_v48  ;;  %v7127_v59 = vld [vmem:[#allocation7 + $0xc8] sm:$0xff]  ;;  %v7130_v3 = vld [vmem:[#allocation7 + $0xd8] sm:$0xff] }
 0x5f3   : > { %2957 = vmatprep.subr.mxu1 %v8635_v58  ;;  %3028 = vmatprep.subr.mxu0 %v8636_v60  ;;  %8659 = vst [vmem:[#allocation78_spill] sm:$0xff] %v7127_v59  ;;  %8660 = vst [vmem:[#allocation79_spill] sm:$0xff] %v7130_v3  ;;  %v7133_v54 = vld [vmem:[#allocation7 + $0xc0] sm:$0xff]  ;;  %v7136_v42 = vld [vmem:[#allocation7 + $0xd0] sm:$0xff] }
 0x5f4   : > { %2958 = vmatpush1.msra.mxu1 %v8637_v21  ;;  %3029 = vmatpush1.msra.mxu0 %v8638_v39  ;;  %8661 = vst [vmem:[#allocation80_spill] sm:$0xff] %v7133_v54  ;;  %8662 = vst [vmem:[#allocation81_spill] sm:$0xff] %v7136_v42  ;;  %v7139_v58 = vld [vmem:[#allocation7 + $0xa8] sm:$0xff]  ;;  %v7142_v60 = vld [vmem:[#allocation7 + $0xb8] sm:$0xff] }
 0x5f5   : > { %2959 = vmatprep.subr.mxu1 %v8639_v5  ;;  %3030 = vmatprep.subr.mxu0 %v8640_v37  ;;  %8663 = vst [vmem:[#allocation117_spill] sm:$0xff] %v7139_v58  ;;  %8664 = vst [vmem:[#allocation119_spill] sm:$0xff] %v7142_v60  ;;  %v7145_v21 = vld [vmem:[#allocation7 + $0xa0] sm:$0xff]  ;;  %v7148_v39 = vld [vmem:[#allocation7 + $0xb0] sm:$0xff] }
 0x5f6   : > { %2960 = vmatpush1.msra.mxu1 %v8641_v30  ;;  %3031 = vmatpush1.msra.mxu0 %v8642_v29  ;;  %8665 = vst [vmem:[#allocation121_spill] sm:$0xff] %v7145_v21  ;;  %8666 = vst [vmem:[#allocation147_spill] sm:$0xff] %v7148_v39  ;;  %v7151_v5 = vld [vmem:[#allocation7 + $0x88] sm:$0xff]  ;;  %v7154_v37 = vld [vmem:[#allocation7 + $0x98] sm:$0xff] }
 0x5f7   : > { %2961 = vmatprep.subr.mxu1 %v8643_v11  ;;  %3032 = vmatprep.subr.mxu0 %v8554_v51  ;;  %8667 = vst [vmem:[#allocation150_spill] sm:$0xff] %v7151_v5  ;;  %8668 = vst [vmem:[#allocation151_spill] sm:$0xff] %v7154_v37  ;;  %v7157_v30 = vld [vmem:[#allocation7 + $0x80] sm:$0xff]  ;;  %v7160_v29 = vld [vmem:[#allocation7 + $0x90] sm:$0xff] }
 0x5f8   : > { %2962 = vmatpush1.msra.mxu1 %v8644_v14  ;;  %3033 = vmatpush1.msra.mxu0 %v8645_v4  ;;  %8669 = vst [vmem:[#allocation153_spill] sm:$0xff] %v7157_v30  ;;  %8670 = vst [vmem:[#allocation154_spill] sm:$0xff] %v7160_v29  ;;  %v7163_v11 = vld [vmem:[#allocation7 + $0x68] sm:$0xff]  ;;  %v7166_v14 = vld [vmem:[#allocation7 + $0x78] sm:$0xff] }
 0x5f9   : > { %2963 = vmatprep.subr.mxu1 %v8557_v1  ;;  %3034 = vmatprep.subr.mxu0 %v8558_v10  ;;  %v7037_v1 = vld [vmem:[#allocation7 + $0x1c0] sm:$0xff]  ;;  %v7043_v10 = vld [vmem:[#allocation7 + $0x1a8] sm:$0xff]  ;;  %8671 = vst [vmem:[#allocation156_spill] sm:$0xff] %v7163_v11  ;;  %8672 = vst [vmem:[#allocation31_spill] sm:$0xff] %v7166_v14 }
 0x5fa   : > { %2964 = vmatpush1.msra.mxu1 %v8646_v0  ;;  %3035 = vmatpush1.msra.mxu0 %v8560_v7  ;;  %v7040_v7 = vld [vmem:[#allocation7 + $0x1d0] sm:$0xff]  ;;  %v7169_v4 = vld [vmem:[#allocation7 + $0x60] sm:$0xff] }
 0x5fb   : > { %2965 = vmatprep.subr.mxu1 %v8561_v32  ;;  %3036 = vmatprep.subr.mxu0 %v8647_v56  ;;  %8673 = vst [vmem:[#allocation32_spill] sm:$0xff] %v7169_v4  ;;  %v7172_v0 = vld [vmem:[#allocation7 + $0x70] sm:$0xff]  ;;  %v7178_v56 = vld [vmem:[#allocation7 + $0x58] sm:$0xff] }
 0x5fc   : > { %v4644_v40 = vpop.eup %4643  ;;  %2966 = vmatpush1.msra.mxu1 %v8563_v20  ;;  %3037 = vmatpush1.msra.mxu0 %v6682_v13  ;;  %v7019_v20 = vld [vmem:[#allocation7 + $0x1e8] sm:$0xff]  ;;  %v7034_v13 = vld [vmem:[#allocation7 + $0x1d8] sm:$0xff]  ;;  %8674 = vst [vmem:[#allocation33_spill] sm:$0xff] %v7172_v0  ;;  %8676 = vst [vmem:[#allocation35_spill] sm:$0xff] %v7178_v56 }
 0x5fd   : > { %2967 = vmatprep.subr.mxu1 %v6685_v25  ;;  %3038 = vmatprep.subr.mxu0 %v6688_v62  ;;  %v7009_v51 = vmul.f32 %v4644_v40, %v4642_v52  ;;  %v7022_v62 = vld [vmem:[#allocation7 + $0x1f8] sm:$0xff]  ;;  %v7025_v25 = vld [vmem:[#allocation7 + $0x1e0] sm:$0xff]  ;;  %v7175_v52 = vld [vmem:[#allocation7 + $0x48] sm:$0xff] }
 0x5fe   : > { %2968 = vmatpush1.msra.mxu1 %v6693_v17  ;;  %3001 = vmatprep.mubr.f32.mxu1 %v8226_v28  ;;  %v7031_v17 = vld [vmem:[#allocation7 + $0x1c8] sm:$0xff]  ;;  %8675 = vst [vmem:[#allocation34_spill] sm:$0xff] %v7175_v52  ;;  %v7181_v40 = vld [vmem:[#allocation7 + $0x40] sm:$0xff]  ;;  %v7184_v32 = vld [vmem:[#allocation7 + $0x50] sm:$0xff] }
 0x5ff   : > { %3039 = vmatpush1.msra.mxu0 %v6697_v15  ;;  %3072 = vmatprep.mubr.f32.mxu0 %v8226_v28  ;;  %v7028_v15 = vld [vmem:[#allocation7 + $0x1f0] sm:$0xff]  ;;  %8677 = vst [vmem:[#allocation36_spill] sm:$0xff] %v7181_v40  ;;  %8678 = vst [vmem:[#allocation37_spill] sm:$0xff] %v7184_v32 }
 0x600   : > { %3002 = vmatmul.mubr.f32.vlgmr.msra.gmra.mxu1 %v7009_v51  ;;  %3073 = vmatmul.mubr.f32.vlgmr.msra.gmra.mxu0 %v7009_v51 }
 0x601   : > { %3112 = vmatprep.subr.mxu1 %v7019_v20  ;;  %3183 = vmatprep.subr.mxu0 %v7022_v62 }
 0x602   : > { %3113 = vmatpush1.msra.mxu1 %v7025_v25  ;;  %3184 = vmatpush1.msra.mxu0 %v7028_v15 }
 0x603   : > { %3114 = vmatprep.subr.mxu1 %v7031_v17  ;;  %3185 = vmatprep.subr.mxu0 %v7034_v13 }
 0x604   : > { %3115 = vmatpush1.msra.mxu1 %v7037_v1  ;;  %3186 = vmatpush1.msra.mxu0 %v7040_v7 }
 0x605   : > { %3116 = vmatprep.subr.mxu1 %v7043_v10  ;;  %3187 = vmatprep.subr.mxu0 %v7046_v41 }
 0x606   : > { %3117 = vmatpush1.msra.mxu1 %v7049_v43  ;;  %3188 = vmatpush1.msra.mxu0 %v7052_v19 }
 0x607   : > { %3118 = vmatprep.subr.mxu1 %v7055_v38  ;;  %3189 = vmatprep.subr.mxu0 %v7058_v44 }
 0x608   : > { %3119 = vmatpush1.msra.mxu1 %v7061_v45  ;;  %3190 = vmatpush1.msra.mxu0 %v7064_v35 }
 0x609   : > { %3120 = vmatprep.subr.mxu1 %v7067_v26  ;;  %3191 = vmatprep.subr.mxu0 %v7070_v34 }
 0x60a   : > { %3121 = vmatpush1.msra.mxu1 %v7073_v63  ;;  %3192 = vmatpush1.msra.mxu0 %v7076_v24 }
 0x60b   : > { %3122 = vmatprep.subr.mxu1 %v7079_v46  ;;  %3193 = vmatprep.subr.mxu0 %v7082_v55 }
 0x60c   : > { %3123 = vmatpush1.msra.mxu1 %v7085_v31  ;;  %3194 = vmatpush1.msra.mxu0 %v7088_v36 }
 0x60d   : > { %3124 = vmatprep.subr.mxu1 %v7091_v50  ;;  %3195 = vmatprep.subr.mxu0 %v7094_v22 }
 0x60e   : > { %3125 = vmatpush1.msra.mxu1 %v7097_v18  ;;  %3196 = vmatpush1.msra.mxu0 %v7100_v12 }
 0x60f   : > { %3126 = vmatprep.subr.mxu1 %v7103_v6  ;;  %3197 = vmatprep.subr.mxu0 %v7106_v53 }
 0x610   : > { %3127 = vmatpush1.msra.mxu1 %v7109_v16  ;;  %3198 = vmatpush1.msra.mxu0 %v7112_v2 }
 0x611   : > { %3128 = vmatprep.subr.mxu1 %v7115_v49  ;;  %3199 = vmatprep.subr.mxu0 %v7118_v23 }
 0x612   : > { %3129 = vmatpush1.msra.mxu1 %v7121_v9  ;;  %3200 = vmatpush1.msra.mxu0 %v7124_v48 }
 0x613   : > { %3130 = vmatprep.subr.mxu1 %v7127_v59  ;;  %3201 = vmatprep.subr.mxu0 %v7130_v3 }
 0x614   : > { %3131 = vmatpush1.msra.mxu1 %v7133_v54  ;;  %3202 = vmatpush1.msra.mxu0 %v7136_v42 }
 0x615   : > { %3132 = vmatprep.subr.mxu1 %v7139_v58  ;;  %3203 = vmatprep.subr.mxu0 %v7142_v60 }
 0x616   : > { %3133 = vmatpush1.msra.mxu1 %v7145_v21  ;;  %3204 = vmatpush1.msra.mxu0 %v7148_v39  ;;  %v8692_v21 = vld [vmem:[#allocation26_spill] sm:$0xff] }
 0x617   : > { %3134 = vmatprep.subr.mxu1 %v7151_v5  ;;  %3205 = vmatprep.subr.mxu0 %v7154_v37  ;;  %v8691_v5 = vld [vmem:[#allocation28_spill] sm:$0xff] }
 0x618   : > { %3135 = vmatpush1.msra.mxu1 %v7157_v30  ;;  %3206 = vmatpush1.msra.mxu0 %v7160_v29 }
 0x619   : > { %3136 = vmatprep.subr.mxu1 %v7163_v11  ;;  %3207 = vmatprep.subr.mxu0 %v7166_v14  ;;  %v8690_v11 = vld [vmem:[#allocation27_spill] sm:$0xff] }
 0x61a   : > { %3137 = vmatpush1.msra.mxu1 %v7169_v4  ;;  %3208 = vmatpush1.msra.mxu0 %v7172_v0  ;;  %v7190_v0 = vld [vmem:[#allocation7 + $0x38] sm:$0xff] }
 0x61b   : > { %3138 = vmatprep.subr.mxu1 %v7175_v52  ;;  %3209 = vmatprep.subr.mxu0 %v7178_v56  ;;  %8680 = vst [vmem:[#allocation39_spill] sm:$0xff] %v7190_v0  ;;  %v7193_v52 = vld [vmem:[#allocation7 + $0x20] sm:$0xff]  ;;  %v7196_v56 = vld [vmem:[#allocation7 + $0x30] sm:$0xff] }
 0x61c   : > { %3139 = vmatpush1.msra.mxu1 %v7181_v40  ;;  %3210 = vmatpush1.msra.mxu0 %v7184_v32  ;;  %8681 = vst [vmem:[#allocation40_spill] sm:$0xff] %v7193_v52  ;;  %8682 = vst [vmem:[#allocation41_spill] sm:$0xff] %v7196_v56  ;;  %v7199_v40 = vld [vmem:[#allocation7 + $0x8] sm:$0xff]  ;;  %v7202_v32 = vld [vmem:[#allocation7 + $0x18] sm:$0xff] }
 0x61d   : > { %3140 = vmatprep.subr.mxu1 %v7187_v47  ;;  %3211 = vmatprep.subr.mxu0 %v7190_v0  ;;  %8683 = vst [vmem:[#allocation42_spill] sm:$0xff] %v7199_v40  ;;  %8684 = vst [vmem:[#allocation43_spill] sm:$0xff] %v7202_v32  ;;  %v7205_v47 = vld [vmem:[#allocation7] sm:$0xff]  ;;  %v7208_v0 = vld [vmem:[#allocation7 + $0x10] sm:$0xff] }
 0x61e   : > { %3141 = vmatpush1.msra.mxu1 %v7193_v52  ;;  %3212 = vmatpush1.msra.mxu0 %v7196_v56  ;;  %8685 = vst [vmem:[#allocation44_spill] sm:$0xff] %v7205_v47  ;;  %8686 = vst [vmem:[#allocation45_spill] sm:$0xff] %v7208_v0  ;;  %v7213_v56 = vld [vmem:[#allocation10 + $0x1e8] sm:$0xff]  ;;  %v8689_v52 = vld [vmem:[#allocation25_spill] sm:$0xff] }
 0x61f   : > { %3142 = vmatprep.subr.mxu1 %v7199_v40  ;;  %3213 = vmatprep.subr.mxu0 %v7202_v32  ;;  %8687 = vst [vmem:[#allocation46_spill] sm:$0xff] %v7213_v56  ;;  %v7216_v40 = vld [vmem:[#allocation10 + $0x1f8] sm:$0xff] }
 0x620   : > { %3143 = vmatpush1.msra.mxu1 %v7205_v47  ;;  %3214 = vmatpush1.msra.mxu0 %v7208_v0  ;;  %8688 = vst [vmem:[#allocation47_spill] sm:$0xff] %v7216_v40 }
 0x621   : > { %3176 = vmatprep.mubr.f32.mxu1 %v8226_v28  ;;  %3247 = vmatprep.mubr.f32.mxu0 %v8226_v28 }
 0x622   : > { %3287 = vmatprep.subr.mxu1 %v7213_v56  ;;  %3358 = vmatprep.subr.mxu0 %v7216_v40 }
 0x69f   : > { %v2828_v32 = vpop.f32.mrf.mxu1  ;;  %v2899_v0 = vpop.f32.mrf.mxu0 }
 0x6a0   : > { %v2904_v4 = vadd.f32 %v2828_v32, %v8689_v52  ;;  %v2906_v56 = vadd.f32 %v2899_v0, %v8692_v21  ;;  %v8694_v21 = vld [vmem:[#allocation106_spill] sm:$0xff] }
 0x6a1   : > { %v2830_v47 = vpop.f32.mrf.mxu1  ;;  %v2901_v37 = vpop.f32.mrf.mxu0 }
 0x6a2   : > { %v4332_v14 = vmul.f32 -1.442695, %v2904_v4  ;;  %v2905_v29 = vadd.f32 %v2830_v47, %v8690_v11  ;;  %v2907_v39 = vadd.f32 %v2901_v37, %v8691_v5 }
 0x6a4   : > { %4645 = vpow2.f32 %v4332_v14  ;;  %v4333_v30 = vmul.f32 -1.442695, %v2905_v29  ;;  %v4334_v60 = vmul.f32 -1.442695, %v2907_v39  ;;  %v8693_v29 = vld [vmem:[#allocation104_spill] sm:$0xff] }
 0x6a6   : > { %4647 = vpow2.f32 %v4333_v30 }
 0x6a7   : > { %4649 = vtanh.f32 %v2906_v56 }
 0x6a8   : > { %4651 = vpow2.f32 %v4334_v60 }
 0x6b1   : > { %v4646_v58 = vpop.eup %4645 }
 0x6b2   : > { %v2911_v42 = vadd.f32 1.0, %v4646_v58 }
 0x6b3   : > { %v4648_v40 = vpop.eup %4647 }
 0x6b4   : > { %4653 = vrcp.f32 %v2911_v42  ;;  %v2917_v32 = vadd.f32 1.0, %v4648_v40  ;;  %v4650_v4 = vpop.eup %4649 }
 0x6b5   : > { %v4652_v47 = vpop.eup %4651 }
 0x6b6   : > { %4655 = vrcp.f32 %v2917_v32  ;;  %v2924_v0 = vadd.f32 1.0, %v4652_v47  ;;  %v8695_v32 = vld [vmem:[#allocation107_spill] sm:$0xff] }
 0x6c0   : > { %v3003_v11 = vpop.f32.mrf.mxu1  ;;  %v3074_v60 = vpop.f32.mrf.mxu0 }
 0x6c1   : > { %v4654_v14 = vpop.eup %4653  ;;  %v3079_v30 = vadd.f32 %v3003_v11, %v8693_v29  ;;  %v8696_v11 = vld [vmem:[#allocation105_spill] sm:$0xff] }
 0x6c2   : > { %v2928_v52 = vmul.f32 %v4654_v14, %v4650_v4  ;;  %v3005_v54 = vpop.f32.mrf.mxu1  ;;  %v3076_v40 = vpop.f32.mrf.mxu0  ;;  %v3081_v14 = vadd.f32 %v3074_v60, %v8696_v11  ;;  %v7242_v60 = vld [vmem:[#allocation10 + $0x1c8] sm:$0xff]  ;;  %v7263_v11 = vld [vmem:[#allocation10 + $0x1b0] sm:$0xff] }
 0x6c3   : > { %v4656_v5 = vpop.eup %4655  ;;  %v4335_v37 = vmul.f32 -1.442695, %v3079_v30  ;;  %v3080_v39 = vadd.f32 %v3005_v54, %v8694_v21  ;;  %v3082_v4 = vadd.f32 %v3076_v40, %v8695_v32  ;;  %v8697_v21 = vmax.f32 %v6785_v61, %v6939_v33  ;;  %v7248_v61 = vld [vmem:[#allocation10 + $0x1c0] sm:$0xff]  ;;  %v7251_v33 = vld [vmem:[#allocation10 + $0x1d0] sm:$0xff]  ;;  %v7254_v40 = vld [vmem:[#allocation10 + $0x1a8] sm:$0xff]  ;;  %8698 = vst [vmem:[#allocation48_spill] sm:$0xff] %v7263_v11 }
 0x6c4   : > { %v2927_v58 = vmul.f32 %v4656_v5, %v6934_v8  ;;  %v7257_v32 = vld [vmem:[#allocation10 + $0x1b8] sm:$0xff] }
 0x6c5   : > { %4657 = vpow2.f32 %v4335_v37  ;;  %v4336_v42 = vmul.f32 -1.442695, %v3080_v39  ;;  %v4337_v29 = vmul.f32 -1.442695, %v3082_v4  ;;  %v7260_v4 = vld [vmem:[#allocation10 + $0x1a0] sm:$0xff] }
 0x6c6   : > { %v7226_v56 = vadd.f32 %v2928_v52, %v2927_v58  ;;  %v7236_v58 = vld [vmem:[#allocation10 + $0x1e0] sm:$0xff] }
 0x6c7   : > { %4659 = vpow2.f32 %v4336_v42  ;;  %v7245_v42 = vld [vmem:[#allocation10 + $0x1d8] sm:$0xff] }
 0x6c8   : > { %4661 = vrcp.f32 %v2924_v0  ;;  %v7239_v0 = vld [vmem:[#allocation10 + $0x1f0] sm:$0xff] }
 0x6c9   : > { %4663 = vtanh.f32 %v7226_v56 }
 0x6ca   : > { %4665 = vtanh.f32 %v3081_v14  ;;  %v7266_v14 = vld [vmem:[#allocation10 + $0x188] sm:$0xff] }
 0x6cb   : > { %4667 = vpow2.f32 %v4337_v29  ;;  %8699 = vst [vmem:[#allocation49_spill] sm:$0xff] %v7266_v14  ;;  %v7269_v29 = vld [vmem:[#allocation10 + $0x198] sm:$0xff] }
 0x6cc   : > { %8700 = vst [vmem:[#allocation50_spill] sm:$0xff] %v7269_v29 }
 0x6d2   : > { %v4658_v30 = vpop.eup %4657 }
 0x6d3   : > { %v3086_v54 = vadd.f32 1.0, %v4658_v30 }
 0x6d4   : > { %v4660_v8 = vpop.eup %4659 }
 0x6d5   : > { %v4662_v47 = vpop.eup %4661  ;;  %4669 = vrcp.f32 %v3086_v54  ;;  %v3092_v5 = vadd.f32 1.0, %v4660_v8  ;;  %v7272_v54 = vld [vmem:[#allocation10 + $0x180] sm:$0xff]  ;;  %v7275_v8 = vld [vmem:[#allocation10 + $0x190] sm:$0xff] }
 0x6d6   : > { %v4664_v52 = vpop.eup %4663  ;;  %8701 = vst [vmem:[#allocation51_spill] sm:$0xff] %v7272_v54  ;;  %8702 = vst [vmem:[#allocation52_spill] sm:$0xff] %v7275_v8 }
 0x6d7   : > { %4671 = vrcp.f32 %v3092_v5  ;;  %v2931_v37 = vmul.f32 %v4664_v52, %v4662_v47  ;;  %v4666_v30 = vpop.eup %4665  ;;  %v7278_v5 = vld [vmem:[#allocation10 + $0x168] sm:$0xff]  ;;  %v7281_v52 = vld [vmem:[#allocation10 + $0x178] sm:$0xff] }
 0x6d8   : > { %v4668_v47 = vpop.eup %4667  ;;  %8703 = vst [vmem:[#allocation53_spill] sm:$0xff] %v7278_v5  ;;  %8704 = vst [vmem:[#allocation54_spill] sm:$0xff] %v7281_v52 }
 0x6d9   : > { %v7234_v39 = vmax.f32 %v8697_v21, %v2931_v37  ;;  %3177 = vmatmul.mubr.f32.vlgmr.msra.gmra.mxu1 %v2931_v37  ;;  %3248 = vmatmul.mubr.f32.vlgmr.msra.gmra.mxu0 %v2931_v37  ;;  %v7284_v21 = vld [vmem:[#allocation10 + $0x160] sm:$0xff] }
 0x6da   : > { %3288 = vmatpush1.msra.mxu1 %v7236_v58  ;;  %3359 = vmatpush1.msra.mxu0 %v7239_v0  ;;  %8705 = vst [vmem:[#allocation55_spill] sm:$0xff] %v7284_v21 }
 0x6db   : > { %3289 = vmatprep.subr.mxu1 %v7242_v60  ;;  %3360 = vmatprep.subr.mxu0 %v7245_v42 }
 0x6dc   : > { %3290 = vmatpush1.msra.mxu1 %v7248_v61  ;;  %3361 = vmatpush1.msra.mxu0 %v7251_v33 }
 0x6dd   : > { %3291 = vmatprep.subr.mxu1 %v7254_v40  ;;  %3362 = vmatprep.subr.mxu0 %v7257_v32 }
 0x6de   : > { %3292 = vmatpush1.msra.mxu1 %v7260_v4  ;;  %3363 = vmatpush1.msra.mxu0 %v7263_v11  ;;  %v7296_v11 = vld [vmem:[#allocation10 + $0x140] sm:$0xff] }
 0x6df   : > { %3293 = vmatprep.subr.mxu1 %v7266_v14  ;;  %3364 = vmatprep.subr.mxu0 %v7269_v29  ;;  %v7287_v29 = vld [vmem:[#allocation10 + $0x170] sm:$0xff]  ;;  %v7293_v14 = vld [vmem:[#allocation10 + $0x158] sm:$0xff]  ;;  %8709 = vst [vmem:[#allocation59_spill] sm:$0xff] %v7296_v11 }
 0x6e0   : > { %3294 = vmatpush1.msra.mxu1 %v7272_v54  ;;  %3365 = vmatpush1.msra.mxu0 %v7275_v8  ;;  %8706 = vst [vmem:[#allocation56_spill] sm:$0xff] %v7287_v29  ;;  %v7290_v8 = vld [vmem:[#allocation10 + $0x148] sm:$0xff]  ;;  %8708 = vst [vmem:[#allocation58_spill] sm:$0xff] %v7293_v14 }
 0x6e1   : > { %3295 = vmatprep.subr.mxu1 %v7278_v5  ;;  %3366 = vmatprep.subr.mxu0 %v7281_v52  ;;  %8707 = vst [vmem:[#allocation57_spill] sm:$0xff] %v7290_v8  ;;  %v3099_v52 = vadd.f32 1.0, %v4668_v47  ;;  %v7312_v47 = vld [vmem:[#allocation10 + $0x130] sm:$0xff] }
 0x6e2   : > { %v4670_v37 = vpop.eup %4669  ;;  %3296 = vmatpush1.msra.mxu1 %v7284_v21  ;;  %3367 = vmatpush1.msra.mxu0 %v7287_v29  ;;  %v7299_v21 = vld [vmem:[#allocation10 + $0x150] sm:$0xff]  ;;  %8713 = vst [vmem:[#allocation63_spill] sm:$0xff] %v7312_v47 }
 0x6e3   : > { %v3103_v54 = vmul.f32 %v4670_v37, %v4666_v30  ;;  %3297 = vmatprep.subr.mxu1 %v7290_v8  ;;  %3368 = vmatprep.subr.mxu0 %v7293_v14  ;;  %8710 = vst [vmem:[#allocation60_spill] sm:$0xff] %v7299_v21  ;;  %v7303_v37 = vld [vmem:[#allocation10 + $0x128] sm:$0xff]  ;;  %v7306_v8 = vld [vmem:[#allocation10 + $0x138] sm:$0xff]  ;;  %v7309_v14 = vld [vmem:[#allocation10 + $0x120] sm:$0xff]  ;;  %4673 = vrcp.f32 %v3099_v52 }
 0x6e4   : > { %v4672_v5 = vpop.eup %4671  ;;  %3298 = vmatpush1.msra.mxu1 %v7296_v11  ;;  %3369 = vmatpush1.msra.mxu0 %v7299_v21  ;;  %8711 = vst [vmem:[#allocation61_spill] sm:$0xff] %v7306_v8  ;;  %8712 = vst [vmem:[#allocation62_spill] sm:$0xff] %v7309_v14  ;;  %v7317_v21 = vld [vmem:[#allocation10 + $0x108] sm:$0xff]  ;;  %v7339_v52 = vld [vmem:[#allocation10 + $0xf0] sm:$0xff] }
 0x6e5   : > { %v3102_v30 = vmul.f32 %v4672_v5, %v6972_v27  ;;  %3299 = vmatprep.subr.mxu1 %v7303_v37  ;;  %3370 = vmatprep.subr.mxu0 %v7306_v8  ;;  %8714 = vst [vmem:[#allocation64_spill] sm:$0xff] %v7317_v21  ;;  %v7320_v27 = vld [vmem:[#allocation10 + $0x118] sm:$0xff]  ;;  %v7323_v5 = vld [vmem:[#allocation10 + $0x100] sm:$0xff]  ;;  %8721 = vst [vmem:[#allocation71_spill] sm:$0xff] %v7339_v52 }
 0x6e6   : > { %3300 = vmatpush1.msra.mxu1 %v7309_v14  ;;  %3371 = vmatpush1.msra.mxu0 %v7312_v47  ;;  %8715 = vst [vmem:[#allocation65_spill] sm:$0xff] %v7320_v27  ;;  %8716 = vst [vmem:[#allocation66_spill] sm:$0xff] %v7323_v5  ;;  %v7326_v14 = vld [vmem:[#allocation10 + $0x110] sm:$0xff]  ;;  %v7329_v47 = vld [vmem:[#allocation10 + $0xe8] sm:$0xff] }
 0x6e7   : > { %v7315_v11 = vadd.f32 %v3103_v54, %v3102_v30  ;;  %3301 = vmatprep.subr.mxu1 %v7317_v21  ;;  %3372 = vmatprep.subr.mxu0 %v7320_v27  ;;  %8717 = vst [vmem:[#allocation67_spill] sm:$0xff] %v7326_v14  ;;  %8718 = vst [vmem:[#allocation68_spill] sm:$0xff] %v7329_v47  ;;  %v7332_v54 = vld [vmem:[#allocation10 + $0xf8] sm:$0xff]  ;;  %v7336_v30 = vld [vmem:[#allocation10 + $0xe0] sm:$0xff] }
 0x6e8   : > { %3302 = vmatpush1.msra.mxu1 %v7323_v5  ;;  %3373 = vmatpush1.msra.mxu0 %v7326_v14  ;;  %8719 = vst [vmem:[#allocation69_spill] sm:$0xff] %v7332_v54  ;;  %8720 = vst [vmem:[#allocation70_spill] sm:$0xff] %v7336_v30  ;;  %v7342_v5 = vld [vmem:[#allocation10 + $0xc8] sm:$0xff]  ;;  %v7345_v14 = vld [vmem:[#allocation10 + $0xd8] sm:$0xff] }
 0x6e9   : > { %3303 = vmatprep.subr.mxu1 %v7329_v47  ;;  %3374 = vmatprep.subr.mxu0 %v7332_v54  ;;  %4675 = vtanh.f32 %v7315_v11  ;;  %8722 = vst [vmem:[#allocation72_spill] sm:$0xff] %v7342_v5  ;;  %8723 = vst [vmem:[#allocation73_spill] sm:$0xff] %v7345_v14  ;;  %v7348_v47 = vld [vmem:[#allocation10 + $0xc0] sm:$0xff]  ;;  %v7351_v54 = vld [vmem:[#allocation10 + $0xd0] sm:$0xff] }
 0x6ea   : > { %3304 = vmatpush1.msra.mxu1 %v7336_v30  ;;  %3375 = vmatpush1.msra.mxu0 %v7339_v52  ;;  %8724 = vst [vmem:[#allocation74_spill] sm:$0xff] %v7348_v47  ;;  %8725 = vst [vmem:[#allocation75_spill] sm:$0xff] %v7351_v54  ;;  %v7354_v30 = vld [vmem:[#allocation10 + $0xa8] sm:$0xff]  ;;  %v7357_v52 = vld [vmem:[#allocation10 + $0xb8] sm:$0xff] }
 0x6eb   : > { %3305 = vmatprep.subr.mxu1 %v7342_v5  ;;  %3376 = vmatprep.subr.mxu0 %v7345_v14  ;;  %8726 = vst [vmem:[#allocation21_spill] sm:$0xff] %v7354_v30  ;;  %8727 = vst [vmem:[#allocation23_spill] sm:$0xff] %v7357_v52  ;;  %v7360_v5 = vld [vmem:[#allocation10 + $0xa0] sm:$0xff]  ;;  %v7363_v14 = vld [vmem:[#allocation10 + $0xb0] sm:$0xff] }
 0x6ec   : > { %3306 = vmatpush1.msra.mxu1 %v7348_v47  ;;  %3377 = vmatpush1.msra.mxu0 %v7351_v54  ;;  %8728 = vst [vmem:[#allocation24_spill] sm:$0xff] %v7360_v5  ;;  %8729 = vst [vmem:[#allocation22_spill] sm:$0xff] %v7363_v14  ;;  %v7366_v47 = vld [vmem:[#allocation10 + $0x88] sm:$0xff]  ;;  %v7369_v54 = vld [vmem:[#allocation10 + $0x98] sm:$0xff] }
 0x6ed   : > { %3307 = vmatprep.subr.mxu1 %v7354_v30  ;;  %3378 = vmatprep.subr.mxu0 %v7357_v52  ;;  %8730 = vst [vmem:[#allocation108_spill] sm:$0xff] %v7366_v47  ;;  %8731 = vst [vmem:[#allocation110_spill] sm:$0xff] %v7369_v54  ;;  %v7372_v30 = vld [vmem:[#allocation10 + $0x80] sm:$0xff]  ;;  %v7375_v52 = vld [vmem:[#allocation10 + $0x90] sm:$0xff] }
 0x6ee   : > { %3308 = vmatpush1.msra.mxu1 %v7360_v5  ;;  %3379 = vmatpush1.msra.mxu0 %v7363_v14  ;;  %8732 = vst [vmem:[#allocation111_spill] sm:$0xff] %v7372_v30  ;;  %8733 = vst [vmem:[#allocation109_spill] sm:$0xff] %v7375_v52  ;;  %v7378_v5 = vld [vmem:[#allocation10 + $0x68] sm:$0xff]  ;;  %v7381_v14 = vld [vmem:[#allocation10 + $0x78] sm:$0xff] }
 0x6ef   : > { %3309 = vmatprep.subr.mxu1 %v7366_v47  ;;  %3380 = vmatprep.subr.mxu0 %v7369_v54  ;;  %8734 = vst [vmem:[#allocation118_spill] sm:$0xff] %v7378_v5  ;;  %8735 = vst [vmem:[#allocation120_spill] sm:$0xff] %v7381_v14  ;;  %v7384_v47 = vld [vmem:[#allocation10 + $0x60] sm:$0xff]  ;;  %v7387_v54 = vld [vmem:[#allocation10 + $0x70] sm:$0xff] }
 0x6f0   : > { %3310 = vmatpush1.msra.mxu1 %v7372_v30  ;;  %3381 = vmatpush1.msra.mxu0 %v7375_v52  ;;  %8736 = vst [vmem:[#allocation122_spill] sm:$0xff] %v7384_v47  ;;  %8737 = vst [vmem:[#allocation123_spill] sm:$0xff] %v7387_v54  ;;  %v7390_v30 = vld [vmem:[#allocation10 + $0x48] sm:$0xff]  ;;  %v7393_v52 = vld [vmem:[#allocation10 + $0x58] sm:$0xff] }
 0x6f1   : > { %3311 = vmatprep.subr.mxu1 %v7378_v5  ;;  %3382 = vmatprep.subr.mxu0 %v7381_v14  ;;  %8738 = vst [vmem:[#allocation124_spill] sm:$0xff] %v7390_v30  ;;  %8739 = vst [vmem:[#allocation125_spill] sm:$0xff] %v7393_v52  ;;  %v7396_v5 = vld [vmem:[#allocation10 + $0x40] sm:$0xff]  ;;  %v7399_v14 = vld [vmem:[#allocation10 + $0x50] sm:$0xff] }
 0x6f2   : > { %3312 = vmatpush1.msra.mxu1 %v7384_v47  ;;  %3383 = vmatpush1.msra.mxu0 %v7387_v54  ;;  %8740 = vst [vmem:[#allocation126_spill] sm:$0xff] %v7396_v5  ;;  %8741 = vst [vmem:[#allocation127_spill] sm:$0xff] %v7399_v14  ;;  %v4674_v47 = vpop.eup %4673  ;;  %v7402_v27 = vld [vmem:[#allocation10 + $0x28] sm:$0xff]  ;;  %v7405_v54 = vld [vmem:[#allocation10 + $0x38] sm:$0xff] }
 0x6f3   : > { %3313 = vmatprep.subr.mxu1 %v7390_v30  ;;  %3384 = vmatprep.subr.mxu0 %v7393_v52  ;;  %8742 = vst [vmem:[#allocation128_spill] sm:$0xff] %v7402_v27  ;;  %8743 = vst [vmem:[#allocation129_spill] sm:$0xff] %v7405_v54  ;;  %v7408_v21 = vld [vmem:[#allocation10 + $0x20] sm:$0xff]  ;;  %v7411_v52 = vld [vmem:[#allocation10 + $0x30] sm:$0xff] }
 0x6f4   : > { %3314 = vmatpush1.msra.mxu1 %v7396_v5  ;;  %3385 = vmatpush1.msra.mxu0 %v7399_v14  ;;  %8744 = vst [vmem:[#allocation130_spill] sm:$0xff] %v7408_v21  ;;  %8745 = vst [vmem:[#allocation131_spill] sm:$0xff] %v7411_v52  ;;  %v7414_v5 = vld [vmem:[#allocation10 + $0x8] sm:$0xff]  ;;  %v7417_v14 = vld [vmem:[#allocation10 + $0x18] sm:$0xff] }
 0x6f5   : > { %3315 = vmatprep.subr.mxu1 %v7402_v27  ;;  %3386 = vmatprep.subr.mxu0 %v7405_v54  ;;  %8746 = vst [vmem:[#allocation132_spill] sm:$0xff] %v7414_v5  ;;  %v7420_v8 = vld [vmem:[#allocation10] sm:$0xff] }
 0x6f6   : > { %v4676_v30 = vpop.eup %4675  ;;  %3316 = vmatpush1.msra.mxu1 %v7408_v21  ;;  %3387 = vmatpush1.msra.mxu0 %v7411_v52  ;;  %v7424_v21 = vld [vmem:[#allocation10 + $0x10] sm:$0xff] }
 0x6f7   : > { %3317 = vmatprep.subr.mxu1 %v7414_v5  ;;  %3388 = vmatprep.subr.mxu0 %v7417_v14  ;;  %v3106_v27 = vmul.f32 %v4676_v30, %v4674_v47  ;;  %v8747_v5 = vmax.f32 %v6857_v57, %v7009_v51  ;;  %v8748_v57 = vld [vmem:[#allocation80_spill] sm:$0xff]  ;;  %v8749_v51 = vld [vmem:[#allocation81_spill] sm:$0xff]  ;;  %v8753_v30 = vld [vmem:[#allocation147_spill] sm:$0xff] }
 0x6f8   : > { %3318 = vmatpush1.msra.mxu1 %v7420_v8  ;;  %3351 = vmatprep.mubr.f32.mxu1 %v8226_v28  ;;  %v8750_v47 = vld [vmem:[#allocation117_spill] sm:$0xff] }
 0x6f9   : > { %3389 = vmatpush1.msra.mxu0 %v7424_v21  ;;  %3422 = vmatprep.mubr.f32.mxu0 %v8226_v28  ;;  %v7431_v52 = vmax.f32 %v8747_v5, %v3106_v27  ;;  %v8752_v5 = vld [vmem:[#allocation121_spill] sm:$0xff] }
 0x6fa   : > { %3352 = vmatmul.mubr.f32.vlgmr.msra.gmra.mxu1 %v3106_v27  ;;  %3423 = vmatmul.mubr.f32.vlgmr.msra.gmra.mxu0 %v3106_v27  ;;  %v8751_v27 = vld [vmem:[#allocation119_spill] sm:$0xff] }
 0x6fb   : > { %3462 = vmatprep.subr.mxu1 %v7019_v20  ;;  %3533 = vmatprep.subr.mxu0 %v7022_v62 }
 0x6fc   : > { %3463 = vmatpush1.msra.mxu1 %v7025_v25  ;;  %3534 = vmatpush1.msra.mxu0 %v7028_v15 }
 0x6fd   : > { %3464 = vmatprep.subr.mxu1 %v7031_v17  ;;  %3535 = vmatprep.subr.mxu0 %v7034_v13 }
 0x6fe   : > { %3465 = vmatpush1.msra.mxu1 %v7037_v1  ;;  %3536 = vmatpush1.msra.mxu0 %v7040_v7 }
 0x6ff   : > { %3466 = vmatprep.subr.mxu1 %v7043_v10  ;;  %3537 = vmatprep.subr.mxu0 %v7046_v41 }
 0x700   : > { %3467 = vmatpush1.msra.mxu1 %v7049_v43  ;;  %3538 = vmatpush1.msra.mxu0 %v7052_v19 }
 0x701   : > { %3468 = vmatprep.subr.mxu1 %v7055_v38  ;;  %3539 = vmatprep.subr.mxu0 %v7058_v44 }
 0x702   : > { %3469 = vmatpush1.msra.mxu1 %v7061_v45  ;;  %3540 = vmatpush1.msra.mxu0 %v7064_v35 }
 0x703   : > { %3470 = vmatprep.subr.mxu1 %v7067_v26  ;;  %3541 = vmatprep.subr.mxu0 %v7070_v34 }
 0x704   : > { %3471 = vmatpush1.msra.mxu1 %v7073_v63  ;;  %3542 = vmatpush1.msra.mxu0 %v7076_v24 }
 0x705   : > { %3472 = vmatprep.subr.mxu1 %v7079_v46  ;;  %3543 = vmatprep.subr.mxu0 %v7082_v55 }
 0x706   : > { %3473 = vmatpush1.msra.mxu1 %v7085_v31  ;;  %3544 = vmatpush1.msra.mxu0 %v7088_v36 }
 0x707   : > { %3474 = vmatprep.subr.mxu1 %v7091_v50  ;;  %3545 = vmatprep.subr.mxu0 %v7094_v22 }
 0x708   : > { %3475 = vmatpush1.msra.mxu1 %v7097_v18  ;;  %3546 = vmatpush1.msra.mxu0 %v7100_v12 }
 0x709   : > { %3476 = vmatprep.subr.mxu1 %v7103_v6  ;;  %3547 = vmatprep.subr.mxu0 %v7106_v53  ;;  %v8779_v53 = vld [vmem:[#allocation30_spill] sm:$0xff] }
 0x70a   : > { %3477 = vmatpush1.msra.mxu1 %v7109_v16  ;;  %3548 = vmatpush1.msra.mxu0 %v7112_v2  ;;  %v8778_v2 = vld [vmem:[#allocation83_spill] sm:$0xff] }
 0x70b   : > { %3478 = vmatprep.subr.mxu1 %v7115_v49  ;;  %3549 = vmatprep.subr.mxu0 %v7118_v23  ;;  %v8754_v23 = vld [vmem:[#allocation150_spill] sm:$0xff] }
 0x70c   : > { %3479 = vmatpush1.msra.mxu1 %v7121_v9  ;;  %3550 = vmatpush1.msra.mxu0 %v7124_v48  ;;  %v8755_v9 = vld [vmem:[#allocation151_spill] sm:$0xff]  ;;  %v8756_v48 = vld [vmem:[#allocation153_spill] sm:$0xff] }
 0x70d   : > { %3480 = vmatprep.subr.mxu1 %v7127_v59  ;;  %3551 = vmatprep.subr.mxu0 %v7130_v3  ;;  %v8757_v59 = vld [vmem:[#allocation154_spill] sm:$0xff]  ;;  %v8758_v3 = vld [vmem:[#allocation156_spill] sm:$0xff] }
 0x70e   : > { %3481 = vmatpush1.msra.mxu1 %v8748_v57  ;;  %3552 = vmatpush1.msra.mxu0 %v8749_v51  ;;  %v8759_v57 = vld [vmem:[#allocation31_spill] sm:$0xff]  ;;  %v8760_v51 = vld [vmem:[#allocation32_spill] sm:$0xff] }
 0x70f   : > { %3482 = vmatprep.subr.mxu1 %v8750_v47  ;;  %3553 = vmatprep.subr.mxu0 %v8751_v27  ;;  %v8761_v47 = vld [vmem:[#allocation33_spill] sm:$0xff]  ;;  %v8762_v27 = vld [vmem:[#allocation34_spill] sm:$0xff] }
 0x710   : > { %3483 = vmatpush1.msra.mxu1 %v8752_v5  ;;  %3554 = vmatpush1.msra.mxu0 %v8753_v30  ;;  %v8763_v5 = vld [vmem:[#allocation35_spill] sm:$0xff]  ;;  %v8764_v30 = vld [vmem:[#allocation36_spill] sm:$0xff] }
 0x711   : > { %3484 = vmatprep.subr.mxu1 %v8754_v23  ;;  %3555 = vmatprep.subr.mxu0 %v8755_v9  ;;  %v8765_v23 = vld [vmem:[#allocation37_spill] sm:$0xff]  ;;  %v8766_v9 = vld [vmem:[#allocation38_spill] sm:$0xff] }
 0x712   : > { %3485 = vmatpush1.msra.mxu1 %v8756_v48  ;;  %3556 = vmatpush1.msra.mxu0 %v8757_v59  ;;  %v8767_v48 = vld [vmem:[#allocation39_spill] sm:$0xff]  ;;  %v8768_v59 = vld [vmem:[#allocation40_spill] sm:$0xff] }
 0x713   : > { %3486 = vmatprep.subr.mxu1 %v8758_v3  ;;  %3557 = vmatprep.subr.mxu0 %v8759_v57  ;;  %v8769_v3 = vld [vmem:[#allocation41_spill] sm:$0xff]  ;;  %v8770_v57 = vld [vmem:[#allocation42_spill] sm:$0xff] }
 0x714   : > { %3487 = vmatpush1.msra.mxu1 %v8760_v51  ;;  %3558 = vmatpush1.msra.mxu0 %v8761_v47  ;;  %v8771_v51 = vld [vmem:[#allocation43_spill] sm:$0xff]  ;;  %v8772_v47 = vld [vmem:[#allocation44_spill] sm:$0xff] }
 0x715   : > { %3488 = vmatprep.subr.mxu1 %v8762_v27  ;;  %3559 = vmatprep.subr.mxu0 %v8763_v5  ;;  %v8773_v27 = vld [vmem:[#allocation45_spill] sm:$0xff] }
 0x716   : > { %3489 = vmatpush1.msra.mxu1 %v8764_v30  ;;  %3560 = vmatpush1.msra.mxu0 %v8765_v23  ;;  %v8774_v23 = vld [vmem:[#allocation46_spill] sm:$0xff] }
 0x717   : > { %3490 = vmatprep.subr.mxu1 %v8766_v9  ;;  %3561 = vmatprep.subr.mxu0 %v8767_v48  ;;  %v8775_v9 = vld [vmem:[#allocation47_spill] sm:$0xff] }
 0x718   : > { %3491 = vmatpush1.msra.mxu1 %v8768_v59  ;;  %3562 = vmatpush1.msra.mxu0 %v8769_v3  ;;  %v8776_v59 = vld [vmem:[#allocation29_spill] sm:$0xff] }
 0x719   : > { %3492 = vmatprep.subr.mxu1 %v8770_v57  ;;  %3563 = vmatprep.subr.mxu0 %v8771_v51  ;;  %v8777_v57 = vld [vmem:[#allocation82_spill] sm:$0xff] }
 0x71a   : > { %3493 = vmatpush1.msra.mxu1 %v8772_v47  ;;  %3564 = vmatpush1.msra.mxu0 %v8773_v27 }
 0x71b   : > { %3526 = vmatprep.mubr.f32.mxu1 %v8226_v28  ;;  %3597 = vmatprep.mubr.f32.mxu0 %v8226_v28 }
 0x71c   : > { %3637 = vmatprep.subr.mxu1 %v8774_v23  ;;  %3708 = vmatprep.subr.mxu0 %v8775_v9 }
 0x799   : > { %v3178_v48 = vpop.f32.mrf.mxu1  ;;  %v3249_v51 = vpop.f32.mrf.mxu0 }
 0x79a   : > { %v3254_v30 = vadd.f32 %v3178_v48, %v8776_v59  ;;  %v3256_v6 = vadd.f32 %v3249_v51, %v8779_v53  ;;  %v8781_v53 = vld [vmem:[#allocation102_spill] sm:$0xff] }
 0x79b   : > { %v3180_v3 = vpop.f32.mrf.mxu1  ;;  %v3251_v27 = vpop.f32.mrf.mxu0 }
 0x79c   : > { %v4338_v5 = vmul.f32 -1.442695, %v3254_v30  ;;  %v3255_v49 = vadd.f32 %v3180_v3, %v8777_v57  ;;  %v3257_v16 = vadd.f32 %v3251_v27, %v8778_v2 }
 0x79e   : > { %4677 = vpow2.f32 %v4338_v5  ;;  %v4339_v47 = vmul.f32 -1.442695, %v3255_v49  ;;  %v4340_v12 = vmul.f32 -1.442695, %v3257_v16  ;;  %v8780_v49 = vld [vmem:[#allocation100_spill] sm:$0xff] }
 0x7a0   : > { %4679 = vpow2.f32 %v4339_v47 }
 0x7a1   : > { %4681 = vtanh.f32 %v3256_v6 }
 0x7a2   : > { %4683 = vpow2.f32 %v4340_v12 }
 0x7ab   : > { %v4678_v23 = vpop.eup %4677 }
 0x7ac   : > { %v3261_v18 = vadd.f32 1.0, %v4678_v23 }
 0x7ad   : > { %v4680_v9 = vpop.eup %4679 }
 0x7ae   : > { %4685 = vrcp.f32 %v3261_v18  ;;  %v3267_v48 = vadd.f32 1.0, %v4680_v9  ;;  %v4682_v59 = vpop.eup %4681 }
 0x7af   : > { %v4684_v3 = vpop.eup %4683 }
 0x7b0   : > { %4687 = vrcp.f32 %v3267_v48  ;;  %v3274_v6 = vadd.f32 1.0, %v4684_v3  ;;  %v8782_v48 = vld [vmem:[#allocation103_spill] sm:$0xff] }
 0x7ba   : > { %v3353_v57 = vpop.f32.mrf.mxu1  ;;  %v3424_v12 = vpop.f32.mrf.mxu0 }
 0x7bb   : > { %v4686_v5 = vpop.eup %4685  ;;  %v3429_v47 = vadd.f32 %v3353_v57, %v8780_v49  ;;  %v8783_v57 = vld [vmem:[#allocation101_spill] sm:$0xff] }
 0x7bc   : > { %v3278_v30 = vmul.f32 %v4686_v5, %v4682_v59  ;;  %v3355_v22 = vpop.f32.mrf.mxu1  ;;  %v3426_v51 = vpop.f32.mrf.mxu0  ;;  %v3431_v5 = vadd.f32 %v3424_v12, %v8783_v57  ;;  %v8790_v57 = vld [vmem:[#allocation54_spill] sm:$0xff] }
 0x7bd   : > { %v4688_v2 = vpop.eup %4687  ;;  %v4341_v27 = vmul.f32 -1.442695, %v3429_v47  ;;  %v3430_v16 = vadd.f32 %v3355_v22, %v8781_v53  ;;  %v3432_v59 = vadd.f32 %v3426_v51, %v8782_v48  ;;  %v8788_v51 = vld [vmem:[#allocation52_spill] sm:$0xff] }
 0x7be   : > { %v3277_v23 = vmul.f32 %v4688_v2, %v7226_v56  ;;  %v8795_v53 = vld [vmem:[#allocation60_spill] sm:$0xff] }
 0x7bf   : > { %4689 = vpow2.f32 %v4341_v27  ;;  %v4342_v18 = vmul.f32 -1.442695, %v3430_v16  ;;  %v4343_v49 = vmul.f32 -1.442695, %v3432_v59  ;;  %v8784_v16 = vld [vmem:[#allocation48_spill] sm:$0xff]  ;;  %v8789_v59 = vld [vmem:[#allocation53_spill] sm:$0xff] }
 0x7c0   : > { %v7508_v9 = vadd.f32 %v3278_v30, %v3277_v23  ;;  %v8785_v23 = vld [vmem:[#allocation49_spill] sm:$0xff] }
 0x7c1   : > { %4691 = vpow2.f32 %v4342_v18  ;;  %v8787_v18 = vld [vmem:[#allocation51_spill] sm:$0xff] }
 0x7c2   : > { %4693 = vrcp.f32 %v3274_v6  ;;  %v8786_v6 = vld [vmem:[#allocation50_spill] sm:$0xff] }
 0x7c3   : > { %4695 = vtanh.f32 %v7508_v9 }
 0x7c4   : > { %4697 = vtanh.f32 %v3431_v5 }
 0x7c5   : > { %4699 = vpow2.f32 %v4343_v49  ;;  %v8791_v49 = vld [vmem:[#allocation55_spill] sm:$0xff] }
 0x7cc   : > { %v4690_v47 = vpop.eup %4689 }
 0x7cd   : > { %v3436_v22 = vadd.f32 1.0, %v4690_v47 }
 0x7ce   : > { %v4692_v56 = vpop.eup %4691 }
 0x7cf   : > { %v4694_v3 = vpop.eup %4693  ;;  %4701 = vrcp.f32 %v3436_v22  ;;  %v3442_v2 = vadd.f32 1.0, %v4692_v56  ;;  %v8792_v22 = vld [vmem:[#allocation57_spill] sm:$0xff]  ;;  %v8793_v56 = vld [vmem:[#allocation58_spill] sm:$0xff] }
 0x7d0   : > { %v4696_v30 = vpop.eup %4695 }
 0x7d1   : > { %4703 = vrcp.f32 %v3442_v2  ;;  %v7513_v27 = vmul.f32 %v4696_v30, %v4694_v3  ;;  %v4698_v12 = vpop.eup %4697  ;;  %v8794_v30 = vld [vmem:[#allocation59_spill] sm:$0xff] }
 0x7d2   : > { %v4700_v48 = vpop.eup %4699 }
 0x7d3   : > { %3527 = vmatmul.mubr.f32.vlgmr.msra.gmra.mxu1 %v7513_v27  ;;  %3598 = vmatmul.mubr.f32.vlgmr.msra.gmra.mxu0 %v7513_v27  ;;  %v3449_v2 = vadd.f32 1.0, %v4700_v48  ;;  %v8801_v48 = vld [vmem:[#allocation66_spill] sm:$0xff] }
 0x7d4   : > { %3638 = vmatpush1.msra.mxu1 %v7236_v58  ;;  %3709 = vmatpush1.msra.mxu0 %v7239_v0 }
 0x7d5   : > { %3639 = vmatprep.subr.mxu1 %v7242_v60  ;;  %3710 = vmatprep.subr.mxu0 %v7245_v42  ;;  %4705 = vrcp.f32 %v3449_v2  ;;  %v8810_v2 = vld [vmem:[#allocation75_spill] sm:$0xff] }
 0x7d6   : > { %3640 = vmatpush1.msra.mxu1 %v7248_v61  ;;  %3711 = vmatpush1.msra.mxu0 %v7251_v33 }
 0x7d7   : > { %3641 = vmatprep.subr.mxu1 %v7254_v40  ;;  %3712 = vmatprep.subr.mxu0 %v7257_v32 }
 0x7d8   : > { %3642 = vmatpush1.msra.mxu1 %v7260_v4  ;;  %3713 = vmatpush1.msra.mxu0 %v8784_v16 }
 0x7d9   : > { %3643 = vmatprep.subr.mxu1 %v8785_v23  ;;  %3714 = vmatprep.subr.mxu0 %v8786_v6 }
 0x7da   : > { %3644 = vmatpush1.msra.mxu1 %v8787_v18  ;;  %3715 = vmatpush1.msra.mxu0 %v8788_v51 }
 0x7db   : > { %3645 = vmatprep.subr.mxu1 %v8789_v59  ;;  %3716 = vmatprep.subr.mxu0 %v8790_v57  ;;  %v8796_v57 = vld [vmem:[#allocation61_spill] sm:$0xff] }
 0x7dc   : > { %v4702_v5 = vpop.eup %4701  ;;  %3646 = vmatpush1.msra.mxu1 %v8791_v49  ;;  %3717 = vmatpush1.msra.mxu0 %v7287_v29  ;;  %v8797_v49 = vld [vmem:[#allocation62_spill] sm:$0xff]  ;;  %v8798_v29 = vld [vmem:[#allocation63_spill] sm:$0xff] }
 0x7dd   : > { %v3453_v47 = vmul.f32 %v4702_v5, %v4698_v12  ;;  %3647 = vmatprep.subr.mxu1 %v8792_v22  ;;  %3718 = vmatprep.subr.mxu0 %v8793_v56  ;;  %v8799_v5 = vld [vmem:[#allocation64_spill] sm:$0xff]  ;;  %v8800_v56 = vld [vmem:[#allocation65_spill] sm:$0xff] }
 0x7de   : > { %v4704_v3 = vpop.eup %4703  ;;  %3648 = vmatpush1.msra.mxu1 %v8794_v30  ;;  %3719 = vmatpush1.msra.mxu0 %v8795_v53  ;;  %v8802_v53 = vld [vmem:[#allocation67_spill] sm:$0xff] }
 0x7df   : > { %v3452_v59 = vmul.f32 %v4704_v3, %v7315_v11  ;;  %3649 = vmatprep.subr.mxu1 %v7303_v37  ;;  %3720 = vmatprep.subr.mxu0 %v8796_v57  ;;  %v8803_v11 = vld [vmem:[#allocation68_spill] sm:$0xff]  ;;  %v8804_v3 = vld [vmem:[#allocation69_spill] sm:$0xff] }
 0x7e0   : > { %3650 = vmatpush1.msra.mxu1 %v8797_v49  ;;  %3721 = vmatpush1.msra.mxu0 %v8798_v29  ;;  %v8805_v49 = vld [vmem:[#allocation70_spill] sm:$0xff]  ;;  %v8806_v29 = vld [vmem:[#allocation71_spill] sm:$0xff] }
 0x7e1   : > { %v7546_v12 = vadd.f32 %v3453_v47, %v3452_v59  ;;  %3651 = vmatprep.subr.mxu1 %v8799_v5  ;;  %3722 = vmatprep.subr.mxu0 %v8800_v56  ;;  %v8807_v59 = vld [vmem:[#allocation72_spill] sm:$0xff]  ;;  %v8808_v47 = vld [vmem:[#allocation73_spill] sm:$0xff]  ;;  %v8809_v56 = vld [vmem:[#allocation74_spill] sm:$0xff] }
 0x7e2   : > { %3652 = vmatpush1.msra.mxu1 %v8801_v48  ;;  %3723 = vmatpush1.msra.mxu0 %v8802_v53  ;;  %v8811_v48 = vld [vmem:[#allocation21_spill] sm:$0xff]  ;;  %v8812_v53 = vld [vmem:[#allocation23_spill] sm:$0xff]  ;;  %v8815_v5 = vld [vmem:[#allocation108_spill] sm:$0xff] }
 0x7e3   : > { %3653 = vmatprep.subr.mxu1 %v8803_v11  ;;  %3724 = vmatprep.subr.mxu0 %v8804_v3  ;;  %4707 = vtanh.f32 %v7546_v12  ;;  %v8813_v11 = vld [vmem:[#allocation24_spill] sm:$0xff]  ;;  %v8814_v3 = vld [vmem:[#allocation22_spill] sm:$0xff] }
 0x7e4   : > { %3654 = vmatpush1.msra.mxu1 %v8805_v49  ;;  %3725 = vmatpush1.msra.mxu0 %v8806_v29  ;;  %v8816_v49 = vld [vmem:[#allocation110_spill] sm:$0xff]  ;;  %v8817_v29 = vld [vmem:[#allocation111_spill] sm:$0xff] }
 0x7e5   : > { %3655 = vmatprep.subr.mxu1 %v8807_v59  ;;  %3726 = vmatprep.subr.mxu0 %v8808_v47  ;;  %v8818_v59 = vld [vmem:[#allocation109_spill] sm:$0xff]  ;;  %v8819_v47 = vld [vmem:[#allocation118_spill] sm:$0xff] }
 0x7e6   : > { %3656 = vmatpush1.msra.mxu1 %v8809_v56  ;;  %3727 = vmatpush1.msra.mxu0 %v8810_v2  ;;  %v8820_v56 = vld [vmem:[#allocation120_spill] sm:$0xff]  ;;  %v8821_v2 = vld [vmem:[#allocation122_spill] sm:$0xff] }
 0x7e7   : > { %3657 = vmatprep.subr.mxu1 %v8811_v48  ;;  %3728 = vmatprep.subr.mxu0 %v8812_v53  ;;  %v8822_v48 = vld [vmem:[#allocation123_spill] sm:$0xff]  ;;  %v8823_v53 = vld [vmem:[#allocation124_spill] sm:$0xff] }
 0x7e8   : > { %3658 = vmatpush1.msra.mxu1 %v8813_v11  ;;  %3729 = vmatpush1.msra.mxu0 %v8814_v3  ;;  %v8824_v11 = vld [vmem:[#allocation125_spill] sm:$0xff]  ;;  %v8825_v3 = vld [vmem:[#allocation126_spill] sm:$0xff] }
 0x7e9   : > { %3659 = vmatprep.subr.mxu1 %v8815_v5  ;;  %3730 = vmatprep.subr.mxu0 %v8816_v49  ;;  %v8826_v5 = vld [vmem:[#allocation127_spill] sm:$0xff]  ;;  %v4706_v49 = vpop.eup %4705 }
 0x7ea   : > { %3660 = vmatpush1.msra.mxu1 %v8817_v29  ;;  %3731 = vmatpush1.msra.mxu0 %v8818_v59  ;;  %v8827_v29 = vld [vmem:[#allocation128_spill] sm:$0xff]  ;;  %v8828_v59 = vld [vmem:[#allocation130_spill] sm:$0xff] }
 0x7eb   : > { %3661 = vmatprep.subr.mxu1 %v8819_v47  ;;  %3732 = vmatprep.subr.mxu0 %v8820_v56  ;;  %v8829_v56 = vld [vmem:[#allocation131_spill] sm:$0xff] }
 0x7ec   : > { %3662 = vmatpush1.msra.mxu1 %v8821_v2  ;;  %3733 = vmatpush1.msra.mxu0 %v8822_v48  ;;  %v8830_v2 = vld [vmem:[#allocation132_spill] sm:$0xff] }
 0x7ed   : > { %3663 = vmatprep.subr.mxu1 %v8823_v53  ;;  %3734 = vmatprep.subr.mxu0 %v8824_v11 }
 0x7ee   : > { %3664 = vmatpush1.msra.mxu1 %v8825_v3  ;;  %3735 = vmatpush1.msra.mxu0 %v8826_v5 }
 0x7ef   : > { %3665 = vmatprep.subr.mxu1 %v8827_v29  ;;  %3736 = vmatprep.subr.mxu0 %v7405_v54 }
 0x7f0   : > { %v4708_v47 = vpop.eup %4707  ;;  %3666 = vmatpush1.msra.mxu1 %v8828_v59  ;;  %3737 = vmatpush1.msra.mxu0 %v8829_v56 }
 0x7f1   : > { %3667 = vmatprep.subr.mxu1 %v8830_v2  ;;  %3738 = vmatprep.subr.mxu0 %v7417_v14  ;;  %v7583_v53 = vmul.f32 %v4708_v47, %v4706_v49  ;;  %v8856_v49 = vld [vmem:[#allocation32_spill] sm:$0xff]  ;;  %v8857_v47 = vld [vmem:[#allocation33_spill] sm:$0xff] }
 0x7f2   : > { %3668 = vmatpush1.msra.mxu1 %v7420_v8  ;;  %3701 = vmatprep.mubr.f32.mxu1 %v8226_v28 }
 0x7f3   : > { %3739 = vmatpush1.msra.mxu0 %v7424_v21  ;;  %3772 = vmatprep.mubr.f32.mxu0 %v8226_v28  ;;  %v3457_v54 = vmax.f32 %v7431_v52, %v7583_v53  ;;  %v8917_v52 = vld [vmem:[#allocation89_spill] sm:$0xff] }
 0x7f4   : > { %3702 = vmatmul.mubr.f32.vlgmr.msra.gmra.mxu1 %v7583_v53  ;;  %3773 = vmatmul.mubr.f32.vlgmr.msra.gmra.mxu0 %v7583_v53 }
 0x7f5   : > { %3812 = vmatprep.subr.mxu1 %v7019_v20  ;;  %3883 = vmatprep.subr.mxu0 %v7022_v62  ;;  %v8831_v20 = vld [vmem:[#allocation17_spill] sm:$0xff]  ;;  %v8832_v62 = vld [vmem:[#allocation19_spill] sm:$0xff] }
 0x7f6   : > { %3813 = vmatpush1.msra.mxu1 %v7025_v25  ;;  %3884 = vmatpush1.msra.mxu0 %v7028_v15  ;;  %v8833_v25 = vld [vmem:[#allocation20_spill] sm:$0xff]  ;;  %v8834_v15 = vld [vmem:[#allocation18_spill] sm:$0xff] }
 0x7f7   : > { %3814 = vmatprep.subr.mxu1 %v7031_v17  ;;  %3885 = vmatprep.subr.mxu0 %v7034_v13  ;;  %v8835_v17 = vld [vmem:[#allocation112_spill] sm:$0xff]  ;;  %v8836_v13 = vld [vmem:[#allocation114_spill] sm:$0xff] }
 0x7f8   : > { %3815 = vmatpush1.msra.mxu1 %v7037_v1  ;;  %3886 = vmatpush1.msra.mxu0 %v7040_v7  ;;  %v8837_v1 = vld [vmem:[#allocation115_spill] sm:$0xff]  ;;  %v8838_v7 = vld [vmem:[#allocation113_spill] sm:$0xff] }
 0x7f9   : > { %3816 = vmatprep.subr.mxu1 %v7043_v10  ;;  %3887 = vmatprep.subr.mxu0 %v7046_v41  ;;  %v8839_v10 = vld [vmem:[#allocation116_spill] sm:$0xff] }
 0x7fa   : > { %3817 = vmatpush1.msra.mxu1 %v7049_v43  ;;  %3888 = vmatpush1.msra.mxu0 %v7052_v19  ;;  %v8840_v41 = vld [vmem:[#allocation76_spill] sm:$0xff]  ;;  %v8841_v43 = vld [vmem:[#allocation77_spill] sm:$0xff]  ;;  %v8842_v19 = vld [vmem:[#allocation78_spill] sm:$0xff] }
 0x7fb   : > { %3818 = vmatprep.subr.mxu1 %v7055_v38  ;;  %3889 = vmatprep.subr.mxu0 %v7058_v44  ;;  %v8843_v38 = vld [vmem:[#allocation79_spill] sm:$0xff]  ;;  %v8844_v44 = vld [vmem:[#allocation80_spill] sm:$0xff] }
 0x7fc   : > { %3819 = vmatpush1.msra.mxu1 %v7061_v45  ;;  %3890 = vmatpush1.msra.mxu0 %v7064_v35  ;;  %v8845_v45 = vld [vmem:[#allocation81_spill] sm:$0xff] }
 0x7fd   : > { %3820 = vmatprep.subr.mxu1 %v7067_v26  ;;  %3891 = vmatprep.subr.mxu0 %v7070_v34  ;;  %v8846_v35 = vld [vmem:[#allocation117_spill] sm:$0xff]  ;;  %v8847_v26 = vld [vmem:[#allocation119_spill] sm:$0xff] }
 0x7fe   : > { %3821 = vmatpush1.msra.mxu1 %v7073_v63  ;;  %3892 = vmatpush1.msra.mxu0 %v7076_v24  ;;  %v8848_v34 = vld [vmem:[#allocation121_spill] sm:$0xff]  ;;  %v8849_v63 = vld [vmem:[#allocation147_spill] sm:$0xff]  ;;  %v8850_v24 = vld [vmem:[#allocation150_spill] sm:$0xff] }
 0x7ff   : > { %3822 = vmatprep.subr.mxu1 %v7079_v46  ;;  %3893 = vmatprep.subr.mxu0 %v7082_v55  ;;  %v8851_v46 = vld [vmem:[#allocation151_spill] sm:$0xff]  ;;  %v8852_v55 = vld [vmem:[#allocation153_spill] sm:$0xff] }
 0x800   : > { %3823 = vmatpush1.msra.mxu1 %v7085_v31  ;;  %3894 = vmatpush1.msra.mxu0 %v7088_v36  ;;  %v8853_v31 = vld [vmem:[#allocation154_spill] sm:$0xff]  ;;  %v8854_v36 = vld [vmem:[#allocation156_spill] sm:$0xff] }
 0x801   : > { %3824 = vmatprep.subr.mxu1 %v7091_v50  ;;  %3895 = vmatprep.subr.mxu0 %v8831_v20  ;;  %v8855_v50 = vld [vmem:[#allocation31_spill] sm:$0xff]  ;;  %v8858_v20 = vld [vmem:[#allocation34_spill] sm:$0xff] }
 0x802   : > { %3825 = vmatpush1.msra.mxu1 %v8832_v62  ;;  %3896 = vmatpush1.msra.mxu0 %v8833_v25  ;;  %v8859_v62 = vld [vmem:[#allocation35_spill] sm:$0xff]  ;;  %v8860_v25 = vld [vmem:[#allocation36_spill] sm:$0xff] }
 0x803   : > { %3826 = vmatprep.subr.mxu1 %v8834_v15  ;;  %3897 = vmatprep.subr.mxu0 %v8835_v17  ;;  %v8861_v15 = vld [vmem:[#allocation37_spill] sm:$0xff]  ;;  %v8862_v17 = vld [vmem:[#allocation38_spill] sm:$0xff] }
 0x804   : > { %3827 = vmatpush1.msra.mxu1 %v8836_v13  ;;  %3898 = vmatpush1.msra.mxu0 %v8837_v1  ;;  %v8863_v13 = vld [vmem:[#allocation39_spill] sm:$0xff]  ;;  %v8864_v1 = vld [vmem:[#allocation40_spill] sm:$0xff] }
 0x805   : > { %3828 = vmatprep.subr.mxu1 %v8838_v7  ;;  %3899 = vmatprep.subr.mxu0 %v8839_v10  ;;  %v8865_v7 = vld [vmem:[#allocation41_spill] sm:$0xff]  ;;  %v8866_v10 = vld [vmem:[#allocation42_spill] sm:$0xff] }
 0x806   : > { %3829 = vmatpush1.msra.mxu1 %v8840_v41  ;;  %3900 = vmatpush1.msra.mxu0 %v8841_v43  ;;  %v8867_v41 = vld [vmem:[#allocation43_spill] sm:$0xff]  ;;  %v8868_v43 = vld [vmem:[#allocation44_spill] sm:$0xff] }
 0x807   : > { %3830 = vmatprep.subr.mxu1 %v8842_v19  ;;  %3901 = vmatprep.subr.mxu0 %v8843_v38  ;;  %v8869_v19 = vld [vmem:[#allocation45_spill] sm:$0xff]  ;;  %v8870_v38 = vld [vmem:[#allocation46_spill] sm:$0xff] }
 0x808   : > { %3831 = vmatpush1.msra.mxu1 %v8844_v44  ;;  %3902 = vmatpush1.msra.mxu0 %v8845_v45  ;;  %v8871_v44 = vld [vmem:[#allocation47_spill] sm:$0xff] }
 0x809   : > { %3832 = vmatprep.subr.mxu1 %v8846_v35  ;;  %3903 = vmatprep.subr.mxu0 %v8847_v26  ;;  %v8872_v35 = vld [vmem:[#allocation84_spill] sm:$0xff] }
 0x80a   : > { %3833 = vmatpush1.msra.mxu1 %v8848_v34  ;;  %3904 = vmatpush1.msra.mxu0 %v8849_v63 }
 0x80b   : > { %3834 = vmatprep.subr.mxu1 %v8850_v24  ;;  %3905 = vmatprep.subr.mxu0 %v8851_v46  ;;  %v8873_v24 = vld [vmem:[#allocation86_spill] sm:$0xff] }
 0x80c   : > { %3835 = vmatpush1.msra.mxu1 %v8852_v55  ;;  %3906 = vmatpush1.msra.mxu0 %v8853_v31 }
 0x80d   : > { %3836 = vmatprep.subr.mxu1 %v8854_v36  ;;  %3907 = vmatprep.subr.mxu0 %v8855_v50  ;;  %v8874_v50 = vld [vmem:[#allocation87_spill] sm:$0xff] }
 0x80e   : > { %3837 = vmatpush1.msra.mxu1 %v8856_v49  ;;  %3908 = vmatpush1.msra.mxu0 %v8857_v47  ;;  %v8875_v47 = vld [vmem:[#allocation85_spill] sm:$0xff] }
 0x80f   : > { %3838 = vmatprep.subr.mxu1 %v8858_v20  ;;  %3909 = vmatprep.subr.mxu0 %v8859_v62 }
 0x810   : > { %3839 = vmatpush1.msra.mxu1 %v8860_v25  ;;  %3910 = vmatpush1.msra.mxu0 %v8861_v15 }
 0x811   : > { %3840 = vmatprep.subr.mxu1 %v8862_v17  ;;  %3911 = vmatprep.subr.mxu0 %v8863_v13 }
 0x812   : > { %3841 = vmatpush1.msra.mxu1 %v8864_v1  ;;  %3912 = vmatpush1.msra.mxu0 %v8865_v7 }
 0x813   : > { %3842 = vmatprep.subr.mxu1 %v8866_v10  ;;  %3913 = vmatprep.subr.mxu0 %v8867_v41 }
 0x814   : > { %3843 = vmatpush1.msra.mxu1 %v8868_v43  ;;  %3914 = vmatpush1.msra.mxu0 %v8869_v19  ;;  %v8876_v43 = vld [vmem:[#allocation96_spill] sm:$0xff] }
 0x815   : > { %3876 = vmatprep.mubr.f32.mxu1 %v8226_v28  ;;  %3947 = vmatprep.mubr.f32.mxu0 %v8226_v28 }
 0x816   : > { %3987 = vmatprep.subr.mxu1 %v8870_v38  ;;  %4058 = vmatprep.subr.mxu0 %v8871_v44 }
 0x893   : > { %v3528_v45 = vpop.f32.mrf.mxu1  ;;  %v3599_v55 = vpop.f32.mrf.mxu0 }
 0x894   : > { %v3604_v26 = vadd.f32 %v3528_v45, %v8872_v35  ;;  %v3606_v20 = vadd.f32 %v3599_v55, %v8875_v47  ;;  %v8879_v47 = vld [vmem:[#allocation97_spill] sm:$0xff] }
 0x895   : > { %v3530_v34 = vpop.f32.mrf.mxu1  ;;  %v3601_v36 = vpop.f32.mrf.mxu0 }
 0x896   : > { %v4344_v63 = vmul.f32 -1.442695, %v3604_v26  ;;  %v3605_v46 = vadd.f32 %v3530_v34, %v8873_v24  ;;  %v3607_v49 = vadd.f32 %v3601_v36, %v8874_v50  ;;  %v8877_v26 = vld [vmem:[#allocation98_spill] sm:$0xff]  ;;  %v8878_v50 = vld [vmem:[#allocation99_spill] sm:$0xff] }
 0x898   : > { %4709 = vpow2.f32 %v4344_v63  ;;  %v4345_v31 = vmul.f32 -1.442695, %v3605_v46  ;;  %v4346_v62 = vmul.f32 -1.442695, %v3607_v49 }
 0x89a   : > { %4711 = vpow2.f32 %v4345_v31 }
 0x89b   : > { %4713 = vtanh.f32 %v3606_v20 }
 0x89c   : > { %4715 = vpow2.f32 %v4346_v62 }
 0x8a5   : > { %v4710_v25 = vpop.eup %4709 }
 0x8a6   : > { %v3611_v15 = vadd.f32 1.0, %v4710_v25 }
 0x8a7   : > { %v4712_v17 = vpop.eup %4711 }
 0x8a8   : > { %4717 = vrcp.f32 %v3611_v15  ;;  %v3617_v13 = vadd.f32 1.0, %v4712_v17  ;;  %v4714_v1 = vpop.eup %4713 }
 0x8a9   : > { %v4716_v7 = vpop.eup %4715 }
 0x8aa   : > { %4719 = vrcp.f32 %v3617_v13  ;;  %v3624_v24 = vadd.f32 1.0, %v4716_v7 }
 0x8b4   : > { %v3703_v10 = vpop.f32.mrf.mxu1  ;;  %v3774_v46 = vpop.f32.mrf.mxu0 }
 0x8b5   : > { %v4718_v41 = vpop.eup %4717  ;;  %v3779_v19 = vadd.f32 %v3703_v10, %v8876_v43  ;;  %v3781_v20 = vadd.f32 %v3774_v46, %v8879_v47  ;;  %v8880_v10 = vmax.f32 %v7234_v39, %v7513_v27  ;;  %v8890_v43 = vld [vmem:[#allocation65_spill] sm:$0xff]  ;;  %v8904_v46 = vld [vmem:[#allocation22_spill] sm:$0xff] }
 0x8b6   : > { %v3628_v38 = vmul.f32 %v4718_v41, %v4714_v1  ;;  %v3705_v44 = vpop.f32.mrf.mxu1  ;;  %v3776_v36 = vpop.f32.mrf.mxu0  ;;  %v8909_v47 = vld [vmem:[#allocation118_spill] sm:$0xff] }
 0x8b7   : > { %v4720_v45 = vpop.eup %4719  ;;  %v4347_v35 = vmul.f32 -1.442695, %v3779_v19  ;;  %v3780_v34 = vadd.f32 %v3705_v44, %v8877_v26  ;;  %v3782_v49 = vadd.f32 %v3776_v36, %v8878_v50  ;;  %v8892_v19 = vld [vmem:[#allocation67_spill] sm:$0xff]  ;;  %v8897_v44 = vld [vmem:[#allocation72_spill] sm:$0xff]  ;;  %v8906_v36 = vld [vmem:[#allocation110_spill] sm:$0xff] }
 0x8b8   : > { %v3627_v63 = vmul.f32 %v4720_v45, %v7508_v9  ;;  %v8898_v45 = vld [vmem:[#allocation73_spill] sm:$0xff]  ;;  %v8900_v26 = vld [vmem:[#allocation75_spill] sm:$0xff] }
 0x8b9   : > { %4721 = vpow2.f32 %v4347_v35  ;;  %v4348_v55 = vmul.f32 -1.442695, %v3780_v34  ;;  %v4349_v62 = vmul.f32 -1.442695, %v3782_v49  ;;  %v8899_v35 = vld [vmem:[#allocation74_spill] sm:$0xff]  ;;  %v8901_v34 = vld [vmem:[#allocation21_spill] sm:$0xff] }
 0x8ba   : > { %v7668_v31 = vadd.f32 %v3628_v38, %v3627_v63  ;;  %v8896_v38 = vld [vmem:[#allocation71_spill] sm:$0xff]  ;;  %v8908_v49 = vld [vmem:[#allocation109_spill] sm:$0xff] }
 0x8bb   : > { %4723 = vpow2.f32 %v4348_v55  ;;  %v8902_v63 = vld [vmem:[#allocation23_spill] sm:$0xff]  ;;  %v8905_v55 = vld [vmem:[#allocation108_spill] sm:$0xff] }
 0x8bc   : > { %4725 = vrcp.f32 %v3624_v24  ;;  %v8903_v24 = vld [vmem:[#allocation24_spill] sm:$0xff]  ;;  %v8907_v50 = vld [vmem:[#allocation111_spill] sm:$0xff] }
 0x8bd   : > { %4727 = vtanh.f32 %v7668_v31 }
 0x8be   : > { %4729 = vtanh.f32 %v3781_v20  ;;  %v8910_v20 = vld [vmem:[#allocation120_spill] sm:$0xff] }
 0x8bf   : > { %4731 = vpow2.f32 %v4349_v62  ;;  %v8911_v62 = vld [vmem:[#allocation122_spill] sm:$0xff] }
 0x8c6   : > { %v4722_v25 = vpop.eup %4721 }
 0x8c7   : > { %v3786_v15 = vadd.f32 1.0, %v4722_v25  ;;  %v8912_v25 = vld [vmem:[#allocation124_spill] sm:$0xff] }
 0x8c8   : > { %v4724_v9 = vpop.eup %4723 }
 0x8c9   : > { %v4726_v17 = vpop.eup %4725  ;;  %4733 = vrcp.f32 %v3786_v15  ;;  %v3792_v13 = vadd.f32 1.0, %v4724_v9  ;;  %v8913_v9 = vld [vmem:[#allocation129_spill] sm:$0xff] }
 0x8ca   : > { %v4728_v1 = vpop.eup %4727 }
 0x8cb   : > { %4735 = vrcp.f32 %v3792_v13  ;;  %v3631_v7 = vmul.f32 %v4728_v1, %v4726_v17  ;;  %v4730_v39 = vpop.eup %4729 }
 0x8cd   : > { %v7676_v41 = vmax.f32 %v8880_v10, %v3631_v7  ;;  %3877 = vmatmul.mubr.f32.vlgmr.msra.gmra.mxu1 %v3631_v7  ;;  %3948 = vmatmul.mubr.f32.vlgmr.msra.gmra.mxu0 %v3631_v7 }
 0x8ce   : > { %3988 = vmatpush1.msra.mxu1 %v7236_v58  ;;  %4059 = vmatpush1.msra.mxu0 %v7239_v0  ;;  %v4732_v58 = vpop.eup %4731  ;;  %v8881_v0 = vld [vmem:[#allocation53_spill] sm:$0xff] }
 0x8cf   : > { %3989 = vmatprep.subr.mxu1 %v7242_v60  ;;  %4060 = vmatprep.subr.mxu0 %v7245_v42  ;;  %v8882_v60 = vld [vmem:[#allocation54_spill] sm:$0xff]  ;;  %v3799_v27 = vadd.f32 1.0, %v4732_v58 }
 0x8d0   : > { %3990 = vmatpush1.msra.mxu1 %v7248_v61  ;;  %4061 = vmatpush1.msra.mxu0 %v7251_v33  ;;  %v8883_v61 = vld [vmem:[#allocation55_spill] sm:$0xff]  ;;  %v8884_v33 = vld [vmem:[#allocation56_spill] sm:$0xff] }
 0x8d1   : > { %3991 = vmatprep.subr.mxu1 %v7254_v40  ;;  %4062 = vmatprep.subr.mxu0 %v7257_v32  ;;  %v8885_v32 = vld [vmem:[#allocation58_spill] sm:$0xff]  ;;  %4737 = vrcp.f32 %v3799_v27 }
 0x8d2   : > { %3992 = vmatpush1.msra.mxu1 %v7260_v4  ;;  %4063 = vmatpush1.msra.mxu0 %v8784_v16  ;;  %v8886_v16 = vld [vmem:[#allocation60_spill] sm:$0xff] }
 0x8d3   : > { %3993 = vmatprep.subr.mxu1 %v8785_v23  ;;  %4064 = vmatprep.subr.mxu0 %v8786_v6  ;;  %v8887_v6 = vld [vmem:[#allocation62_spill] sm:$0xff] }
 0x8d4   : > { %3994 = vmatpush1.msra.mxu1 %v8787_v18  ;;  %4065 = vmatpush1.msra.mxu0 %v8788_v51  ;;  %v8888_v18 = vld [vmem:[#allocation63_spill] sm:$0xff] }
 0x8d5   : > { %3995 = vmatprep.subr.mxu1 %v8881_v0  ;;  %4066 = vmatprep.subr.mxu0 %v8882_v60 }
 0x8d6   : > { %v4734_v42 = vpop.eup %4733  ;;  %3996 = vmatpush1.msra.mxu1 %v8883_v61  ;;  %4067 = vmatpush1.msra.mxu0 %v8884_v33  ;;  %v8918_v33 = vld [vmem:[#allocation92_spill] sm:$0xff] }
 0x8d7   : > { %v3803_v40 = vmul.f32 %v4734_v42, %v4730_v39  ;;  %3997 = vmatprep.subr.mxu1 %v8792_v22  ;;  %4068 = vmatprep.subr.mxu0 %v8885_v32  ;;  %v8889_v22 = vld [vmem:[#allocation64_spill] sm:$0xff] }
 0x8d8   : > { %v4736_v4 = vpop.eup %4735  ;;  %3998 = vmatpush1.msra.mxu1 %v8794_v30  ;;  %4069 = vmatpush1.msra.mxu0 %v8886_v16  ;;  %v8891_v30 = vld [vmem:[#allocation66_spill] sm:$0xff] }
 0x8d9   : > { %v3802_v23 = vmul.f32 %v4736_v4, %v7546_v12  ;;  %3999 = vmatprep.subr.mxu1 %v7303_v37  ;;  %4070 = vmatprep.subr.mxu0 %v8796_v57  ;;  %v8893_v12 = vld [vmem:[#allocation68_spill] sm:$0xff]  ;;  %v8894_v37 = vld [vmem:[#allocation69_spill] sm:$0xff]  ;;  %v8895_v57 = vld [vmem:[#allocation70_spill] sm:$0xff] }
 0x8da   : > { %4000 = vmatpush1.msra.mxu1 %v8887_v6  ;;  %4071 = vmatpush1.msra.mxu0 %v8888_v18  ;;  %v8919_v6 = vld [vmem:[#allocation94_spill] sm:$0xff] }
 0x8db   : > { %v7705_v51 = vadd.f32 %v3803_v40, %v3802_v23  ;;  %4001 = vmatprep.subr.mxu1 %v8889_v22  ;;  %4072 = vmatprep.subr.mxu0 %v8890_v43 }
 0x8dc   : > { %4002 = vmatpush1.msra.mxu1 %v8891_v30  ;;  %4073 = vmatpush1.msra.mxu0 %v8892_v19 }
 0x8dd   : > { %4003 = vmatprep.subr.mxu1 %v8893_v12  ;;  %4074 = vmatprep.subr.mxu0 %v8894_v37  ;;  %4739 = vtanh.f32 %v7705_v51  ;;  %v8920_v37 = vld [vmem:[#allocation95_spill] sm:$0xff] }
 0x8de   : > { %4004 = vmatpush1.msra.mxu1 %v8895_v57  ;;  %4075 = vmatpush1.msra.mxu0 %v8896_v38  ;;  %v4738_v15 = vpop.eup %4737  ;;  %v8921_v38 = vld [vmem:[#allocation93_spill] sm:$0xff] }
 0x8df   : > { %4005 = vmatprep.subr.mxu1 %v8897_v44  ;;  %4076 = vmatprep.subr.mxu0 %v8898_v45 }
 0x8e0   : > { %4006 = vmatpush1.msra.mxu1 %v8899_v35  ;;  %4077 = vmatpush1.msra.mxu0 %v8900_v26 }
 0x8e1   : > { %4007 = vmatprep.subr.mxu1 %v8901_v34  ;;  %4078 = vmatprep.subr.mxu0 %v8902_v63 }
 0x8e2   : > { %4008 = vmatpush1.msra.mxu1 %v8903_v24  ;;  %4079 = vmatpush1.msra.mxu0 %v8904_v46 }
 0x8e3   : > { %4009 = vmatprep.subr.mxu1 %v8905_v55  ;;  %4080 = vmatprep.subr.mxu0 %v8906_v36 }
 0x8e4   : > { %4010 = vmatpush1.msra.mxu1 %v8907_v50  ;;  %4081 = vmatpush1.msra.mxu0 %v8908_v49 }
 0x8e5   : > { %4011 = vmatprep.subr.mxu1 %v8909_v47  ;;  %4082 = vmatprep.subr.mxu0 %v8910_v20 }
 0x8e6   : > { %4012 = vmatpush1.msra.mxu1 %v8911_v62  ;;  %4083 = vmatpush1.msra.mxu0 %v8822_v48 }
 0x8e7   : > { %4013 = vmatprep.subr.mxu1 %v8912_v25  ;;  %4084 = vmatprep.subr.mxu0 %v8824_v11 }
 0x8e8   : > { %4014 = vmatpush1.msra.mxu1 %v8825_v3  ;;  %4085 = vmatpush1.msra.mxu0 %v8826_v5  ;;  %v8914_v5 = vld [vmem:[#allocation88_spill] sm:$0xff] }
 0x8e9   : > { %4015 = vmatprep.subr.mxu1 %v8827_v29  ;;  %4086 = vmatprep.subr.mxu0 %v8913_v9 }
 0x8ea   : > { %v4740_v17 = vpop.eup %4739  ;;  %4016 = vmatpush1.msra.mxu1 %v8828_v59  ;;  %4087 = vmatpush1.msra.mxu0 %v8829_v56  ;;  %v8915_v59 = vld [vmem:[#allocation90_spill] sm:$0xff] }
 0x8eb   : > { %4017 = vmatprep.subr.mxu1 %v8830_v2  ;;  %4088 = vmatprep.subr.mxu0 %v7417_v14  ;;  %v3806_v48 = vmul.f32 %v4740_v17, %v4738_v15 }
 0x8ec   : > { %4018 = vmatpush1.msra.mxu1 %v7420_v8  ;;  %4051 = vmatprep.mubr.f32.mxu1 %v8226_v28 }
 0x8ed   : > { %4089 = vmatpush1.msra.mxu0 %v7424_v21  ;;  %4122 = vmatprep.mubr.f32.mxu0 %v8226_v28  ;;  %v7749_v29 = vmax.f32 %v3457_v54, %v3806_v48  ;;  %v8916_v28 = vld [vmem:[#allocation91_spill] sm:$0xff] }
 0x8ee   : > { %4052 = vmatmul.mubr.f32.vlgmr.msra.gmra.mxu1 %v3806_v48  ;;  %4123 = vmatmul.mubr.f32.vlgmr.msra.gmra.mxu0 %v3806_v48 }
 0x98d   : > { %v3878_v56 = vpop.f32.mrf.mxu1  ;;  %v3949_v2 = vpop.f32.mrf.mxu0 }
 0x98e   : > { %v3954_v11 = vadd.f32 %v3878_v56, %v8914_v5  ;;  %v3956_v54 = vadd.f32 %v3949_v2, %v8917_v52 }
 0x98f   : > { %v3880_v14 = vpop.f32.mrf.mxu1  ;;  %v3951_v21 = vpop.f32.mrf.mxu0 }
 0x990   : > { %v4350_v3 = vmul.f32 -1.442695, %v3954_v11  ;;  %v3955_v8 = vadd.f32 %v3880_v14, %v8915_v59  ;;  %v3957_v1 = vadd.f32 %v3951_v21, %v8916_v28 }
 0x992   : > { %4741 = vpow2.f32 %v4350_v3  ;;  %v4351_v13 = vmul.f32 -1.442695, %v3955_v8  ;;  %v4352_v7 = vmul.f32 -1.442695, %v3957_v1 }
 0x994   : > { %4743 = vpow2.f32 %v4351_v13 }
 0x995   : > { %4745 = vpow2.f32 %v4352_v7 }
 0x996   : > { %4747 = vtanh.f32 %v3956_v54 }
 0x99f   : > { %v4742_v53 = vpop.eup %4741 }
 0x9a0   : > { %v3961_v10 = vadd.f32 1.0, %v4742_v53 }
 0x9a1   : > { %v4744_v39 = vpop.eup %4743 }
 0x9a2   : > { %4749 = vrcp.f32 %v3961_v10  ;;  %v3967_v58 = vadd.f32 1.0, %v4744_v39  ;;  %v4746_v0 = vpop.eup %4745 }
 0x9a3   : > { %v4748_v60 = vpop.eup %4747  ;;  %v3974_v4 = vadd.f32 1.0, %v4746_v0 }
 0x9a4   : > { %4751 = vrcp.f32 %v3967_v58 }
 0x9ae   : > { %v4053_v42 = vpop.f32.mrf.mxu1  ;;  %v4124_v43 = vpop.f32.mrf.mxu0 }
 0x9af   : > { %v4750_v61 = vpop.eup %4749  ;;  %v4129_v40 = vadd.f32 %v4053_v42, %v8918_v33  ;;  %v4131_v44 = vadd.f32 %v4124_v43, %v8921_v38 }
 0x9b0   : > { %v3978_v32 = vmul.f32 %v4750_v61, %v4748_v60  ;;  %v4055_v27 = vpop.f32.mrf.mxu1  ;;  %v4126_v12 = vpop.f32.mrf.mxu0 }
 0x9b1   : > { %v4752_v16 = vpop.eup %4751  ;;  %v4353_v23 = vmul.f32 -1.442695, %v4129_v40  ;;  %v4130_v18 = vadd.f32 %v4055_v27, %v8919_v6  ;;  %v4132_v57 = vadd.f32 %v4126_v12, %v8920_v37 }
 0x9b2   : > { %v3977_v22 = vmul.f32 %v4752_v16, %v7668_v31 }
 0x9b3   : > { %4753 = vpow2.f32 %v4353_v23  ;;  %v4354_v30 = vmul.f32 -1.442695, %v4130_v18  ;;  %v4355_v45 = vmul.f32 -1.442695, %v4132_v57 }
 0x9b4   : > { %v3979_v19 = vadd.f32 %v3978_v32, %v3977_v22  ;;  %4755 = vrcp.f32 %v3974_v4 }
 0x9b5   : > { %4757 = vpow2.f32 %v4354_v30 }
 0x9b6   : > { %4759 = vtanh.f32 %v3979_v19 }
 0x9b7   : > { %4761 = vtanh.f32 %v4131_v44 }
 0x9b8   : > { %4763 = vpow2.f32 %v4355_v45 }
 0x9c0   : > { %v4754_v35 = vpop.eup %4753 }
 0x9c1   : > { %v4756_v26 = vpop.eup %4755  ;;  %v4136_v34 = vadd.f32 1.0, %v4754_v35 }
 0x9c2   : > { %v4758_v63 = vpop.eup %4757 }
 0x9c3   : > { %v4760_v31 = vpop.eup %4759  ;;  %4765 = vrcp.f32 %v4136_v34  ;;  %v4142_v24 = vadd.f32 1.0, %v4758_v63 }
 0x9c4   : > { %v3981_v46 = vmul.f32 %v4760_v31, %v4756_v26  ;;  %v4762_v36 = vpop.eup %4761 }
 0x9c5   : > { %4767 = vrcp.f32 %v4142_v24  ;;  %v4764_v50 = vpop.eup %4763 }
 0x9c6   : > { %v3982_v55 = vmax.f32 %v7676_v41, %v3981_v46  ;;  %v4149_v62 = vadd.f32 1.0, %v4764_v50 }
 0x9c8   : > { %4769 = vtanh.f32 %v3982_v55 }
 0x9c9   : > { %4771 = vrcp.f32 %v4149_v62 }
 0x9d0   : > { %v4766_v49 = vpop.eup %4765 }
 0x9d1   : > { %v4153_v47 = vmul.f32 %v4766_v49, %v4762_v36 }
 0x9d2   : > { %v4768_v20 = vpop.eup %4767 }
 0x9d3   : > { %v4152_v25 = vmul.f32 %v4768_v20, %v7705_v51 }
 0x9d5   : > { %v4770_v15 = vpop.eup %4769  ;;  %v4154_v9 = vadd.f32 %v4153_v47, %v4152_v25 }
 0x9d6   : > { %4159 = vst [vmem:[%s358_s19] sm:$0xff] %v4770_v15  ;;  %v4772_v41 = vpop.eup %4771 }
 0x9d7   : > { %4773 = vtanh.f32 %v4154_v9 }
 0x9e4   : > { %v4774_v17 = vpop.eup %4773 }
 0x9e5   : > { %v4156_v48 = vmul.f32 %v4774_v17, %v4772_v41 }
 0x9e7   : > { %v4157_v56 = vmax.f32 %v7749_v29, %v4156_v48 }
 0x9e9   : > { %4775 = vtanh.f32 %v4157_v56 }
 0x9f6   : > { %v4776_v51 = vpop.eup %4775 }
 0x9f7   : > { %4161 = vst [vmem:[%s358_s19 + $0x8] sm:$0xff] %v4776_v51 }
 0x9f8   : > { %5150 = shalt.err (!%p5147_p11)
}
 0x9f9   : > { %s5151_s9 = scalar_lea.hbm %s7768_s13, 256  ;;  %s5155_s19 = scalar_lea.hbm %s7811_s8, 512 }
 0x9fa   : > { %p5152_p0 = scmp.ne.s32.totalorder %s7768_s13, %s5151_s9  ;;  %p5156_p3 = scmp.lt.s32.totalorder %s7768_s13, %s7811_s8 }
 0x9fb   : > { %p5157_p10 = scmp.lt.s32.totalorder %s5155_s19, %s5151_s9 }
 0x9fc   : > { %p5153_p2 = pnand %p5152_p0, %p5304_p5 }
 0x9fd   : > { %p5158_p9 = por %p5157_p10, %p5156_p3 }
 0x9fe   : > { %p5154_p1 = pneg %p5153_p2 }
 0xa00   : > { %p5159_p12 = pnand %p5158_p9, %p5154_p1 }
 0xa02   : > { %5162 = shalt.err (!%p5159_p12)
}
 0xa03   : > { %4446 = dma.vmem_to_hbm [thread:$0]  (%p5304_p5), %s4178_s23, 256, %s7768_s13, %s4163_s18  }
 0xa04 PF: > { %p4473_p13 = scmp.ge.s32.totalorder %s5209_s30, 2  ;;  %s4189_s22 = sand.u32 1, %s5197_s27  }
 0xa05   : > { %s4190_s24 = scalar_lea.sflag [#allocation6], %s4189_s22 }
 0xa06   : > { %p4462_p4 = pnand %p4473_p13, %p5308_p6 }
 0xa08   : > { %p4463_p7 = pneg %p4462_p4 }
 0xa0a   : > { %5192 = dma.done.wait (%p4463_p7), %s4190_s24, 256  }
 0xa0b   : > { %5194 = vsyncadd (%p4463_p7), %s4190_s24, 4294967040  ;;  %p21_p8 = scmp.ge.s32.totalorder %s5291_s11, 4   ;;  %s8922_s27 = smov %s5201_s28 }
 0xa0c   : > { %s8923_s28 = smov %s5205_s29  ;;  %s8924_s29 = smov %s5302_s14 }
 0xa0d   : > { %s8925_s30 = smov %s5291_s11  ;;  %23 = sbr.rel (!%p21_p8) target bundleno = 6 (0x6), region = 104 }
 0xa12   :  { %4195 = vsyncpa [#allocation5], 1 }
 0xa13   :  { %4197 = vsyncpa [#allocation5 + $0x1], 1 }
 0xa14   :  { %4198 = vsyncpa [#allocation8], 1 }
 0xa15   :  { %4199 = vsyncpa [#allocation11], 1 }
 0xa16   :  { %4200 = vsyncpa [#allocation6], 1 }
 0xa17   :  { %4202 = vsyncpa [#allocation6 + $0x1], 1 }

</bundles_post_ra>
